<compile_context>
chip_gen: v7x
topology: tpu7x:2x2x1
jax: 0.10.0
libtpu: 0.0.40
codegen_flags: <defaults>
</compile_context>

<pallas_src>
import numpy as np
import jax
import jax.numpy as jnp
from jax import lax
from jax.experimental import pallas as pl
from jax.experimental.pallas import tpu as pltpu


# ----------------------------------------------------------------------------
# Host-side (one-time) weight transform: stride-2 VALID conv -> dense matrix.
# ----------------------------------------------------------------------------
def conv_to_dense(w, b, h_in, w_in, stride):
    """w: (Cout, Cin, K, K), b: (Cout,). Returns (dense, bias, h_out, w_out).

    dense has shape (Cin*h_in*w_in, Cout*h_out*w_out) and satisfies
        conv(x, w)[co, ho, wo] == (x.reshape(-1) @ dense)[(co*h_out+ho)*w_out+wo]
    i.e. flatten orders match PyTorch's NCHW .reshape(B, -1).
    """
    w = np.asarray(w, dtype=np.float32)
    b = np.asarray(b, dtype=np.float32)
    c_out, c_in, kh, kw = w.shape
    h_out = (h_in - kh) // stride + 1
    w_out = (w_in - kw) // stride + 1

    dense = np.zeros((c_in, h_in, w_in, c_out, h_out, w_out), dtype=np.float32)
    ho = np.arange(h_out)
    wo = np.arange(w_out)
    for i in range(kh):
        for j in range(kw):
            hi = ho * stride + i                       # (h_out,)
            wi = wo * stride + j                       # (w_out,)
            # dense[ci, hi[a], wi[b], co, a, b] = w[co, ci, i, j]
            dense[:, hi[:, None], wi[None, :], :, ho[:, None], wo[None, :]] = \
                w[:, :, i, j].T                        # (c_in, c_out)
    dense = dense.reshape(c_in * h_in * w_in, c_out * h_out * w_out)
    bias = np.repeat(b, h_out * w_out)                 # (co, ho, wo) flatten order
    return dense, bias, h_out, w_out


def round_up(n, m):
    return ((n + m - 1) // m) * m


def pad2d(a, rows, cols):
    out = np.zeros((rows, cols), dtype=np.float32)
    out[: a.shape[0], : a.shape[1]] = a
    return out


def pad1d(a, n):
    out = np.zeros((n,), dtype=np.float32)
    out[: a.shape[0]] = a
    return out


# ----------------------------------------------------------------------------
# Pallas kernel: the whole encoder forward for one batch tile.
# ----------------------------------------------------------------------------
def encoder_kernel(x_ref, w1_ref, b1_ref, w2_ref, b2_ref, w3_ref, b3_ref,
                   wh_ref, bh_ref, mean_ref, logvar_ref):
    def dense_relu(h, w_ref, b_ref):
        y = jnp.dot(h, w_ref[...], preferred_element_type=jnp.float32) + b_ref[...]
        return jnp.maximum(y, 0.0)

    h = x_ref[...]                                     # (Bt, Cin*H*W)
    h = dense_relu(h, w1_ref, b1_ref)                  # (Bt, pad(F*13*13))   conv1+relu
    h = dense_relu(h, w2_ref, b2_ref)                  # (Bt, pad(2F*6*6))    conv2+relu
    h = dense_relu(h, w3_ref, b3_ref)                  # (Bt, pad(4F*2*2))    conv3+relu
    # Fused heads: one MXU matmul producing [mean | logvar].
    ml = jnp.dot(h, wh_ref[...], preferred_element_type=jnp.float32) + bh_ref[...]
    cd = mean_ref.shape[-1]
    mean_ref[...] = ml[:, :cd]
    logvar_ref[...] = ml[:, cd:2 * cd]


# ----------------------------------------------------------------------------
# Wrapper.
# ----------------------------------------------------------------------------
def mnist_conv_encoder_forward(x, params, *, batch_tile=None):
    """x: (B, 1, H, W) f32; params = (w1,b1,w2,b2,w3,b3,wm,bm,wl,bl) as in PyTorch."""
    w1, b1, w2, b2, w3, b3, wm, bm, wl, bl = params
    B, c_in, H, W = x.shape

    d1, db1, H1, W1 = conv_to_dense(w1, b1, H, W, stride=2)
    d2, db2, H2, W2 = conv_to_dense(w2, b2, H1, W1, stride=2)
    d3, db3, H3, W3 = conv_to_dense(w3, b3, H2, W2, stride=2)

    flat_dim = d3.shape[1]
    code_dim = int(np.asarray(wm).shape[0])
    assert np.asarray(wm).shape[1] == flat_dim and np.asarray(wl).shape[1] == flat_dim

    # Pad hidden column dims up to lane multiples of 128 (zero columns are inert
    # through bias + relu and matching zero rows of the next matrix).
    p1 = round_up(d1.shape[1], 128)
    p2 = round_up(d2.shape[1], 128)
    p3 = round_up(d3.shape[1], 128)

    d1p = pad2d(d1, d1.shape[0], p1); db1p = pad1d(db1, p1)
    d2p = pad2d(d2, p1, p2);          db2p = pad1d(db2, p2)
    d3p = pad2d(d3, p2, p3);          db3p = pad1d(db3, p3)

    # Fuse the two Linear heads into one matmul: columns = [mean | logvar].
    wh = np.concatenate([np.asarray(wm, np.float32).T,
                         np.asarray(wl, np.float32).T], axis=1)    # (flat, 2*cd)
    bh = np.concatenate([np.asarray(bm, np.float32),
                         np.asarray(bl, np.float32)])              # (2*cd,)
    whp = pad2d(wh, p3, 2 * code_dim)

    x_flat = x.reshape(B, c_in * H * W).astype(jnp.float32)

    args = (
        x_flat,
        jnp.asarray(d1p), jnp.asarray(db1p)[None, :],
        jnp.asarray(d2p), jnp.asarray(db2p)[None, :],
        jnp.asarray(d3p), jnp.asarray(db3p)[None, :],
        jnp.asarray(whp), jnp.asarray(bh)[None, :],
    )

    bt = B if batch_tile is None else batch_tile
    assert B % bt == 0 and (bt == B or bt % 8 == 0), \
        "batch_tile must divide B (and be 8-aligned when smaller than B)"
    grid = (B // bt,)

    def batch_spec(n_cols):
        return pl.BlockSpec((bt, n_cols), lambda i: (i, 0))

    def resident_spec(shape):
        # Same block every grid step -> weights stay resident in VMEM.
        return pl.BlockSpec(shape, lambda i: (0, 0))

    in_specs = [batch_spec(c_in * H * W)]
    for a in args[1:]:
        in_specs.append(resident_spec(a.shape))

    out_shape = (jax.ShapeDtypeStruct((B, code_dim), jnp.float32),
                 jax.ShapeDtypeStruct((B, code_dim), jnp.float32))
    out_specs = (batch_spec(code_dim), batch_spec(code_dim))

    return pl.pallas_call(
        encoder_kernel,
        grid=grid,
        in_specs=in_specs,
        out_specs=out_specs,
        out_shape=out_shape,
        compiler_params=pltpu.CompilerParams(
            dimension_semantics=("parallel",),
        ),
    )(*args)


# ----------------------------------------------------------------------------
# Pure-JAX reference mirroring the PyTorch forward exactly.
# ----------------------------------------------------------------------------
def encoder_reference(x, params):
    w1, b1, w2, b2, w3, b3, wm, bm, wl, bl = params
    hp = lax.Precision.HIGHEST

    def conv(h, w, b, stride):
        y = lax.conv_general_dilated(
            h, w, window_strides=(stride, stride), padding="VALID",
            dimension_numbers=("NCHW", "OIHW", "NCHW"), precision=hp)
        return y + b[None, :, None, None]

    h = jax.nn.relu(conv(x, w1, b1, 2))
    h = jax.nn.relu(conv(h, w2, b2, 2))
    h = jax.nn.relu(conv(h, w3, b3, 2))
    h = h.reshape(x.shape[0], -1)
    mean = jnp.dot(h, wm.T, precision=hp) + bm
    logvar = jnp.dot(h, wl.T, precision=hp) + bl
    return mean, logvar


if __name__ == "__main__":
    feature_dim, code_dim = 4, 8
    B, H, W = 2, 28, 28   # MNIST-sized input so the flattened dim is 2*2*4*feature_dim

    key = jax.random.PRNGKey(0)
    ks = jax.random.split(key, 11)

    def rnd(k, shape, scale):
        return scale * jax.random.normal(k, shape, dtype=jnp.float32)

    w1 = rnd(ks[0], (feature_dim, 1, 4, 4), 0.25)
    b1 = rnd(ks[1], (feature_dim,), 0.1)
    w2 = rnd(ks[2], (2 * feature_dim, feature_dim, 3, 3), 0.17)
    b2 = rnd(ks[3], (2 * feature_dim,), 0.1)
    w3 = rnd(ks[4], (4 * feature_dim, 2 * feature_dim, 4, 4), 0.09)
    b3 = rnd(ks[5], (4 * feature_dim,), 0.1)
    wm = rnd(ks[6], (code_dim, 2 * 2 * 4 * feature_dim), 0.12)
    bm = rnd(ks[7], (code_dim,), 0.1)
    wl = rnd(ks[8], (code_dim, 2 * 2 * 4 * feature_dim), 0.12)
    bl = rnd(ks[9], (code_dim,), 0.1)
    x = jax.random.normal(ks[10], (B, 1, H, W), dtype=jnp.float32)

    params = (w1, b1, w2, b2, w3, b3, wm, bm, wl, bl)

    mean, logvar = mnist_conv_encoder_forward(x, params)
    mean, logvar = jax.block_until_ready((mean, logvar))

    mean_ref, logvar_ref = encoder_reference(x, params)
    assert mean.shape == (B, code_dim) and logvar.shape == (B, code_dim)
    # Tolerance accommodates MXU pass-precision differences between the Pallas
    # matmul chain and the XLA conv reference; real layout/bias/relu bugs give
    # O(0.1..1) errors and are still caught.
    assert jnp.allclose(mean, mean_ref, atol=1e-2, rtol=1e-2), "mean mismatch vs reference"
    assert jnp.allclose(logvar, logvar_ref, atol=1e-2, rtol=1e-2), "logvar mismatch vs reference"

    print("KERNEL_OK")
</pallas_src>

<mosaic_0001>
module attributes {stable_mosaic.version = 11 : i64} {
  func.func @encoder_kernel(%arg0: i32, %arg1: memref<2x784xf32, #tpu.memory_space<vmem>>, %arg2: memref<784x768xf32, #tpu.memory_space<vmem>>, %arg3: memref<1x768xf32, #tpu.memory_space<vmem>>, %arg4: memref<768x384xf32, #tpu.memory_space<vmem>>, %arg5: memref<1x384xf32, #tpu.memory_space<vmem>>, %arg6: memref<384x128xf32, #tpu.memory_space<vmem>>, %arg7: memref<1x128xf32, #tpu.memory_space<vmem>>, %arg8: memref<128x16xf32, #tpu.memory_space<vmem>>, %arg9: memref<1x16xf32, #tpu.memory_space<vmem>>, %arg10: memref<2x8xf32, #tpu.memory_space<vmem>>, %arg11: memref<2x8xf32, #tpu.memory_space<vmem>>) attributes {dimension_semantics = [#tpu.dimension_semantics<parallel>], iteration_bounds = array<i64: 1>, scalar_prefetch = 0 : i64, scratch_operands = 0 : i64, tpu.core_type = #tpu.core_type<tc>, window_params = [{transform_indices = @transform_0, window_bounds = array<i64: 2, 784>}, {pipeline_mode = #tpu.pipeline_mode<synchronous>, transform_indices = @transform_1, window_bounds = array<i64: 784, 768>}, {pipeline_mode = #tpu.pipeline_mode<synchronous>, transform_indices = @transform_2, window_bounds = array<i64: 1, 768>}, {pipeline_mode = #tpu.pipeline_mode<synchronous>, transform_indices = @transform_3, window_bounds = array<i64: 768, 384>}, {pipeline_mode = #tpu.pipeline_mode<synchronous>, transform_indices = @transform_4, window_bounds = array<i64: 1, 384>}, {pipeline_mode = #tpu.pipeline_mode<synchronous>, transform_indices = @transform_5, window_bounds = array<i64: 384, 128>}, {pipeline_mode = #tpu.pipeline_mode<synchronous>, transform_indices = @transform_6, window_bounds = array<i64: 1, 128>}, {pipeline_mode = #tpu.pipeline_mode<synchronous>, transform_indices = @transform_7, window_bounds = array<i64: 128, 16>}, {pipeline_mode = #tpu.pipeline_mode<synchronous>, transform_indices = @transform_8, window_bounds = array<i64: 1, 16>}, {transform_indices = @transform_9, window_bounds = array<i64: 2, 8>}, {transform_indices = @transform_10, window_bounds = array<i64: 2, 8>}]} {
    %c0 = arith.constant 0 : index
    %c0_0 = arith.constant 0 : index
    %0 = vector.load %arg1[%c0, %c0_0] : memref<2x784xf32, #tpu.memory_space<vmem>>, vector<2x784xf32>
    %c0_1 = arith.constant 0 : index
    %c0_2 = arith.constant 0 : index
    %1 = vector.load %arg2[%c0_1, %c0_2] : memref<784x768xf32, #tpu.memory_space<vmem>>, vector<784x768xf32>
    %cst = arith.constant dense<0.000000e+00> : vector<2x768xf32>
    %2 = tpu.matmul %0, %1, %cst {dimension_numbers = #tpu.dot_dimension_numbers<[1], [0], [0], [1], [0, 0, 1, 1], [], []>} : vector<2x784xf32>, vector<784x768xf32>, vector<2x768xf32> -> vector<2x768xf32>
    %c0_3 = arith.constant 0 : index
    %c0_4 = arith.constant 0 : index
    %3 = vector.load %arg3[%c0_3, %c0_4] : memref<1x768xf32, #tpu.memory_space<vmem>>, vector<1x768xf32>
    %4 = vector.broadcast %3 : vector<1x768xf32> to vector<2x768xf32>
    %5 = arith.addf %2, %4 : vector<2x768xf32>
    %cst_5 = arith.constant 0.000000e+00 : f32
    %6 = vector.broadcast %cst_5 : f32 to vector<2x768xf32>
    %7 = arith.maximumf %5, %6 : vector<2x768xf32>
    %c0_6 = arith.constant 0 : index
    %c0_7 = arith.constant 0 : index
    %8 = vector.load %arg4[%c0_6, %c0_7] : memref<768x384xf32, #tpu.memory_space<vmem>>, vector<768x384xf32>
    %cst_8 = arith.constant dense<0.000000e+00> : vector<2x384xf32>
    %9 = tpu.matmul %7, %8, %cst_8 {dimension_numbers = #tpu.dot_dimension_numbers<[1], [0], [0], [1], [0, 0, 1, 1], [], []>} : vector<2x768xf32>, vector<768x384xf32>, vector<2x384xf32> -> vector<2x384xf32>
    %c0_9 = arith.constant 0 : index
    %c0_10 = arith.constant 0 : index
    %10 = vector.load %arg5[%c0_9, %c0_10] : memref<1x384xf32, #tpu.memory_space<vmem>>, vector<1x384xf32>
    %11 = vector.broadcast %10 : vector<1x384xf32> to vector<2x384xf32>
    %12 = arith.addf %9, %11 : vector<2x384xf32>
    %cst_11 = arith.constant 0.000000e+00 : f32
    %13 = vector.broadcast %cst_11 : f32 to vector<2x384xf32>
    %14 = arith.maximumf %12, %13 : vector<2x384xf32>
    %c0_12 = arith.constant 0 : index
    %c0_13 = arith.constant 0 : index
    %15 = vector.load %arg6[%c0_12, %c0_13] : memref<384x128xf32, #tpu.memory_space<vmem>>, vector<384x128xf32>
    %cst_14 = arith.constant dense<0.000000e+00> : vector<2x128xf32>
    %16 = tpu.matmul %14, %15, %cst_14 {dimension_numbers = #tpu.dot_dimension_numbers<[1], [0], [0], [1], [0, 0, 1, 1], [], []>} : vector<2x384xf32>, vector<384x128xf32>, vector<2x128xf32> -> vector<2x128xf32>
    %c0_15 = arith.constant 0 : index
    %c0_16 = arith.constant 0 : index
    %17 = vector.load %arg7[%c0_15, %c0_16] : memref<1x128xf32, #tpu.memory_space<vmem>>, vector<1x128xf32>
    %18 = vector.broadcast %17 : vector<1x128xf32> to vector<2x128xf32>
    %19 = arith.addf %16, %18 : vector<2x128xf32>
    %cst_17 = arith.constant 0.000000e+00 : f32
    %20 = vector.broadcast %cst_17 : f32 to vector<2x128xf32>
    %21 = arith.maximumf %19, %20 : vector<2x128xf32>
    %c0_18 = arith.constant 0 : index
    %c0_19 = arith.constant 0 : index
    %22 = vector.load %arg8[%c0_18, %c0_19] : memref<128x16xf32, #tpu.memory_space<vmem>>, vector<128x16xf32>
    %cst_20 = arith.constant dense<0.000000e+00> : vector<2x16xf32>
    %23 = tpu.matmul %21, %22, %cst_20 {dimension_numbers = #tpu.dot_dimension_numbers<[1], [0], [0], [1], [0, 0, 1, 1], [], []>} : vector<2x128xf32>, vector<128x16xf32>, vector<2x16xf32> -> vector<2x16xf32>
    %c0_21 = arith.constant 0 : index
    %c0_22 = arith.constant 0 : index
    %24 = vector.load %arg9[%c0_21, %c0_22] : memref<1x16xf32, #tpu.memory_space<vmem>>, vector<1x16xf32>
    %25 = vector.broadcast %24 : vector<1x16xf32> to vector<2x16xf32>
    %26 = arith.addf %23, %25 : vector<2x16xf32>
    %27 = vector.extract_strided_slice %26 {offsets = [0, 0], sizes = [2, 8], strides = [1, 1]} : vector<2x16xf32> to vector<2x8xf32>
    %c0_23 = arith.constant 0 : index
    %c0_24 = arith.constant 0 : index
    %28 = vector.load %arg10[%c0_23, %c0_24] : memref<2x8xf32, #tpu.memory_space<vmem>>, vector<2x8xf32>
    tpu.vector_store %arg10[%c0_23, %c0_24], %27 {strides = array<i32>} : memref<2x8xf32, #tpu.memory_space<vmem>>, vector<2x8xf32>,
    %29 = vector.extract_strided_slice %26 {offsets = [0, 8], sizes = [2, 8], strides = [1, 1]} : vector<2x16xf32> to vector<2x8xf32>
    %c0_25 = arith.constant 0 : index
    %c0_26 = arith.constant 0 : index
    %30 = vector.load %arg11[%c0_25, %c0_26] : memref<2x8xf32, #tpu.memory_space<vmem>>, vector<2x8xf32>
    tpu.vector_store %arg11[%c0_25, %c0_26], %29 {strides = array<i32>} : memref<2x8xf32, #tpu.memory_space<vmem>>, vector<2x8xf32>,
    return
  }
  func.func @transform_0(%arg0: i32) -> (i32, i32) {
    %c0_i32 = arith.constant 0 : i32
    %c0_i32_0 = arith.constant 0 : i32
    return %arg0, %c0_i32 : i32, i32
  }
  func.func @transform_1(%arg0: i32) -> (i32, i32) {
    %c0_i32 = arith.constant 0 : i32
    %c0_i32_0 = arith.constant 0 : i32
    %c0_i32_1 = arith.constant 0 : i32
    return %c0_i32, %c0_i32_0 : i32, i32
  }
  func.func @transform_2(%arg0: i32) -> (i32, i32) {
    %c0_i32 = arith.constant 0 : i32
    %c0_i32_0 = arith.constant 0 : i32
    %c0_i32_1 = arith.constant 0 : i32
    return %c0_i32, %c0_i32_0 : i32, i32
  }
  func.func @transform_3(%arg0: i32) -> (i32, i32) {
    %c0_i32 = arith.constant 0 : i32
    %c0_i32_0 = arith.constant 0 : i32
    %c0_i32_1 = arith.constant 0 : i32
    return %c0_i32, %c0_i32_0 : i32, i32
  }
  func.func @transform_4(%arg0: i32) -> (i32, i32) {
    %c0_i32 = arith.constant 0 : i32
    %c0_i32_0 = arith.constant 0 : i32
    %c0_i32_1 = arith.constant 0 : i32
    return %c0_i32, %c0_i32_0 : i32, i32
  }
  func.func @transform_5(%arg0: i32) -> (i32, i32) {
    %c0_i32 = arith.constant 0 : i32
    %c0_i32_0 = arith.constant 0 : i32
    %c0_i32_1 = arith.constant 0 : i32
    return %c0_i32, %c0_i32_0 : i32, i32
  }
  func.func @transform_6(%arg0: i32) -> (i32, i32) {
    %c0_i32 = arith.constant 0 : i32
    %c0_i32_0 = arith.constant 0 : i32
    %c0_i32_1 = arith.constant 0 : i32
    return %c0_i32, %c0_i32_0 : i32, i32
  }
  func.func @transform_7(%arg0: i32) -> (i32, i32) {
    %c0_i32 = arith.constant 0 : i32
    %c0_i32_0 = arith.constant 0 : i32
    %c0_i32_1 = arith.constant 0 : i32
    return %c0_i32, %c0_i32_0 : i32, i32
  }
  func.func @transform_8(%arg0: i32) -> (i32, i32) {
    %c0_i32 = arith.constant 0 : i32
    %c0_i32_0 = arith.constant 0 : i32
    %c0_i32_1 = arith.constant 0 : i32
    return %c0_i32, %c0_i32_0 : i32, i32
  }
  func.func @transform_9(%arg0: i32) -> (i32, i32) {
    %c0_i32 = arith.constant 0 : i32
    %c0_i32_0 = arith.constant 0 : i32
    return %arg0, %c0_i32 : i32, i32
  }
  func.func @transform_10(%arg0: i32) -> (i32, i32) {
    %c0_i32 = arith.constant 0 : i32
    %c0_i32_0 = arith.constant 0 : i32
    return %arg0, %c0_i32 : i32, i32
  }
}

</mosaic_0001>

<bundles_post_ra>
// kernel: tpu_custom_call.1
= control target key start
LH: loop header
LB: loop body
LE: loop exit
PB: predicated region body
PF: predicated region fallthrough
CT: control target
= control target key end

     0   :  { %16 = vsyncpa [#allocation3], 0  ;;  %s4608_s0 = inlined_call_operand.hbm [shape: f32[2,784], index: 0, kind: input, shape index: {}]   ;;  %s4609_s1 = inlined_call_operand.hbm [shape: f32[784,768], index: 1, kind: input, shape index: {}]   ;;  %s4610_s2 = inlined_call_operand.hbm [shape: f32[1,768], index: 2, kind: input, shape index: {}]   ;;  %s4611_s3 = inlined_call_operand.hbm [shape: f32[768,384], index: 3, kind: input, shape index: {}]   ;;  %s4612_s4 = inlined_call_operand.hbm [shape: f32[1,384], index: 4, kind: input, shape index: {}]   ;;  %s4613_s5 = inlined_call_operand.hbm [shape: f32[384,128], index: 5, kind: input, shape index: {}]   ;;  %s4614_s6 = inlined_call_operand.hbm [shape: f32[1,128], index: 6, kind: input, shape index: {}]   ;;  %s4615_s7 = inlined_call_operand.vmem [shape: f32[128,16], index: 7, kind: input, shape index: {}]   ;;  %s4616_s8 = inlined_call_operand.hbm [shape: f32[1,16], index: 8, kind: input, shape index: {}]   ;;  %s4617_s9 = inlined_call_operand.hbm [shape: f32[2,8], index: 9, kind: output, shape index: {0}]   ;;  %s4618_s10 = inlined_call_operand.hbm [shape: f32[2,8], index: 10, kind: output, shape index: {1}]  }
   0x1   :  { %17 = vsyncpa [#allocation6], 0 }
   0x2   :  { %18 = vsyncpa [#allocation9], 0 }
   0x3   :  { %19 = vsyncpa [#allocation12], 0 }
   0x4   :  { %20 = vsyncpa [#allocation15], 0 }
   0x5   :  { %21 = vsyncpa [#allocation4], 0 }
   0x6   :  { %22 = vsyncpa [#allocation18], 0  ;;  %s4211_s13 = smov [#allocation5]   ;;  %s3977_s17 = scalar_lea.hbm %s4609_s1, 75264 }
   0x7   :  { %s38_s14 = sshll.u32 %s4211_s13, 4  ;;  %p3978_p0 = scmp.ne.s32.totalorder %s4609_s1, %s3977_s17  ;;  %s39_s14 = int_to_ptr.vmem [resolvable:$true] %s38_s14 }
   0x8   :  { %p3981_p1 = scmp.lt.u32.totalorder %s3977_s17, %s4609_s1 }
   0xa   :  { %p3983_p2 = pnand %p3981_p1, %p3978_p0 }
   0xc   :  { %3986 = shalt.err (!%p3983_p2)
}
   0xd   :  { %s3987_s22 = scalar_lea.vmem %s39_s14, 75264  ;;  %p3992_p4 = scmp.lt.s32.totalorder %s39_s14, %s39_s14 }
   0xe   :  { %p3988_p3 = scmp.ne.s32.totalorder %s39_s14, %s3987_s22  ;;  %p3993_p5 = scmp.lt.s32.totalorder %s3987_s22, %s3987_s22 }
  0x10   :  { %p3994_p6 = por %p3993_p5, %p3992_p4 }
  0x12   :  { %p3995_p7 = pnand %p3994_p6, %p3988_p3 }
  0x14   :  { %3998 = shalt.err (!%p3995_p7)
}
  0x15   :  { %s4212_s23 = smov 768   ;;  %s4213_s24 = smov 48  }
  0x16   :  { %44 = dma.hbm_to_vmem [thread:$0]  %s4609_s1, 75264, %s39_s14, [#allocation6], %s4212_s23, %s4212_s23, %s4213_s24  }
  0x17   :  { %s4214_s27 = smov [#allocation8]   ;;  %s3999_s11 = scalar_lea.hbm %s4611_s3, 36864 }
  0x18   :  { %s60_s28 = sshll.u32 %s4214_s27, 4  ;;  %p4000_p8 = scmp.ne.s32.totalorder %s4611_s3, %s3999_s11  ;;  %s61_s28 = int_to_ptr.vmem [resolvable:$true] %s60_s28 }
  0x19   :  { %p4003_p9 = scmp.lt.u32.totalorder %s3999_s11, %s4611_s3 }
  0x1b   :  { %p4005_p10 = pnand %p4003_p9, %p4000_p8 }
  0x1d   :  { %4008 = shalt.err (!%p4005_p10)
}
  0x1e   :  { %s4009_s17 = scalar_lea.vmem %s61_s28, 36864  ;;  %p4014_p12 = scmp.lt.s32.totalorder %s61_s28, %s61_s28 }
  0x1f   :  { %p4010_p11 = scmp.ne.s32.totalorder %s61_s28, %s4009_s17  ;;  %p4015_p13 = scmp.lt.s32.totalorder %s4009_s17, %s4009_s17 }
  0x21   :  { %p4016_p0 = por %p4015_p13, %p4014_p12 }
  0x23   :  { %p4017_p1 = pnand %p4016_p0, %p4010_p11 }
  0x25   :  { %4020 = shalt.err (!%p4017_p1)
}
  0x26   :  { %s4215_s1 = smov 384   ;;  %s4216_s14 = smov 24  }
  0x27   :  { %66 = dma.hbm_to_vmem [thread:$0]  %s4611_s3, 36864, %s61_s28, [#allocation9], %s4215_s1, %s4215_s1, %s4216_s14  }
  0x28   :  { %s4217_s20 = smov [#allocation11]   ;;  %s4021_s24 = scalar_lea.hbm %s4613_s5, 6144 }
  0x29   :  { %s82_s21 = sshll.u32 %s4217_s20, 4  ;;  %p4022_p2 = scmp.ne.s32.totalorder %s4613_s5, %s4021_s24  ;;  %s83_s21 = int_to_ptr.vmem [resolvable:$true] %s82_s21 }
  0x2a   :  { %p4025_p3 = scmp.lt.u32.totalorder %s4021_s24, %s4613_s5 }
  0x2c   :  { %p4027_p4 = pnand %p4025_p3, %p4022_p2 }
  0x2e   :  { %4030 = shalt.err (!%p4027_p4)
}
  0x2f   :  { %s4031_s30 = scalar_lea.vmem %s83_s21, 6144  ;;  %p4036_p6 = scmp.lt.s32.totalorder %s83_s21, %s83_s21 }
  0x30   :  { %p4032_p5 = scmp.ne.s32.totalorder %s83_s21, %s4031_s30  ;;  %p4037_p7 = scmp.lt.s32.totalorder %s4031_s30, %s4031_s30 }
  0x32   :  { %p4038_p8 = por %p4037_p7, %p4036_p6 }
  0x34   :  { %p4039_p9 = pnand %p4038_p8, %p4032_p5 }
  0x36   :  { %4042 = shalt.err (!%p4039_p9)
}
  0x37   :  { %s4218_s3 = smov 128   ;;  %s4219_s28 = smov 8  }
  0x38   :  { %88 = dma.hbm_to_vmem [thread:$0]  %s4613_s5, 6144, %s83_s21, [#allocation12], %s4218_s3, %s4218_s3, %s4219_s28  }
  0x39   :  { %s4220_s13 = smov [#allocation2]   ;;  %s4221_s16 = smov [#allocation7]  }
  0x3a   :  { %s29_s15 = sshll.u32 %s4220_s13, 4  ;;  %s51_s17 = sshll.u32 %s4221_s16, 4  ;;  %s30_s15 = int_to_ptr.vmem [resolvable:$true] %s29_s15  ;;  %s52_s17 = int_to_ptr.vmem [resolvable:$true] %s51_s17 }
  0x3b   :  { %s4043_s18 = scalar_lea.hbm %s4608_s0, 224 }
  0x3c   :  { %p4044_p10 = scmp.ne.s32.totalorder %s4608_s0, %s4043_s18  ;;  %p4047_p11 = scmp.lt.u32.totalorder %s4043_s18, %s4608_s0 }
  0x3e   :  { %p4049_p12 = pnand %p4047_p11, %p4044_p10 }
  0x40   :  { %4052 = shalt.err (!%p4049_p12)
}
  0x41   :  { %s4053_s5 = scalar_lea.vmem %s30_s15, 224  ;;  %p4058_p0 = scmp.lt.s32.totalorder %s30_s15, %s30_s15 }
  0x42   :  { %p4054_p13 = scmp.ne.s32.totalorder %s30_s15, %s4053_s5  ;;  %p4059_p1 = scmp.lt.s32.totalorder %s4053_s5, %s4053_s5 }
  0x44   :  { %p4060_p2 = por %p4059_p1, %p4058_p0 }
  0x46   :  { %p4061_p3 = pnand %p4060_p2, %p4054_p13 }
  0x48   :  { %4064 = shalt.err (!%p4061_p3)
}
  0x49   :  { %32 = dma.hbm_to_vmem [thread:$0]  %s4608_s0, 224, %s30_s15, [#allocation3]  }
  0x4a   :  { %s4065_s27 = scalar_lea.hbm %s4610_s2, 96 }
  0x4b   :  { %p4066_p4 = scmp.ne.s32.totalorder %s4610_s2, %s4065_s27  ;;  %p4069_p5 = scmp.lt.u32.totalorder %s4065_s27, %s4610_s2 }
  0x4d   :  { %p4071_p6 = pnand %p4069_p5, %p4066_p4 }
  0x4f   :  { %4074 = shalt.err (!%p4071_p6)
}
  0x50   :  { %s4075_s11 = scalar_lea.vmem %s52_s17, 96  ;;  %p4080_p8 = scmp.lt.s32.totalorder %s52_s17, %s52_s17 }
  0x51   :  { %p4076_p7 = scmp.ne.s32.totalorder %s52_s17, %s4075_s11  ;;  %p4081_p9 = scmp.lt.s32.totalorder %s4075_s11, %s4075_s11 }
  0x53   :  { %p4082_p10 = por %p4081_p9, %p4080_p8 }
  0x55   :  { %p4083_p11 = pnand %p4082_p10, %p4076_p7 }
  0x57   :  { %4086 = shalt.err (!%p4083_p11)
}
  0x58   :  { %54 = dma.hbm_to_vmem [thread:$0]  %s4610_s2, 96, %s52_s17, [#allocation6]  }
  0x59   :  { %s4222_s13 = smov [#allocation10]   ;;  %s4223_s16 = smov [#allocation13]  }
  0x5a   :  { %s73_s15 = sshll.u32 %s4222_s13, 4  ;;  %s95_s1 = sshll.u32 %s4223_s16, 4  ;;  %s74_s15 = int_to_ptr.vmem [resolvable:$true] %s73_s15  ;;  %s96_s1 = int_to_ptr.vmem [resolvable:$true] %s95_s1 }
  0x5b   :  { %s4087_s19 = scalar_lea.hbm %s4612_s4, 48 }
  0x5c   :  { %p4088_p12 = scmp.ne.s32.totalorder %s4612_s4, %s4087_s19  ;;  %p4091_p13 = scmp.lt.u32.totalorder %s4087_s19, %s4612_s4 }
  0x5e   :  { %p4093_p0 = pnand %p4091_p13, %p4088_p12 }
  0x60   :  { %4096 = shalt.err (!%p4093_p0)
}
  0x61   :  { %s4097_s2 = scalar_lea.vmem %s74_s15, 48  ;;  %s4101_s17 = scalar_lea.vmem %s74_s15, 64 }
  0x62   :  { %p4098_p1 = scmp.ne.s32.totalorder %s74_s15, %s4097_s2  ;;  %p4102_p2 = scmp.lt.s32.totalorder %s74_s15, %s74_s15 }
  0x63   :  { %p4103_p3 = scmp.lt.s32.totalorder %s4101_s17, %s4097_s2 }
  0x65   :  { %p4104_p4 = por %p4103_p3, %p4102_p2 }
  0x67   :  { %p4105_p5 = pnand %p4104_p4, %p4098_p1 }
  0x69   :  { %4108 = shalt.err (!%p4105_p5)
}
  0x6a   :  { %76 = dma.hbm_to_vmem [thread:$0]  %s4612_s4, 48, %s74_s15, [#allocation9]  }
  0x6b   :  { %s4109_s27 = scalar_lea.hbm %s4614_s6, 16 }
  0x6c   :  { %p4110_p6 = scmp.ne.s32.totalorder %s4614_s6, %s4109_s27  ;;  %p4113_p7 = scmp.lt.u32.totalorder %s4109_s27, %s4614_s6 }
  0x6e   :  { %p4115_p8 = pnand %p4113_p7, %p4110_p6 }
  0x70   :  { %4118 = shalt.err (!%p4115_p8)
}
  0x71   :  { %s4119_s11 = scalar_lea.vmem %s96_s1, 16  ;;  %s4123_s0 = scalar_lea.vmem %s96_s1, 32 }
  0x72   :  { %p4120_p9 = scmp.ne.s32.totalorder %s96_s1, %s4119_s11  ;;  %p4124_p10 = scmp.lt.s32.totalorder %s96_s1, %s96_s1 }
  0x73   :  { %p4125_p11 = scmp.lt.s32.totalorder %s4123_s0, %s4119_s11 }
  0x75   :  { %p4126_p12 = por %p4125_p11, %p4124_p10 }
  0x77   :  { %p4127_p13 = pnand %p4126_p12, %p4120_p9 }
  0x79   :  { %4130 = shalt.err (!%p4127_p13)
}
  0x7a   :  { %98 = dma.hbm_to_vmem [thread:$0]  %s4614_s6, 16, %s96_s1, [#allocation12]  }
  0x7b   :  { %s4224_s13 = smov [#allocation14]   ;;  %s4131_s18 = scalar_lea.hbm %s4616_s8, 16 }
  0x7c   :  { %s107_s15 = sshll.u32 %s4224_s13, 4  ;;  %p4132_p0 = scmp.ne.s32.totalorder %s4616_s8, %s4131_s18  ;;  %s108_s15 = int_to_ptr.vmem [resolvable:$true] %s107_s15 }
  0x7d   :  { %p4135_p1 = scmp.lt.u32.totalorder %s4131_s18, %s4616_s8 }
  0x7f   :  { %p4137_p2 = pnand %p4135_p1, %p4132_p0 }
  0x81   :  { %4140 = shalt.err (!%p4137_p2)
}
  0x82   :  { %s4141_s5 = scalar_lea.vmem %s108_s15, 16  ;;  %s4145_s6 = scalar_lea.vmem %s108_s15, 32 }
  0x83   :  { %p4142_p3 = scmp.ne.s32.totalorder %s108_s15, %s4141_s5  ;;  %p4146_p4 = scmp.lt.s32.totalorder %s108_s15, %s108_s15 }
  0x84   :  { %p4147_p5 = scmp.lt.s32.totalorder %s4145_s6, %s4141_s5 }
  0x86   :  { %p4148_p6 = por %p4147_p5, %p4146_p4 }
  0x88   :  { %p4149_p7 = pnand %p4148_p6, %p4142_p3 }
  0x8a   :  { %4152 = shalt.err (!%p4149_p7)
}
  0x8b   :  { %110 = dma.hbm_to_vmem [thread:$0]  %s4616_s8, 16, %s108_s15, [#allocation15]  }
  0x8c   :  { %4197 = dma.done.wait [#allocation3], 224  }
  0x8d   :  { %4198 = vsyncadd [#allocation3], 4294967072 }
  0x8e   :  { %4199 = dma.done.wait [#allocation6], 75360  }
  0x8f   :  { %4200 = vsyncadd [#allocation6], 4294891936 }
  0x90   :  { %4201 = dma.done.wait [#allocation9], 36912  }
  0x91   :  { %4202 = vsyncadd [#allocation9], 4294930384 }
  0x92   :  { %4203 = dma.done.wait [#allocation12], 6160  }
  0x93   :  { %4204 = vsyncadd [#allocation12], 4294961136 }
  0x94   :  { %4205 = dma.done.wait [#allocation15], 16  }
  0x95   :  { %4206 = vsyncadd [#allocation15], 4294967280  ;;  %v138_v0 = vld [vmem:[#allocation5 + $0x8] sm:$0xff]  ;;  %v144_v1 = vld [vmem:[#allocation5 + $0x38] sm:$0xff]  ;;  %vm798_vm0 = vcmask 130048   ;;  %vm4228_vm1 = vmmov 0  }
  0x96   :  { %v140_v2 = vld [vmem:[#allocation5 + $0x18] sm:$0xff]  ;;  %v2968_v3 = vpack.c.bf16 %v144_v1, %v138_v0  ;;  %v146_v4 = vld [vmem:[#allocation5 + $0x48] sm:$0xff]  ;;  %v137_v5 = vld [vmem:[#allocation5] sm:$0xff]  ;;  %s4229_s25 = smov [#allocation16]   ;;  %vm2679_vm2 = vcmask 58368  }
  0x97   :  { %v143_v6 = vld [vmem:[#allocation5 + $0x30] sm:$0xff]  ;;  %v3164_v7 = vpack.c.bf16 %v146_v4, %v140_v2  ;;  %v145_v10 = vld [vmem:[#allocation5 + $0x40] sm:$0xff]  ;;  %v150_v11 = vld [vmem:[#allocation5 + $0x68] sm:$0xff]  ;;  %s2692_s26 = sshll.u32 %s4229_s25, 4  ;;  %s2693_s26 = int_to_ptr.vmem [resolvable:$true] %s2692_s26 }
  0x98   :  { %v2970_v8 = vpack.c.bf16 %v143_v6, %v137_v5  ;;  %v139_v9 = vld [vmem:[#allocation5 + $0x10] sm:$0xff]  ;;  %2969 = vmatprep.subr.bf16.mxu0 %v2968_v3  ;;  %v156_v13 = vld [vmem:[#allocation5 + $0x98] sm:$0xff]  ;;  %v158_v15 = vld [vmem:[#allocation5 + $0xa8] sm:$0xff]  ;;  %s4153_s27 = scalar_lea.vmem %s2693_s26, 32  ;;  %p4158_p9 = scmp.lt.s32.totalorder %s2693_s26, %s2693_s26 }
  0x99   :  { %v3166_v12 = vpack.c.bf16 %v145_v10, %v139_v9  ;;  %v152_v14 = vld [vmem:[#allocation5 + $0x78] sm:$0xff]  ;;  %3165 = vmatprep.subr.bf16.mxu1 %v3164_v7  ;;  %v2972_v16 = vpack.c.bf16 %v156_v13, %v150_v11  ;;  %v149_v18 = vld [vmem:[#allocation5 + $0x60] sm:$0xff]  ;;  %v155_v19 = vld [vmem:[#allocation5 + $0x90] sm:$0xff]  ;;  %p4154_p8 = scmp.ne.s32.totalorder %s2693_s26, %s4153_s27  ;;  %p4159_p10 = scmp.lt.s32.totalorder %s4153_s27, %s4153_s27 }
  0x9a   :  { %2971 = vmatpush1.bf16.msra.mxu0 %v2970_v8  ;;  %v3168_v17 = vpack.c.bf16 %v158_v15, %v152_v14  ;;  %v151_v20 = vld [vmem:[#allocation5 + $0x70] sm:$0xff]  ;;  %v2974_v21 = vpack.c.bf16 %v155_v19, %v149_v18  ;;  %v157_v22 = vld [vmem:[#allocation5 + $0xa0] sm:$0xff]  ;;  %v162_v23 = vld [vmem:[#allocation5 + $0xc8] sm:$0xff] }
  0x9b   :  { %3167 = vmatpush1.bf16.msra.mxu1 %v3166_v12  ;;  %v168_v24 = vld [vmem:[#allocation5 + $0xf8] sm:$0xff]  ;;  %2973 = vmatprep.subr.bf16.mxu0 %v2972_v16  ;;  %v3170_v25 = vpack.c.bf16 %v157_v22, %v151_v20  ;;  %v170_v28 = vld [vmem:[#allocation5 + $0x108] sm:$0xff]  ;;  %v161_v29 = vld [vmem:[#allocation5 + $0xc0] sm:$0xff]  ;;  %p4160_p11 = por %p4159_p10, %p4158_p9 }
  0x9c   :  { %3169 = vmatprep.subr.bf16.mxu1 %v3168_v17  ;;  %v2976_v26 = vpack.c.bf16 %v168_v24, %v162_v23  ;;  %v164_v27 = vld [vmem:[#allocation5 + $0xd8] sm:$0xff]  ;;  %v167_v31 = vld [vmem:[#allocation5 + $0xf0] sm:$0xff]  ;;  %v169_v33 = vld [vmem:[#allocation5 + $0x100] sm:$0xff] }
  0x9d   :  { %v3172_v30 = vpack.c.bf16 %v170_v28, %v164_v27  ;;  %v163_v32 = vld [vmem:[#allocation5 + $0xd0] sm:$0xff]  ;;  %v2978_v34 = vpack.c.bf16 %v167_v31, %v161_v29  ;;  %v174_v35 = vld [vmem:[#allocation5 + $0x128] sm:$0xff]  ;;  %v180_v36 = vld [vmem:[#allocation5 + $0x158] sm:$0xff]  ;;  %p4161_p12 = pnand %p4160_p11, %p4154_p8 }
  0x9e   :  { %2975 = vmatpush1.bf16.msra.mxu0 %v2974_v21  ;;  %v176_v37 = vld [vmem:[#allocation5 + $0x138] sm:$0xff]  ;;  %v3174_v38 = vpack.c.bf16 %v169_v33, %v163_v32  ;;  %v2980_v39 = vpack.c.bf16 %v180_v36, %v174_v35  ;;  %v182_v40 = vld [vmem:[#allocation5 + $0x168] sm:$0xff]  ;;  %v173_v41 = vld [vmem:[#allocation5 + $0x120] sm:$0xff] }
  0x9f   :  { %3171 = vmatpush1.bf16.msra.mxu1 %v3170_v25  ;;  %2977 = vmatprep.subr.bf16.mxu0 %v2976_v26  ;;  %v179_v42 = vld [vmem:[#allocation5 + $0x150] sm:$0xff]  ;;  %v3176_v43 = vpack.c.bf16 %v182_v40, %v176_v37  ;;  %v181_v45 = vld [vmem:[#allocation5 + $0x160] sm:$0xff]  ;;  %v186_v46 = vld [vmem:[#allocation5 + $0x188] sm:$0xff] }
  0xa0   :  { %3173 = vmatprep.subr.bf16.mxu1 %v3172_v30  ;;  %v175_v44 = vld [vmem:[#allocation5 + $0x130] sm:$0xff]  ;;  %v192_v47 = vld [vmem:[#allocation5 + $0x1b8] sm:$0xff]  ;;  %v194_v49 = vld [vmem:[#allocation5 + $0x1c8] sm:$0xff]  ;;  %v2982_v50 = vpack.c.bf16 %v179_v42, %v173_v41 }
  0xa1   :  { %v188_v48 = vld [vmem:[#allocation5 + $0x198] sm:$0xff]  ;;  %v3178_v51 = vpack.c.bf16 %v181_v45, %v175_v44  ;;  %v2984_v52 = vpack.c.bf16 %v192_v47, %v186_v46  ;;  %v185_v53 = vld [vmem:[#allocation5 + $0x180] sm:$0xff]  ;;  %v191_v54 = vld [vmem:[#allocation5 + $0x1b0] sm:$0xff]  ;;  %v727_v46 = vlaneseq  ;;  %v4225_v47 = vmov 1983009808  }
  0xa2   :  { %2979 = vmatpush1.bf16.msra.mxu0 %v2978_v34  ;;  %v187_v55 = vld [vmem:[#allocation5 + $0x190] sm:$0xff]  ;;  %v3180_v56 = vpack.c.bf16 %v194_v49, %v188_v48  ;;  %v193_v57 = vld [vmem:[#allocation5 + $0x1c0] sm:$0xff]  ;;  %v198_v58 = vld [vmem:[#allocation5 + $0x1e8] sm:$0xff]  ;;  %v2986_v62 = vpack.c.bf16 %v191_v54, %v185_v53  ;;  %v761_v48 = vunpack.c.l.s4 %v4225_v47 }
  0xa3   :  { %3175 = vmatpush1.bf16.msra.mxu1 %v3174_v38  ;;  %2981 = vmatprep.subr.bf16.mxu0 %v2980_v39  ;;  %v204_v59 = vld [vmem:[#allocation5 + $0x218] sm:$0xff]  ;;  %v206_v61 = vld [vmem:[#allocation5 + $0x228] sm:$0xff]  ;;  %v3182_v63 = vpack.c.bf16 %v193_v57, %v187_v55  ;;  %v197_v1 = vld [vmem:[#allocation5 + $0x1e0] sm:$0xff] }
  0xa4   :  { %3177 = vmatprep.subr.bf16.mxu1 %v3176_v43  ;;  %v200_v60 = vld [vmem:[#allocation5 + $0x1f8] sm:$0xff]  ;;  %v2988_v0 = vpack.c.bf16 %v204_v59, %v198_v58  ;;  %v203_v2 = vld [vmem:[#allocation5 + $0x210] sm:$0xff]  ;;  %v205_v5 = vld [vmem:[#allocation5 + $0x220] sm:$0xff] }
  0xa5   :  { %v199_v3 = vld [vmem:[#allocation5 + $0x1f0] sm:$0xff]  ;;  %v3184_v4 = vpack.c.bf16 %v206_v61, %v200_v60  ;;  %v210_v6 = vld [vmem:[#allocation5 + $0x248] sm:$0xff]  ;;  %v216_v7 = vld [vmem:[#allocation5 + $0x278] sm:$0xff]  ;;  %v2990_v10 = vpack.c.bf16 %v203_v2, %v197_v1  ;;  %v4383_v61 = vshrl.u32 %v727_v46, 7 }
  0xa6   :  { %2983 = vmatpush1.bf16.msra.mxu0 %v2982_v50  ;;  %v212_v8 = vld [vmem:[#allocation5 + $0x258] sm:$0xff]  ;;  %v218_v9 = vld [vmem:[#allocation5 + $0x288] sm:$0xff]  ;;  %v3186_v11 = vpack.c.bf16 %v205_v5, %v199_v3  ;;  %v2992_v12 = vpack.c.bf16 %v216_v7, %v210_v6  ;;  %v209_v13 = vld [vmem:[#allocation5 + $0x240] sm:$0xff] }
  0xa7   :  { %3179 = vmatpush1.bf16.msra.mxu1 %v3178_v51  ;;  %2985 = vmatprep.subr.bf16.mxu0 %v2984_v52  ;;  %v215_v14 = vld [vmem:[#allocation5 + $0x270] sm:$0xff]  ;;  %v3188_v16 = vpack.c.bf16 %v218_v9, %v212_v8  ;;  %v217_v17 = vld [vmem:[#allocation5 + $0x280] sm:$0xff]  ;;  %v222_v18 = vld [vmem:[#allocation5 + $0x2a8] sm:$0xff] }
  0xa8   :  { %3181 = vmatprep.subr.bf16.mxu1 %v3180_v56  ;;  %v211_v15 = vld [vmem:[#allocation5 + $0x250] sm:$0xff]  ;;  %v228_v19 = vld [vmem:[#allocation5 + $0x2d8] sm:$0xff]  ;;  %v230_v21 = vld [vmem:[#allocation5 + $0x2e8] sm:$0xff]  ;;  %v2994_v22 = vpack.c.bf16 %v215_v14, %v209_v13 }
  0xa9   :  { %v224_v20 = vld [vmem:[#allocation5 + $0x2b8] sm:$0xff]  ;;  %v3190_v23 = vpack.c.bf16 %v217_v17, %v211_v15  ;;  %v2996_v24 = vpack.c.bf16 %v228_v19, %v222_v18  ;;  %v221_v25 = vld [vmem:[#allocation5 + $0x2a0] sm:$0xff]  ;;  %v227_v26 = vld [vmem:[#allocation5 + $0x2d0] sm:$0xff] }
  0xaa   :  { %2987 = vmatpush1.bf16.msra.mxu0 %v2986_v62  ;;  %v223_v27 = vld [vmem:[#allocation5 + $0x2b0] sm:$0xff]  ;;  %v3192_v28 = vpack.c.bf16 %v230_v21, %v224_v20  ;;  %v229_v29 = vld [vmem:[#allocation5 + $0x2e0] sm:$0xff]  ;;  %v234_v30 = vld [vmem:[#allocation5 + $0x308] sm:$0xff]  ;;  %v2998_v34 = vpack.c.bf16 %v227_v26, %v221_v25  ;;  %v762_v62 = vunpack.c.0.s8 %v761_v48 }
  0xab   :  { %3183 = vmatpush1.bf16.msra.mxu1 %v3182_v63  ;;  %2989 = vmatprep.subr.bf16.mxu0 %v2988_v0  ;;  %v240_v31 = vld [vmem:[#allocation5 + $0x338] sm:$0xff]  ;;  %v242_v33 = vld [vmem:[#allocation5 + $0x348] sm:$0xff]  ;;  %v3194_v35 = vpack.c.bf16 %v229_v29, %v223_v27  ;;  %v233_v37 = vld [vmem:[#allocation5 + $0x300] sm:$0xff] }
  0xac   :  { %3185 = vmatprep.subr.bf16.mxu1 %v3184_v4  ;;  %v236_v32 = vld [vmem:[#allocation5 + $0x318] sm:$0xff]  ;;  %v3000_v36 = vpack.c.bf16 %v240_v31, %v234_v30  ;;  %v239_v38 = vld [vmem:[#allocation5 + $0x330] sm:$0xff]  ;;  %v241_v41 = vld [vmem:[#allocation5 + $0x340] sm:$0xff] }
  0xad   :  { %v235_v39 = vld [vmem:[#allocation5 + $0x310] sm:$0xff]  ;;  %v3196_v40 = vpack.c.bf16 %v242_v33, %v236_v32  ;;  %v246_v42 = vld [vmem:[#allocation5 + $0x368] sm:$0xff]  ;;  %v252_v43 = vld [vmem:[#allocation5 + $0x398] sm:$0xff]  ;;  %v3002_v49 = vpack.c.bf16 %v239_v38, %v233_v37 }
  0xae   :  { %2991 = vmatpush1.bf16.msra.mxu0 %v2990_v10  ;;  %v248_v44 = vld [vmem:[#allocation5 + $0x378] sm:$0xff]  ;;  %v254_v45 = vld [vmem:[#allocation5 + $0x3a8] sm:$0xff]  ;;  %v3198_v50 = vpack.c.bf16 %v241_v41, %v235_v39  ;;  %v3004_v51 = vpack.c.bf16 %v252_v43, %v246_v42  ;;  %v245_v52 = vld [vmem:[#allocation5 + $0x360] sm:$0xff] }
  0xaf   :  { %3187 = vmatpush1.bf16.msra.mxu1 %v3186_v11  ;;  %2993 = vmatprep.subr.bf16.mxu0 %v2992_v12  ;;  %v251_v53 = vld [vmem:[#allocation5 + $0x390] sm:$0xff]  ;;  %v3200_v55 = vpack.c.bf16 %v254_v45, %v248_v44  ;;  %v253_v56 = vld [vmem:[#allocation5 + $0x3a0] sm:$0xff]  ;;  %v258_v57 = vld [vmem:[#allocation5 + $0x3c8] sm:$0xff]  ;;  %v4386_v11 = vsub.s32 %v762_v62, %v4383_v61 }
  0xb0   :  { %3189 = vmatprep.subr.bf16.mxu1 %v3188_v16  ;;  %v247_v54 = vld [vmem:[#allocation5 + $0x370] sm:$0xff]  ;;  %v264_v58 = vld [vmem:[#allocation5 + $0x3f8] sm:$0xff]  ;;  %v266_v60 = vld [vmem:[#allocation5 + $0x408] sm:$0xff]  ;;  %v3006_v63 = vpack.c.bf16 %v251_v53, %v245_v52 }
  0xb1   :  { %v260_v59 = vld [vmem:[#allocation5 + $0x3d8] sm:$0xff]  ;;  %v3202_v0 = vpack.c.bf16 %v253_v56, %v247_v54  ;;  %v3008_v1 = vpack.c.bf16 %v264_v58, %v258_v57  ;;  %v257_v2 = vld [vmem:[#allocation5 + $0x3c0] sm:$0xff]  ;;  %v263_v3 = vld [vmem:[#allocation5 + $0x3f0] sm:$0xff] }
  0xb2   :  { %2995 = vmatpush1.bf16.msra.mxu0 %v2994_v22  ;;  %v259_v4 = vld [vmem:[#allocation5 + $0x3d0] sm:$0xff]  ;;  %v3204_v5 = vpack.c.bf16 %v266_v60, %v260_v59  ;;  %v265_v6 = vld [vmem:[#allocation5 + $0x400] sm:$0xff]  ;;  %v270_v7 = vld [vmem:[#allocation5 + $0x428] sm:$0xff]  ;;  %v3010_v12 = vpack.c.bf16 %v263_v3, %v257_v2 }
  0xb3   :  { %3191 = vmatpush1.bf16.msra.mxu1 %v3190_v23  ;;  %2997 = vmatprep.subr.bf16.mxu0 %v2996_v24  ;;  %v276_v8 = vld [vmem:[#allocation5 + $0x458] sm:$0xff]  ;;  %v278_v10 = vld [vmem:[#allocation5 + $0x468] sm:$0xff]  ;;  %v269_v13 = vld [vmem:[#allocation5 + $0x420] sm:$0xff]  ;;  %v3206_v14 = vpack.c.bf16 %v265_v6, %v259_v4 }
  0xb4   :  { %3193 = vmatprep.subr.bf16.mxu1 %v3192_v28  ;;  %v272_v9 = vld [vmem:[#allocation5 + $0x438] sm:$0xff]  ;;  %v3012_v15 = vpack.c.bf16 %v276_v8, %v270_v7  ;;  %v275_v16 = vld [vmem:[#allocation5 + $0x450] sm:$0xff]  ;;  %v277_v18 = vld [vmem:[#allocation5 + $0x460] sm:$0xff] }
  0xb5   :  { %v271_v17 = vld [vmem:[#allocation5 + $0x430] sm:$0xff]  ;;  %v3208_v19 = vpack.c.bf16 %v278_v10, %v272_v9  ;;  %v282_v20 = vld [vmem:[#allocation5 + $0x488] sm:$0xff]  ;;  %v288_v21 = vld [vmem:[#allocation5 + $0x4b8] sm:$0xff]  ;;  %v3014_v26 = vpack.c.bf16 %v275_v16, %v269_v13 }
  0xb6   :  { %2999 = vmatpush1.bf16.msra.mxu0 %v2998_v34  ;;  %v4388_v22 = vld [vmem:[#allocation2] sm:$0xff]  ;;  %v290_v24 = vld [vmem:[#allocation5 + $0x4c8] sm:$0xff]  ;;  %v3210_v27 = vpack.c.bf16 %v277_v18, %v271_v17  ;;  %v3016_v28 = vpack.c.bf16 %v288_v21, %v282_v20  ;;  %v281_v29 = vld [vmem:[#allocation5 + $0x480] sm:$0xff] }
  0xb7   :  { %3195 = vmatpush1.bf16.msra.mxu1 %v3194_v35  ;;  %3001 = vmatprep.subr.bf16.mxu0 %v3000_v36  ;;  %v284_v23 = vld [vmem:[#allocation5 + $0x498] sm:$0xff]  ;;  %v4392_v25 = vrot.slane %v4388_v22, %v4386_v11  ;;  %v287_v30 = vld [vmem:[#allocation5 + $0x4b0] sm:$0xff]  ;;  %v289_v34 = vld [vmem:[#allocation5 + $0x4c0] sm:$0xff]  ;;  %v759_v10 = vcombine.high %v4388_v22, %v4388_v22 }
  0xb8   :  { %3197 = vmatprep.subr.bf16.mxu1 %v3196_v40  ;;  %v283_v31 = vld [vmem:[#allocation5 + $0x490] sm:$0xff]  ;;  %v3212_v33 = vpack.c.bf16 %v290_v24, %v284_v23  ;;  %v294_v35 = vld [vmem:[#allocation5 + $0x4e8] sm:$0xff]  ;;  %v300_v36 = vld [vmem:[#allocation5 + $0x518] sm:$0xff]  ;;  %v3018_v39 = vpack.c.bf16 %v287_v30, %v281_v29 }
  0xb9   :  { %v4396_v32 = vcombine.high %v4392_v25, %v4392_v25  ;;  %v296_v37 = vld [vmem:[#allocation5 + $0x4f8] sm:$0xff]  ;;  %v302_v38 = vld [vmem:[#allocation5 + $0x528] sm:$0xff]  ;;  %v3214_v40 = vpack.c.bf16 %v289_v34, %v283_v31  ;;  %v3020_v41 = vpack.c.bf16 %v300_v36, %v294_v35  ;;  %v293_v42 = vld [vmem:[#allocation5 + $0x4e0] sm:$0xff] }
  0xba   :  { %3003 = vmatpush1.bf16.msra.mxu0 %v3002_v49  ;;  %v299_v43 = vld [vmem:[#allocation5 + $0x510] sm:$0xff]  ;;  %v3216_v45 = vpack.c.bf16 %v302_v38, %v296_v37  ;;  %v301_v46 = vld [vmem:[#allocation5 + $0x520] sm:$0xff]  ;;  %v306_v47 = vld [vmem:[#allocation5 + $0x548] sm:$0xff] }
  0xbb   :  { %3199 = vmatpush1.bf16.msra.mxu1 %v3198_v50  ;;  %3005 = vmatprep.subr.bf16.mxu0 %v3004_v51  ;;  %v295_v44 = vld [vmem:[#allocation5 + $0x4f0] sm:$0xff]  ;;  %v312_v48 = vld [vmem:[#allocation5 + $0x578] sm:$0xff]  ;;  %v314_v50 = vld [vmem:[#allocation5 + $0x588] sm:$0xff]  ;;  %v3022_v51 = vpack.c.bf16 %v299_v43, %v293_v42 }
  0xbc   :  { %3201 = vmatprep.subr.bf16.mxu1 %v3200_v55  ;;  %865 = vmatprep.mubr.f32.mxu0 %v4396_v32  ;;  %v308_v49 = vld [vmem:[#allocation5 + $0x558] sm:$0xff]  ;;  %v3218_v52 = vpack.c.bf16 %v301_v46, %v295_v44  ;;  %v3024_v53 = vpack.c.bf16 %v312_v48, %v306_v47  ;;  %v305_v54 = vld [vmem:[#allocation5 + $0x540] sm:$0xff]  ;;  %v311_v55 = vld [vmem:[#allocation5 + $0x570] sm:$0xff] }
  0xbd   :  { %1149 = vmatprep.mubr.f32.mxu1 %v4396_v32  ;;  %v307_v56 = vld [vmem:[#allocation5 + $0x550] sm:$0xff]  ;;  %v3220_v57 = vpack.c.bf16 %v314_v50, %v308_v49  ;;  %v313_v58 = vld [vmem:[#allocation5 + $0x580] sm:$0xff]  ;;  %v318_v59 = vld [vmem:[#allocation5 + $0x5a8] sm:$0xff] }
  0xbe   :  { %3007 = vmatpush1.bf16.msra.mxu0 %v3006_v63  ;;  %v324_v60 = vld [vmem:[#allocation5 + $0x5d8] sm:$0xff]  ;;  %v326_v63 = vld [vmem:[#allocation5 + $0x5e8] sm:$0xff]  ;;  %v317_v3 = vld [vmem:[#allocation5 + $0x5a0] sm:$0xff] }
  0xbf   :  { %3203 = vmatpush1.bf16.msra.mxu1 %v3202_v0  ;;  %3009 = vmatprep.subr.bf16.mxu0 %v3008_v1  ;;  %v320_v62 = vld [vmem:[#allocation5 + $0x5b8] sm:$0xff]  ;;  %v3026_v0 = vpack.c.bf16 %v311_v55, %v305_v54  ;;  %v3222_v1 = vpack.c.bf16 %v313_v58, %v307_v56  ;;  %v3028_v2 = vpack.c.bf16 %v324_v60, %v318_v59  ;;  %v323_v4 = vld [vmem:[#allocation5 + $0x5d0] sm:$0xff]  ;;  %v325_v7 = vld [vmem:[#allocation5 + $0x5e0] sm:$0xff] }
  0xc0   :  { %3205 = vmatprep.subr.bf16.mxu1 %v3204_v5  ;;  %v319_v5 = vld [vmem:[#allocation5 + $0x5b0] sm:$0xff]  ;;  %v3224_v6 = vpack.c.bf16 %v326_v63, %v320_v62  ;;  %v330_v8 = vld [vmem:[#allocation5 + $0x608] sm:$0xff]  ;;  %v336_v9 = vld [vmem:[#allocation5 + $0x638] sm:$0xff] }
  0xc1   :  { %v338_v13 = vld [vmem:[#allocation5 + $0x648] sm:$0xff]  ;;  %v3032_v16 = vpack.c.bf16 %v336_v9, %v330_v8  ;;  %v329_v17 = vld [vmem:[#allocation5 + $0x600] sm:$0xff]  ;;  %v335_v18 = vld [vmem:[#allocation5 + $0x630] sm:$0xff] }
  0xc2   :  { %3011 = vmatpush1.bf16.msra.mxu0 %v3010_v12  ;;  %v332_v12 = vld [vmem:[#allocation5 + $0x618] sm:$0xff]  ;;  %v337_v21 = vld [vmem:[#allocation5 + $0x640] sm:$0xff]  ;;  %v342_v23 = vld [vmem:[#allocation5 + $0x668] sm:$0xff] }
  0xc3   :  { %3207 = vmatpush1.bf16.msra.mxu1 %v3206_v14  ;;  %3013 = vmatprep.subr.bf16.mxu0 %v3012_v15  ;;  %v3030_v14 = vpack.c.bf16 %v323_v4, %v317_v3  ;;  %v3226_v15 = vpack.c.bf16 %v325_v7, %v319_v5  ;;  %v3228_v20 = vpack.c.bf16 %v338_v13, %v332_v12  ;;  %v348_v24 = vld [vmem:[#allocation5 + $0x698] sm:$0xff]  ;;  %v341_v31 = vld [vmem:[#allocation5 + $0x660] sm:$0xff]  ;;  %v343_v34 = vld [vmem:[#allocation5 + $0x670] sm:$0xff] }
  0xc4   :  { %3209 = vmatprep.subr.bf16.mxu1 %v3208_v19  ;;  %v331_v19 = vld [vmem:[#allocation5 + $0x610] sm:$0xff]  ;;  %v344_v22 = vld [vmem:[#allocation5 + $0x678] sm:$0xff]  ;;  %v3036_v30 = vpack.c.bf16 %v348_v24, %v342_v23  ;;  %v349_v36 = vld [vmem:[#allocation5 + $0x6a0] sm:$0xff] }
  0xc5   :  { %v3230_v29 = vpack.c.bf16 %v337_v21, %v331_v19  ;;  %v354_v37 = vld [vmem:[#allocation5 + $0x6c8] sm:$0xff]  ;;  %v360_v38 = vld [vmem:[#allocation5 + $0x6f8] sm:$0xff]  ;;  %v3234_v43 = vpack.c.bf16 %v349_v36, %v343_v34  ;;  %v359_v46 = vld [vmem:[#allocation5 + $0x6f0] sm:$0xff] }
  0xc6   :  { %3015 = vmatpush1.bf16.msra.mxu0 %v3014_v26  ;;  %v4403_v26 = vrot.slane %v759_v10, %v4386_v11  ;;  %v3040_v44 = vpack.c.bf16 %v360_v38, %v354_v37  ;;  %v355_v47 = vld [vmem:[#allocation5 + $0x6d0] sm:$0xff]  ;;  %v361_v49 = vld [vmem:[#allocation5 + $0x700] sm:$0xff]  ;;  %v366_v50 = vld [vmem:[#allocation5 + $0x728] sm:$0xff] }
  0xc7   :  { %3211 = vmatpush1.bf16.msra.mxu1 %v3210_v27  ;;  %3017 = vmatprep.subr.bf16.mxu0 %v3016_v28  ;;  %v350_v27 = vld [vmem:[#allocation5 + $0x6a8] sm:$0xff]  ;;  %v3034_v28 = vpack.c.bf16 %v335_v18, %v329_v17  ;;  %v3238_v55 = vpack.c.bf16 %v361_v49, %v355_v47  ;;  %v371_v58 = vld [vmem:[#allocation5 + $0x750] sm:$0xff]  ;;  %v373_v62 = vld [vmem:[#allocation5 + $0x760] sm:$0xff] }
  0xc8   :  { %3213 = vmatprep.subr.bf16.mxu1 %v3212_v33  ;;  %v347_v33 = vld [vmem:[#allocation5 + $0x690] sm:$0xff]  ;;  %v3232_v35 = vpack.c.bf16 %v350_v27, %v344_v22  ;;  %v378_v63 = vld [vmem:[#allocation5 + $0x788] sm:$0xff]  ;;  %v385_v10 = vld [vmem:[#allocation5 + $0x7c0] sm:$0xff] }
  0xc9   :  { %v3038_v42 = vpack.c.bf16 %v347_v33, %v341_v31  ;;  %v367_v59 = vld [vmem:[#allocation5 + $0x730] sm:$0xff]  ;;  %v390_v12 = vld [vmem:[#allocation5 + $0x7e8] sm:$0xff]  ;;  %v396_v13 = vld [vmem:[#allocation5 + $0x818] sm:$0xff] }
  0xca   :  { %3019 = vmatpush1.bf16.msra.mxu0 %v3018_v39  ;;  %v4407_v39 = vcombine.high %v4403_v26, %v4403_v26  ;;  %v3242_v4 = vpack.c.bf16 %v373_v62, %v367_v59  ;;  %v383_v7 = vld [vmem:[#allocation5 + $0x7b0] sm:$0xff]  ;;  %v3052_v18 = vpack.c.bf16 %v396_v13, %v390_v12  ;;  %v389_v19 = vld [vmem:[#allocation5 + $0x7e0] sm:$0xff]  ;;  %v402_v22 = vld [vmem:[#allocation5 + $0x848] sm:$0xff] }
  0xcb   :  { %3215 = vmatpush1.bf16.msra.mxu1 %v3214_v40  ;;  %3021 = vmatprep.subr.bf16.mxu0 %v3020_v41  ;;  %v356_v40 = vld [vmem:[#allocation5 + $0x6d8] sm:$0xff]  ;;  %v362_v41 = vld [vmem:[#allocation5 + $0x708] sm:$0xff]  ;;  %v379_v8 = vld [vmem:[#allocation5 + $0x790] sm:$0xff] }
  0xcc   :  { %3217 = vmatprep.subr.bf16.mxu1 %v3216_v45  ;;  %v353_v45 = vld [vmem:[#allocation5 + $0x6c0] sm:$0xff]  ;;  %v3236_v48 = vpack.c.bf16 %v362_v41, %v356_v40  ;;  %v3246_v17 = vpack.c.bf16 %v385_v10, %v379_v8  ;;  %v391_v21 = vld [vmem:[#allocation5 + $0x7f0] sm:$0xff]  ;;  %v408_v27 = vld [vmem:[#allocation5 + $0x878] sm:$0xff] }
  0xcd   :  { %v3042_v54 = vpack.c.bf16 %v359_v46, %v353_v45  ;;  %v397_v24 = vld [vmem:[#allocation5 + $0x820] sm:$0xff]  ;;  %v3056_v33 = vpack.c.bf16 %v408_v27, %v402_v22  ;;  %v403_v36 = vld [vmem:[#allocation5 + $0x850] sm:$0xff]  ;;  %v414_v40 = vld [vmem:[#allocation5 + $0x8a8] sm:$0xff] }
  0xce   :  { %3023 = vmatpush1.bf16.msra.mxu0 %v3022_v51  ;;  %v372_v51 = vld [vmem:[#allocation5 + $0x758] sm:$0xff]  ;;  %v3250_v31 = vpack.c.bf16 %v397_v24, %v391_v21  ;;  %v401_v34 = vld [vmem:[#allocation5 + $0x840] sm:$0xff]  ;;  %v415_v49 = vld [vmem:[#allocation5 + $0x8b0] sm:$0xff] }
  0xcf   :  { %3219 = vmatpush1.bf16.msra.mxu1 %v3218_v52  ;;  %3025 = vmatprep.subr.bf16.mxu0 %v3024_v53  ;;  %v368_v52 = vld [vmem:[#allocation5 + $0x738] sm:$0xff]  ;;  %v374_v53 = vld [vmem:[#allocation5 + $0x768] sm:$0xff]  ;;  %v3044_v56 = vpack.c.bf16 %v372_v51, %v366_v50  ;;  %v409_v38 = vld [vmem:[#allocation5 + $0x880] sm:$0xff] }
  0xd0   :  { %3221 = vmatprep.subr.bf16.mxu1 %v3220_v57  ;;  %v365_v57 = vld [vmem:[#allocation5 + $0x720] sm:$0xff]  ;;  %v3240_v60 = vpack.c.bf16 %v374_v53, %v368_v52  ;;  %v420_v41 = vld [vmem:[#allocation5 + $0x8d8] sm:$0xff]  ;;  %v3254_v45 = vpack.c.bf16 %v409_v38, %v403_v36  ;;  %v426_v52 = vld [vmem:[#allocation5 + $0x908] sm:$0xff] }
  0xd1   :  { %v3046_v3 = vpack.c.bf16 %v371_v58, %v365_v57  ;;  %v3060_v46 = vpack.c.bf16 %v420_v41, %v414_v40  ;;  %v413_v47 = vld [vmem:[#allocation5 + $0x8a0] sm:$0xff]  ;;  %v432_v53 = vld [vmem:[#allocation5 + $0x938] sm:$0xff]  ;;  %v427_v62 = vld [vmem:[#allocation5 + $0x910] sm:$0xff] }
  0xd2   :  { %3027 = vmatpush1.bf16.msra.mxu0 %v3026_v0  ;;  %v384_v0 = vld [vmem:[#allocation5 + $0x7b8] sm:$0xff]  ;;  %v421_v51 = vld [vmem:[#allocation5 + $0x8e0] sm:$0xff]  ;;  %v3064_v58 = vpack.c.bf16 %v432_v53, %v426_v52  ;;  %v439_v10 = vld [vmem:[#allocation5 + $0x970] sm:$0xff] }
  0xd3   :  { %3223 = vmatpush1.bf16.msra.mxu1 %v3222_v1  ;;  %3029 = vmatprep.subr.bf16.mxu0 %v3028_v2  ;;  %v380_v1 = vld [vmem:[#allocation5 + $0x798] sm:$0xff]  ;;  %v386_v2 = vld [vmem:[#allocation5 + $0x7c8] sm:$0xff]  ;;  %v3048_v5 = vpack.c.bf16 %v384_v0, %v378_v63  ;;  %v3258_v57 = vpack.c.bf16 %v421_v51, %v415_v49  ;;  %v425_v59 = vld [vmem:[#allocation5 + $0x900] sm:$0xff] }
  0xd4   :  { %3225 = vmatprep.subr.bf16.mxu1 %v3224_v6  ;;  %v377_v6 = vld [vmem:[#allocation5 + $0x780] sm:$0xff]  ;;  %v3244_v9 = vpack.c.bf16 %v386_v2, %v380_v1  ;;  %v438_v1 = vld [vmem:[#allocation5 + $0x968] sm:$0xff]  ;;  %v444_v2 = vld [vmem:[#allocation5 + $0x998] sm:$0xff] }
  0xd5   :  { %v433_v0 = vld [vmem:[#allocation5 + $0x940] sm:$0xff]  ;;  %v451_v24 = vld [vmem:[#allocation5 + $0x9d0] sm:$0xff] }
  0xd6   :  { %3031 = vmatpush1.bf16.msra.mxu0 %v3030_v14  ;;  %v392_v14 = vld [vmem:[#allocation5 + $0x7f8] sm:$0xff]  ;;  %v437_v8 = vld [vmem:[#allocation5 + $0x960] sm:$0xff]  ;;  %v463_v38 = vld [vmem:[#allocation5 + $0xa30] sm:$0xff] }
  0xd7   :  { %3227 = vmatpush1.bf16.msra.mxu1 %v3226_v15  ;;  %3033 = vmatprep.subr.bf16.mxu0 %v3032_v16  ;;  %v398_v15 = vld [vmem:[#allocation5 + $0x828] sm:$0xff]  ;;  %v3050_v16 = vpack.c.bf16 %v383_v7, %v377_v6  ;;  %v3262_v6 = vpack.c.bf16 %v433_v0, %v427_v62  ;;  %v3068_v7 = vpack.c.bf16 %v444_v2, %v438_v1  ;;  %v445_v13 = vld [vmem:[#allocation5 + $0x9a0] sm:$0xff]  ;;  %v475_v51 = vld [vmem:[#allocation5 + $0xa90] sm:$0xff] }
  0xd8   :  { %3229 = vmatprep.subr.bf16.mxu1 %v3228_v20  ;;  %v395_v20 = vld [vmem:[#allocation5 + $0x810] sm:$0xff]  ;;  %v3248_v23 = vpack.c.bf16 %v398_v15, %v392_v14  ;;  %v450_v14 = vld [vmem:[#allocation5 + $0x9c8] sm:$0xff]  ;;  %v456_v15 = vld [vmem:[#allocation5 + $0x9f8] sm:$0xff] }
  0xd9   :  { %866 = vmatmul.mubr.f32.vlgmr.msra.gmra.mrb[0].mxu0 %v4392_v25  ;;  %v449_v21 = vld [vmem:[#allocation5 + $0x9c0] sm:$0xff]  ;;  %v487_v0 = vld [vmem:[#allocation5 + $0xaf0] sm:$0xff] }
  0xda   :  { %3035 = vmatpush1.bf16.msra.mxu0 %v3034_v28  ;;  %1150 = vmatmul.mubr.f32.vlgmr.msra.gmra.mrb[0].mxu1 %v4392_v25  ;;  %v404_v28 = vld [vmem:[#allocation5 + $0x858] sm:$0xff]  ;;  %v457_v27 = vld [vmem:[#allocation5 + $0xa00] sm:$0xff] }
  0xdb   :  { %3231 = vmatpush1.bf16.msra.mxu1 %v3230_v29  ;;  %3037 = vmatprep.subr.bf16.mxu0 %v3036_v30  ;;  %v410_v29 = vld [vmem:[#allocation5 + $0x888] sm:$0xff]  ;;  %v3054_v30 = vpack.c.bf16 %v395_v20, %v389_v19  ;;  %v3266_v19 = vpack.c.bf16 %v445_v13, %v439_v10  ;;  %v3072_v20 = vpack.c.bf16 %v456_v15, %v450_v14  ;;  %v461_v36 = vld [vmem:[#allocation5 + $0xa20] sm:$0xff]  ;;  %v499_v13 = vld [vmem:[#allocation5 + $0xb50] sm:$0xff] }
  0xdc   :  { %3233 = vmatprep.subr.bf16.mxu1 %v3232_v35  ;;  %936 = vmatprep.mubr.f32.mxu0 %v4407_v39  ;;  %v407_v35 = vld [vmem:[#allocation5 + $0x870] sm:$0xff]  ;;  %v3252_v37 = vpack.c.bf16 %v410_v29, %v404_v28  ;;  %v462_v28 = vld [vmem:[#allocation5 + $0xa28] sm:$0xff]  ;;  %v468_v29 = vld [vmem:[#allocation5 + $0xa58] sm:$0xff] }
  0xdd   :  { %1220 = vmatprep.mubr.f32.mxu1 %v4407_v39  ;;  %v469_v41 = vld [vmem:[#allocation5 + $0xa60] sm:$0xff] }
  0xde   :  { %3039 = vmatpush1.bf16.msra.mxu0 %v3038_v42  ;;  %v416_v42 = vld [vmem:[#allocation5 + $0x8b8] sm:$0xff]  ;;  %v473_v49 = vld [vmem:[#allocation5 + $0xa80] sm:$0xff] }
  0xdf   :  { %3235 = vmatpush1.bf16.msra.mxu1 %v3234_v43  ;;  %3041 = vmatprep.subr.bf16.mxu0 %v3040_v44  ;;  %v422_v43 = vld [vmem:[#allocation5 + $0x8e8] sm:$0xff]  ;;  %v3058_v44 = vpack.c.bf16 %v407_v35, %v401_v34  ;;  %v3270_v34 = vpack.c.bf16 %v457_v27, %v451_v24  ;;  %v3076_v35 = vpack.c.bf16 %v468_v29, %v462_v28  ;;  %v481_v53 = vld [vmem:[#allocation5 + $0xac0] sm:$0xff]  ;;  %v511_v27 = vld [vmem:[#allocation5 + $0xbb0] sm:$0xff] }
  0xe0   :  { %3237 = vmatprep.subr.bf16.mxu1 %v3236_v48  ;;  %v419_v48 = vld [vmem:[#allocation5 + $0x8d0] sm:$0xff]  ;;  %v3256_v50 = vpack.c.bf16 %v422_v43, %v416_v42  ;;  %v474_v42 = vld [vmem:[#allocation5 + $0xa88] sm:$0xff]  ;;  %v480_v43 = vld [vmem:[#allocation5 + $0xab8] sm:$0xff] }
  0xe1   :  { %v485_v62 = vld [vmem:[#allocation5 + $0xae0] sm:$0xff] }
  0xe2   :  { %3043 = vmatpush1.bf16.msra.mxu0 %v3042_v54  ;;  %v428_v54 = vld [vmem:[#allocation5 + $0x918] sm:$0xff]  ;;  %v493_v2 = vld [vmem:[#allocation5 + $0xb20] sm:$0xff] }
  0xe3   :  { %3239 = vmatpush1.bf16.msra.mxu1 %v3238_v55  ;;  %3045 = vmatprep.subr.bf16.mxu0 %v3044_v56  ;;  %v434_v55 = vld [vmem:[#allocation5 + $0x948] sm:$0xff]  ;;  %v3062_v56 = vpack.c.bf16 %v419_v48, %v413_v47  ;;  %v3274_v47 = vpack.c.bf16 %v469_v41, %v463_v38  ;;  %v3080_v48 = vpack.c.bf16 %v480_v43, %v474_v42  ;;  %v497_v10 = vld [vmem:[#allocation5 + $0xb40] sm:$0xff]  ;;  %v523_v41 = vld [vmem:[#allocation5 + $0xc10] sm:$0xff] }
  0xe4   :  { %3241 = vmatprep.subr.bf16.mxu1 %v3240_v60  ;;  %v431_v60 = vld [vmem:[#allocation5 + $0x930] sm:$0xff]  ;;  %v3260_v63 = vpack.c.bf16 %v434_v55, %v428_v54  ;;  %v486_v54 = vld [vmem:[#allocation5 + $0xae8] sm:$0xff]  ;;  %v492_v55 = vld [vmem:[#allocation5 + $0xb18] sm:$0xff] }
  0xe5   :  { %v505_v15 = vld [vmem:[#allocation5 + $0xb80] sm:$0xff] }
  0xe6   :  { %3047 = vmatpush1.bf16.msra.mxu0 %v3046_v3  ;;  %v440_v3 = vld [vmem:[#allocation5 + $0x978] sm:$0xff]  ;;  %v509_v24 = vld [vmem:[#allocation5 + $0xba0] sm:$0xff] }
  0xe7   :  { %3243 = vmatpush1.bf16.msra.mxu1 %v3242_v4  ;;  %3049 = vmatprep.subr.bf16.mxu0 %v3048_v5  ;;  %v446_v4 = vld [vmem:[#allocation5 + $0x9a8] sm:$0xff]  ;;  %v3066_v5 = vpack.c.bf16 %v431_v60, %v425_v59  ;;  %v3278_v59 = vpack.c.bf16 %v481_v53, %v475_v51  ;;  %v3084_v60 = vpack.c.bf16 %v492_v55, %v486_v54  ;;  %v517_v29 = vld [vmem:[#allocation5 + $0xbe0] sm:$0xff]  ;;  %v539_v53 = vld [vmem:[#allocation5 + $0xc90] sm:$0xff] }
  0xe8   :  { %3245 = vmatprep.subr.bf16.mxu1 %v3244_v9  ;;  %v443_v9 = vld [vmem:[#allocation5 + $0x990] sm:$0xff]  ;;  %v3264_v12 = vpack.c.bf16 %v446_v4, %v440_v3  ;;  %v498_v3 = vld [vmem:[#allocation5 + $0xb48] sm:$0xff]  ;;  %v504_v4 = vld [vmem:[#allocation5 + $0xb78] sm:$0xff] }
  0xe9   :  { %v521_v38 = vld [vmem:[#allocation5 + $0xc00] sm:$0xff]  ;;  %v535_v54 = vld [vmem:[#allocation5 + $0xc70] sm:$0xff] }
  0xea   :  { %3051 = vmatpush1.bf16.msra.mxu0 %v3050_v16  ;;  %v452_v16 = vld [vmem:[#allocation5 + $0x9d8] sm:$0xff]  ;;  %v529_v43 = vld [vmem:[#allocation5 + $0xc40] sm:$0xff] }
  0xeb   :  { %3247 = vmatpush1.bf16.msra.mxu1 %v3246_v17  ;;  %3053 = vmatprep.subr.bf16.mxu0 %v3052_v18  ;;  %v458_v17 = vld [vmem:[#allocation5 + $0xa08] sm:$0xff]  ;;  %v3070_v18 = vpack.c.bf16 %v443_v9, %v437_v8  ;;  %v3282_v8 = vpack.c.bf16 %v493_v2, %v487_v0  ;;  %v3088_v9 = vpack.c.bf16 %v504_v4, %v498_v3  ;;  %v545_v3 = vld [vmem:[#allocation5 + $0xcc0] sm:$0xff]  ;;  %v551_v4 = vld [vmem:[#allocation5 + $0xcf0] sm:$0xff] }
  0xec   :  { %3249 = vmatprep.subr.bf16.mxu1 %v3248_v23  ;;  %v455_v23 = vld [vmem:[#allocation5 + $0x9f0] sm:$0xff]  ;;  %v3268_v22 = vpack.c.bf16 %v458_v17, %v452_v16  ;;  %v510_v16 = vld [vmem:[#allocation5 + $0xba8] sm:$0xff]  ;;  %v516_v17 = vld [vmem:[#allocation5 + $0xbd8] sm:$0xff] }
  0xee   :  { %3055 = vmatpush1.bf16.msra.mxu0 %v3054_v30  ;;  %v464_v30 = vld [vmem:[#allocation5 + $0xa38] sm:$0xff] }
  0xef   :  { %3251 = vmatpush1.bf16.msra.mxu1 %v3250_v31  ;;  %3057 = vmatprep.subr.bf16.mxu0 %v3056_v33  ;;  %v470_v31 = vld [vmem:[#allocation5 + $0xa68] sm:$0xff]  ;;  %v3074_v33 = vpack.c.bf16 %v455_v23, %v449_v21  ;;  %v3286_v21 = vpack.c.bf16 %v505_v15, %v499_v13  ;;  %v3092_v23 = vpack.c.bf16 %v516_v17, %v510_v16  ;;  %v557_v16 = vld [vmem:[#allocation5 + $0xd20] sm:$0xff]  ;;  %v563_v17 = vld [vmem:[#allocation5 + $0xd50] sm:$0xff] }
  0xf0   :  { %3253 = vmatprep.subr.bf16.mxu1 %v3252_v37  ;;  %v467_v37 = vld [vmem:[#allocation5 + $0xa50] sm:$0xff]  ;;  %v3272_v40 = vpack.c.bf16 %v470_v31, %v464_v30  ;;  %v522_v30 = vld [vmem:[#allocation5 + $0xc08] sm:$0xff]  ;;  %v528_v31 = vld [vmem:[#allocation5 + $0xc38] sm:$0xff]  ;;  %v3106_v13 = vpack.c.bf16 %v551_v4, %v545_v3 }
  0xf1   :  { %v608_v3 = vld [vmem:[#allocation5 + $0xeb8] sm:$0xff]  ;;  %v614_v4 = vld [vmem:[#allocation5 + $0xee8] sm:$0xff] }
  0xf2   :  { %3059 = vmatpush1.bf16.msra.mxu0 %v3058_v44  ;;  %v476_v44 = vld [vmem:[#allocation5 + $0xa98] sm:$0xff] }
  0xf3   :  { %3255 = vmatpush1.bf16.msra.mxu1 %v3254_v45  ;;  %3061 = vmatprep.subr.bf16.mxu0 %v3060_v46  ;;  %v482_v45 = vld [vmem:[#allocation5 + $0xac8] sm:$0xff]  ;;  %v3078_v46 = vpack.c.bf16 %v467_v37, %v461_v36  ;;  %v3290_v36 = vpack.c.bf16 %v517_v29, %v511_v27  ;;  %v3096_v37 = vpack.c.bf16 %v528_v31, %v522_v30  ;;  %v569_v30 = vld [vmem:[#allocation5 + $0xd80] sm:$0xff]  ;;  %v575_v31 = vld [vmem:[#allocation5 + $0xdb0] sm:$0xff] }
  0xf4   :  { %3257 = vmatprep.subr.bf16.mxu1 %v3256_v50  ;;  %v479_v50 = vld [vmem:[#allocation5 + $0xab0] sm:$0xff]  ;;  %v3276_v52 = vpack.c.bf16 %v482_v45, %v476_v44  ;;  %v534_v44 = vld [vmem:[#allocation5 + $0xc68] sm:$0xff]  ;;  %v540_v45 = vld [vmem:[#allocation5 + $0xc98] sm:$0xff]  ;;  %v3110_v27 = vpack.c.bf16 %v563_v17, %v557_v16 }
  0xf5   :  { %v3100_v51 = vpack.c.bf16 %v540_v45, %v534_v44  ;;  %v581_v44 = vld [vmem:[#allocation5 + $0xde0] sm:$0xff]  ;;  %v587_v45 = vld [vmem:[#allocation5 + $0xe10] sm:$0xff]  ;;  %v620_v16 = vld [vmem:[#allocation5 + $0xf18] sm:$0xff] }
  0xf6   :  { %3063 = vmatpush1.bf16.msra.mxu0 %v3062_v56  ;;  %v488_v56 = vld [vmem:[#allocation5 + $0xaf8] sm:$0xff]  ;;  %v626_v17 = vld [vmem:[#allocation5 + $0xf48] sm:$0xff] }
  0xf7   :  { %3259 = vmatpush1.bf16.msra.mxu1 %v3258_v57  ;;  %3065 = vmatprep.subr.bf16.mxu0 %v3064_v58  ;;  %v494_v57 = vld [vmem:[#allocation5 + $0xb28] sm:$0xff]  ;;  %v3082_v58 = vpack.c.bf16 %v479_v50, %v473_v49  ;;  %v4413_v49 = vld [vmem:[#allocation2 + $0x8] sm:$0x3f]  ;;  %v3294_v50 = vpack.c.bf16 %v529_v43, %v523_v41  ;;  %v3114_v41 = vpack.c.bf16 %v575_v31, %v569_v30 }
  0xf8   :  { %3261 = vmatprep.subr.bf16.mxu1 %v3260_v63  ;;  %v491_v63 = vld [vmem:[#allocation5 + $0xb10] sm:$0xff]  ;;  %v3280_v1 = vpack.c.bf16 %v494_v57, %v488_v56  ;;  %v4417_v55 = vrot.slane %v4413_v49, %v4386_v11  ;;  %v541_v57 = vld [vmem:[#allocation5 + $0xca0] sm:$0xff]  ;;  %v632_v30 = vld [vmem:[#allocation5 + $0xf78] sm:$0xff] }
  0xf9   :  { %v638_v31 = vld [vmem:[#allocation5 + $0xfa8] sm:$0xff] }
  0xfa   :  { %3067 = vmatpush1.bf16.msra.mxu0 %v3066_v5  ;;  %v500_v5 = vld [vmem:[#allocation5 + $0xb58] sm:$0xff] }
  0xfb   :  { %3263 = vmatpush1.bf16.msra.mxu1 %v3262_v6  ;;  %3069 = vmatprep.subr.bf16.mxu0 %v3068_v7  ;;  %v506_v6 = vld [vmem:[#allocation5 + $0xb88] sm:$0xff]  ;;  %v3086_v7 = vpack.c.bf16 %v491_v63, %v485_v62  ;;  %v4422_v63 = vcombine.high %v4417_v55, %v4417_v55 }
  0xfc   :  { %3265 = vmatprep.subr.bf16.mxu1 %v3264_v12  ;;  %v503_v12 = vld [vmem:[#allocation5 + $0xb70] sm:$0xff]  ;;  %v3284_v14 = vpack.c.bf16 %v506_v6, %v500_v5  ;;  %v554_v62 = vld [vmem:[#allocation5 + $0xd08] sm:$0xff] }
  0xfd   :  { %v547_v5 = vld [vmem:[#allocation5 + $0xcd0] sm:$0xff] }
  0xfe   :  { %3071 = vmatpush1.bf16.msra.mxu0 %v3070_v18  ;;  %v512_v18 = vld [vmem:[#allocation5 + $0xbb8] sm:$0xff] }
  0xff   :  { %3267 = vmatpush1.bf16.msra.mxu1 %v3266_v19  ;;  %3073 = vmatprep.subr.bf16.mxu0 %v3072_v20  ;;  %v518_v19 = vld [vmem:[#allocation5 + $0xbe8] sm:$0xff]  ;;  %v3090_v20 = vpack.c.bf16 %v503_v12, %v497_v10  ;;  %v560_v10 = vld [vmem:[#allocation5 + $0xd38] sm:$0xff] }
 0x100   :  { %3269 = vmatprep.subr.bf16.mxu1 %v3268_v22  ;;  %v515_v22 = vld [vmem:[#allocation5 + $0xbd0] sm:$0xff]  ;;  %v3288_v28 = vpack.c.bf16 %v518_v19, %v512_v18  ;;  %v566_v12 = vld [vmem:[#allocation5 + $0xd68] sm:$0xff] }
 0x101   :  { %v559_v18 = vld [vmem:[#allocation5 + $0xd30] sm:$0xff]  ;;  %v3304_v19 = vpack.c.bf16 %v566_v12, %v560_v10  ;;  %v3320_v12 = vpack.c.bf16 %v614_v4, %v608_v3 }
 0x102   :  { %3075 = vmatpush1.bf16.msra.mxu0 %v3074_v33  ;;  %v524_v33 = vld [vmem:[#allocation5 + $0xc18] sm:$0xff]  ;;  %v607_v10 = vld [vmem:[#allocation5 + $0xeb0] sm:$0xff] }
 0x103   :  { %3271 = vmatpush1.bf16.msra.mxu1 %v3270_v34  ;;  %3077 = vmatprep.subr.bf16.mxu0 %v3076_v35  ;;  %v530_v34 = vld [vmem:[#allocation5 + $0xc48] sm:$0xff]  ;;  %v3094_v35 = vpack.c.bf16 %v515_v22, %v509_v24  ;;  %v572_v24 = vld [vmem:[#allocation5 + $0xd98] sm:$0xff]  ;;  %v655_v3 = vld [vmem:[#allocation5 + $0x1030] sm:$0xff] }
 0x104   :  { %3273 = vmatprep.subr.bf16.mxu1 %v3272_v40  ;;  %v527_v40 = vld [vmem:[#allocation5 + $0xc30] sm:$0xff]  ;;  %v3292_v42 = vpack.c.bf16 %v530_v34, %v524_v33  ;;  %v578_v22 = vld [vmem:[#allocation5 + $0xdc8] sm:$0xff] }
 0x105   :  { %v571_v33 = vld [vmem:[#allocation5 + $0xd90] sm:$0xff]  ;;  %v3308_v34 = vpack.c.bf16 %v578_v22, %v572_v24  ;;  %v3324_v22 = vpack.c.bf16 %v626_v17, %v620_v16 }
 0x106   :  { %3079 = vmatpush1.bf16.msra.mxu0 %v3078_v46  ;;  %v536_v46 = vld [vmem:[#allocation5 + $0xc78] sm:$0xff]  ;;  %v619_v24 = vld [vmem:[#allocation5 + $0xf10] sm:$0xff] }
 0x107   :  { %3275 = vmatpush1.bf16.msra.mxu1 %v3274_v47  ;;  %3081 = vmatprep.subr.bf16.mxu0 %v3080_v48  ;;  %v542_v47 = vld [vmem:[#allocation5 + $0xca8] sm:$0xff]  ;;  %v3098_v48 = vpack.c.bf16 %v527_v40, %v521_v38  ;;  %v584_v38 = vld [vmem:[#allocation5 + $0xdf8] sm:$0xff]  ;;  %v667_v16 = vld [vmem:[#allocation5 + $0x1090] sm:$0xff] }
 0x108   :  { %3277 = vmatprep.subr.bf16.mxu1 %v3276_v52  ;;  %v533_v52 = vld [vmem:[#allocation5 + $0xc60] sm:$0xff]  ;;  %v3296_v56 = vpack.c.bf16 %v542_v47, %v536_v46  ;;  %v590_v40 = vld [vmem:[#allocation5 + $0xe28] sm:$0xff]  ;;  %v583_v46 = vld [vmem:[#allocation5 + $0xdf0] sm:$0xff] }
 0x109   :  { %v3102_v0 = vpack.c.bf16 %v539_v53, %v533_v52  ;;  %v3312_v47 = vpack.c.bf16 %v590_v40, %v584_v38  ;;  %v596_v52 = vld [vmem:[#allocation5 + $0xe58] sm:$0xff]  ;;  %v602_v53 = vld [vmem:[#allocation5 + $0xe88] sm:$0xff]  ;;  %v631_v38 = vld [vmem:[#allocation5 + $0xf70] sm:$0xff]  ;;  %v3328_v40 = vpack.c.bf16 %v638_v31, %v632_v30 }
 0x10a   :  { %3083 = vmatpush1.bf16.msra.mxu0 %v3082_v58  ;;  %v546_v58 = vld [vmem:[#allocation5 + $0xcc8] sm:$0xff]  ;;  %v679_v30 = vld [vmem:[#allocation5 + $0x10f0] sm:$0xff] }
 0x10b   :  { %3279 = vmatpush1.bf16.msra.mxu1 %v3278_v59  ;;  %3085 = vmatprep.subr.bf16.mxu0 %v3084_v60  ;;  %v552_v59 = vld [vmem:[#allocation5 + $0xcf8] sm:$0xff] }
 0x10c   :  { %3281 = vmatprep.subr.bf16.mxu1 %v3280_v1  ;;  %v548_v60 = vld [vmem:[#allocation5 + $0xcd8] sm:$0xff]  ;;  %v3298_v1 = vpack.c.bf16 %v541_v57, %v535_v54  ;;  %v3104_v2 = vpack.c.bf16 %v552_v59, %v546_v58  ;;  %v3118_v54 = vpack.c.bf16 %v587_v45, %v581_v44  ;;  %v593_v58 = vld [vmem:[#allocation5 + $0xe40] sm:$0xff]  ;;  %v599_v59 = vld [vmem:[#allocation5 + $0xe70] sm:$0xff] }
 0x10d   :  { %v3300_v6 = vpack.c.bf16 %v554_v62, %v548_v60  ;;  %v595_v60 = vld [vmem:[#allocation5 + $0xe50] sm:$0xff]  ;;  %v3316_v62 = vpack.c.bf16 %v602_v53, %v596_v52  ;;  %v644_v44 = vld [vmem:[#allocation5 + $0xfd8] sm:$0xff]  ;;  %v650_v45 = vld [vmem:[#allocation5 + $0x1008] sm:$0xff] }
 0x10e   :  { %3087 = vmatpush1.bf16.msra.mxu0 %v3086_v7  ;;  %v553_v7 = vld [vmem:[#allocation5 + $0xd00] sm:$0xff]  ;;  %v643_v52 = vld [vmem:[#allocation5 + $0xfd0] sm:$0xff]  ;;  %v3332_v53 = vpack.c.bf16 %v650_v45, %v644_v44 }
 0x10f   :  { %3283 = vmatpush1.bf16.msra.mxu1 %v3282_v8  ;;  %3089 = vmatprep.subr.bf16.mxu0 %v3088_v9  ;;  %v558_v8 = vld [vmem:[#allocation5 + $0xd28] sm:$0xff]  ;;  %v564_v9 = vld [vmem:[#allocation5 + $0xd58] sm:$0xff]  ;;  %v691_v44 = vld [vmem:[#allocation5 + $0x1150] sm:$0xff] }
 0x110   :  { %3285 = vmatprep.subr.bf16.mxu1 %v3284_v14  ;;  %v3302_v14 = vpack.c.bf16 %v553_v7, %v547_v5  ;;  %v3108_v15 = vpack.c.bf16 %v564_v9, %v558_v8  ;;  %v3122_v5 = vpack.c.bf16 %v599_v59, %v593_v58  ;;  %v605_v8 = vld [vmem:[#allocation5 + $0xea0] sm:$0xff]  ;;  %v611_v9 = vld [vmem:[#allocation5 + $0xed0] sm:$0xff]  ;;  %v656_v58 = vld [vmem:[#allocation5 + $0x1038] sm:$0xff] }
 0x111   :  { %v662_v59 = vld [vmem:[#allocation5 + $0x1068] sm:$0xff] }
 0x112   :  { %3091 = vmatpush1.bf16.msra.mxu0 %v3090_v20  ;;  %v565_v20 = vld [vmem:[#allocation5 + $0xd60] sm:$0xff]  ;;  %v3336_v4 = vpack.c.bf16 %v662_v59, %v656_v58  ;;  %v703_v58 = vld [vmem:[#allocation5 + $0x11b0] sm:$0xff] }
 0x113   :  { %3287 = vmatpush1.bf16.msra.mxu1 %v3286_v21  ;;  %3093 = vmatprep.subr.bf16.mxu0 %v3092_v23  ;;  %v570_v21 = vld [vmem:[#allocation5 + $0xd88] sm:$0xff]  ;;  %v576_v23 = vld [vmem:[#allocation5 + $0xdb8] sm:$0xff] }
 0x114   :  { %3289 = vmatprep.subr.bf16.mxu1 %v3288_v28  ;;  %v3306_v28 = vpack.c.bf16 %v565_v20, %v559_v18  ;;  %v3112_v29 = vpack.c.bf16 %v576_v23, %v570_v21  ;;  %v3126_v18 = vpack.c.bf16 %v611_v9, %v605_v8  ;;  %v617_v21 = vld [vmem:[#allocation5 + $0xf00] sm:$0xff]  ;;  %v623_v23 = vld [vmem:[#allocation5 + $0xf30] sm:$0xff]  ;;  %v668_v8 = vld [vmem:[#allocation5 + $0x1098] sm:$0xff] }
 0x115   :  { %v674_v9 = vld [vmem:[#allocation5 + $0x10c8] sm:$0xff] }
 0x116   :  { %3095 = vmatpush1.bf16.msra.mxu0 %v3094_v35  ;;  %v577_v35 = vld [vmem:[#allocation5 + $0xdc0] sm:$0xff]  ;;  %v3340_v17 = vpack.c.bf16 %v674_v9, %v668_v8  ;;  %v715_v9 = vld [vmem:[#allocation5 + $0x1210] sm:$0xff] }
 0x117   :  { %3291 = vmatpush1.bf16.msra.mxu1 %v3290_v36  ;;  %3097 = vmatprep.subr.bf16.mxu0 %v3096_v37  ;;  %v582_v36 = vld [vmem:[#allocation5 + $0xde8] sm:$0xff]  ;;  %v588_v37 = vld [vmem:[#allocation5 + $0xe18] sm:$0xff] }
 0x118   :  { %3293 = vmatprep.subr.bf16.mxu1 %v3292_v42  ;;  %v3310_v42 = vpack.c.bf16 %v577_v35, %v571_v33  ;;  %v3116_v43 = vpack.c.bf16 %v588_v37, %v582_v36  ;;  %v3130_v33 = vpack.c.bf16 %v623_v23, %v617_v21  ;;  %v629_v36 = vld [vmem:[#allocation5 + $0xf60] sm:$0xff]  ;;  %v635_v37 = vld [vmem:[#allocation5 + $0xf90] sm:$0xff]  ;;  %v680_v21 = vld [vmem:[#allocation5 + $0x10f8] sm:$0xff] }
 0x119   :  { %937 = vmatmul.mubr.f32.vlgmr.msra.gmra.mrb[0].mxu0 %v4403_v26  ;;  %v686_v23 = vld [vmem:[#allocation5 + $0x1128] sm:$0xff] }
 0x11a   :  { %3099 = vmatpush1.bf16.msra.mxu0 %v3098_v48  ;;  %1221 = vmatmul.mubr.f32.vlgmr.msra.gmra.mrb[0].mxu1 %v4403_v26  ;;  %v589_v48 = vld [vmem:[#allocation5 + $0xe20] sm:$0xff]  ;;  %v3344_v31 = vpack.c.bf16 %v686_v23, %v680_v21  ;;  %v154_v21 = vld [vmem:[#allocation5 + $0x88] sm:$0xff]  ;;  %v160_v23 = vld [vmem:[#allocation5 + $0xb8] sm:$0xff] }
 0x11b   :  { %3295 = vmatpush1.bf16.msra.mxu1 %v3294_v50  ;;  %3101 = vmatprep.subr.bf16.mxu0 %v3100_v51  ;;  %v594_v50 = vld [vmem:[#allocation5 + $0xe48] sm:$0xff]  ;;  %v600_v51 = vld [vmem:[#allocation5 + $0xe78] sm:$0xff] }
 0x11c   :  { %3297 = vmatprep.subr.bf16.mxu1 %v3296_v56  ;;  %1007 = vmatprep.mubr.f32.mxu0 %v4422_v63  ;;  %v3314_v56 = vpack.c.bf16 %v589_v48, %v583_v46  ;;  %v3120_v57 = vpack.c.bf16 %v600_v51, %v594_v50  ;;  %v3134_v46 = vpack.c.bf16 %v635_v37, %v629_v36  ;;  %v641_v50 = vld [vmem:[#allocation5 + $0xfc0] sm:$0xff]  ;;  %v647_v51 = vld [vmem:[#allocation5 + $0xff0] sm:$0xff]  ;;  %v692_v36 = vld [vmem:[#allocation5 + $0x1158] sm:$0xff] }
 0x11d   :  { %1291 = vmatprep.mubr.f32.mxu1 %v4422_v63  ;;  %v698_v37 = vld [vmem:[#allocation5 + $0x1188] sm:$0xff] }
 0x11e   :  { %3103 = vmatpush1.bf16.msra.mxu0 %v3102_v0  ;;  %v601_v0 = vld [vmem:[#allocation5 + $0xe80] sm:$0xff]  ;;  %v3348_v45 = vpack.c.bf16 %v698_v37, %v692_v36  ;;  %v184_v36 = vld [vmem:[#allocation5 + $0x178] sm:$0xff] }
 0x11f   :  { %3299 = vmatpush1.bf16.msra.mxu1 %v3298_v1  ;;  %3105 = vmatprep.subr.bf16.mxu0 %v3104_v2  ;;  %v606_v1 = vld [vmem:[#allocation5 + $0xea8] sm:$0xff]  ;;  %v612_v2 = vld [vmem:[#allocation5 + $0xed8] sm:$0xff] }
 0x120   :  { %3301 = vmatprep.subr.bf16.mxu1 %v3300_v6  ;;  %v3318_v6 = vpack.c.bf16 %v601_v0, %v595_v60  ;;  %v3124_v7 = vpack.c.bf16 %v612_v2, %v606_v1  ;;  %v3138_v60 = vpack.c.bf16 %v647_v51, %v641_v50  ;;  %v653_v1 = vld [vmem:[#allocation5 + $0x1020] sm:$0xff]  ;;  %v659_v2 = vld [vmem:[#allocation5 + $0x1050] sm:$0xff]  ;;  %v704_v50 = vld [vmem:[#allocation5 + $0x11b8] sm:$0xff] }
 0x121   :  { %v710_v51 = vld [vmem:[#allocation5 + $0x11e8] sm:$0xff] }
 0x122   :  { %3107 = vmatpush1.bf16.msra.mxu0 %v3106_v13  ;;  %v613_v13 = vld [vmem:[#allocation5 + $0xee0] sm:$0xff]  ;;  %v3352_v59 = vpack.c.bf16 %v710_v51, %v704_v50  ;;  %v208_v50 = vld [vmem:[#allocation5 + $0x238] sm:$0xff] }
 0x123   :  { %3303 = vmatpush1.bf16.msra.mxu1 %v3302_v14  ;;  %3109 = vmatprep.subr.bf16.mxu0 %v3108_v15  ;;  %v618_v14 = vld [vmem:[#allocation5 + $0xf08] sm:$0xff]  ;;  %v624_v15 = vld [vmem:[#allocation5 + $0xf38] sm:$0xff] }
 0x124   :  { %3305 = vmatprep.subr.bf16.mxu1 %v3304_v19  ;;  %v3322_v19 = vpack.c.bf16 %v613_v13, %v607_v10  ;;  %v3128_v20 = vpack.c.bf16 %v624_v15, %v618_v14  ;;  %v3142_v10 = vpack.c.bf16 %v659_v2, %v653_v1  ;;  %v665_v14 = vld [vmem:[#allocation5 + $0x1080] sm:$0xff]  ;;  %v671_v15 = vld [vmem:[#allocation5 + $0x10b0] sm:$0xff]  ;;  %v716_v1 = vld [vmem:[#allocation5 + $0x1218] sm:$0xff] }
 0x125   :  { %v722_v2 = vld [vmem:[#allocation5 + $0x1248] sm:$0xff] }
 0x126   :  { %3111 = vmatpush1.bf16.msra.mxu0 %v3110_v27  ;;  %v625_v27 = vld [vmem:[#allocation5 + $0xf40] sm:$0xff]  ;;  %v3356_v8 = vpack.c.bf16 %v722_v2, %v716_v1 }
 0x127   :  { %3307 = vmatpush1.bf16.msra.mxu1 %v3306_v28  ;;  %3113 = vmatprep.subr.bf16.mxu0 %v3112_v29  ;;  %v630_v28 = vld [vmem:[#allocation5 + $0xf68] sm:$0xff]  ;;  %v636_v29 = vld [vmem:[#allocation5 + $0xf98] sm:$0xff] }
 0x128   :  { %3309 = vmatprep.subr.bf16.mxu1 %v3308_v34  ;;  %v3326_v34 = vpack.c.bf16 %v625_v27, %v619_v24  ;;  %v3132_v35 = vpack.c.bf16 %v636_v29, %v630_v28  ;;  %v3146_v24 = vpack.c.bf16 %v671_v15, %v665_v14  ;;  %v677_v28 = vld [vmem:[#allocation5 + $0x10e0] sm:$0xff]  ;;  %v683_v29 = vld [vmem:[#allocation5 + $0x1110] sm:$0xff] }
 0x12a   :  { %3115 = vmatpush1.bf16.msra.mxu0 %v3114_v41  ;;  %v637_v41 = vld [vmem:[#allocation5 + $0xfa0] sm:$0xff] }
 0x12b   :  { %3311 = vmatpush1.bf16.msra.mxu1 %v3310_v42  ;;  %3117 = vmatprep.subr.bf16.mxu0 %v3116_v43  ;;  %v642_v42 = vld [vmem:[#allocation5 + $0xfc8] sm:$0xff]  ;;  %v648_v43 = vld [vmem:[#allocation5 + $0xff8] sm:$0xff] }
 0x12c   :  { %3313 = vmatprep.subr.bf16.mxu1 %v3312_v47  ;;  %v3330_v47 = vpack.c.bf16 %v637_v41, %v631_v38  ;;  %v3136_v48 = vpack.c.bf16 %v648_v43, %v642_v42  ;;  %v3150_v38 = vpack.c.bf16 %v683_v29, %v677_v28  ;;  %v689_v42 = vld [vmem:[#allocation5 + $0x1140] sm:$0xff]  ;;  %v695_v43 = vld [vmem:[#allocation5 + $0x1170] sm:$0xff]  ;;  %v166_v29 = vld [vmem:[#allocation5 + $0xe8] sm:$0xff] }
 0x12d   :  { %v159_v28 = vld [vmem:[#allocation5 + $0xb0] sm:$0xff] }
 0x12e   :  { %3119 = vmatpush1.bf16.msra.mxu0 %v3118_v54  ;;  %v649_v54 = vld [vmem:[#allocation5 + $0x1000] sm:$0xff] }
 0x12f   :  { %3315 = vmatpush1.bf16.msra.mxu1 %v3314_v56  ;;  %3121 = vmatprep.subr.bf16.mxu0 %v3120_v57  ;;  %v654_v56 = vld [vmem:[#allocation5 + $0x1028] sm:$0xff]  ;;  %v660_v57 = vld [vmem:[#allocation5 + $0x1058] sm:$0xff] }
 0x130   :  { %3317 = vmatprep.subr.bf16.mxu1 %v3316_v62  ;;  %v3334_v62 = vpack.c.bf16 %v649_v54, %v643_v52  ;;  %v3140_v0 = vpack.c.bf16 %v660_v57, %v654_v56  ;;  %v3154_v52 = vpack.c.bf16 %v695_v43, %v689_v42  ;;  %v701_v56 = vld [vmem:[#allocation5 + $0x11a0] sm:$0xff]  ;;  %v707_v57 = vld [vmem:[#allocation5 + $0x11d0] sm:$0xff]  ;;  %v190_v42 = vld [vmem:[#allocation5 + $0x1a8] sm:$0xff] }
 0x131   :  { %v196_v43 = vld [vmem:[#allocation5 + $0x1d8] sm:$0xff] }
 0x132   :  { %3123 = vmatpush1.bf16.msra.mxu0 %v3122_v5  ;;  %v661_v5 = vld [vmem:[#allocation5 + $0x1060] sm:$0xff] }
 0x133   :  { %3319 = vmatpush1.bf16.msra.mxu1 %v3318_v6  ;;  %3125 = vmatprep.subr.bf16.mxu0 %v3124_v7  ;;  %v666_v6 = vld [vmem:[#allocation5 + $0x1088] sm:$0xff]  ;;  %v672_v7 = vld [vmem:[#allocation5 + $0x10b8] sm:$0xff] }
 0x134   :  { %3321 = vmatprep.subr.bf16.mxu1 %v3320_v12  ;;  %v3338_v12 = vpack.c.bf16 %v661_v5, %v655_v3  ;;  %v3144_v13 = vpack.c.bf16 %v672_v7, %v666_v6  ;;  %v3158_v3 = vpack.c.bf16 %v707_v57, %v701_v56  ;;  %v713_v6 = vld [vmem:[#allocation5 + $0x1200] sm:$0xff]  ;;  %v719_v7 = vld [vmem:[#allocation5 + $0x1230] sm:$0xff]  ;;  %v220_v56 = vld [vmem:[#allocation5 + $0x298] sm:$0xff] }
 0x135   :  { %v3162_v14 = vpack.c.bf16 %v719_v7, %v713_v6  ;;  %v244_v6 = vld [vmem:[#allocation5 + $0x358] sm:$0xff]  ;;  %v1660_v7 = vld [vmem:[#allocation8 + $0x8] sm:$0xff] }
 0x136   :  { %3127 = vmatpush1.bf16.msra.mxu0 %v3126_v18  ;;  %v673_v18 = vld [vmem:[#allocation5 + $0x10c0] sm:$0xff] }
 0x137   :  { %3323 = vmatpush1.bf16.msra.mxu1 %v3322_v19  ;;  %3129 = vmatprep.subr.bf16.mxu0 %v3128_v20  ;;  %v678_v19 = vld [vmem:[#allocation5 + $0x10e8] sm:$0xff]  ;;  %v684_v20 = vld [vmem:[#allocation5 + $0x1118] sm:$0xff] }
 0x138   :  { %3325 = vmatprep.subr.bf16.mxu1 %v3324_v22  ;;  %v3342_v22 = vpack.c.bf16 %v673_v18, %v667_v16  ;;  %v3148_v27 = vpack.c.bf16 %v684_v20, %v678_v19  ;;  %v4226_v18 = vmov 0.0   ;;  %v141_v19 = vld [vmem:[#allocation5 + $0x20] sm:$0xff]  ;;  %v147_v20 = vld [vmem:[#allocation5 + $0x50] sm:$0xff] }
 0x13a   :  { %3131 = vmatpush1.bf16.msra.mxu0 %v3130_v33  ;;  %v685_v33 = vld [vmem:[#allocation5 + $0x1120] sm:$0xff] }
 0x13b   :  { %3327 = vmatpush1.bf16.msra.mxu1 %v3326_v34  ;;  %3133 = vmatprep.subr.bf16.mxu0 %v3132_v35  ;;  %v690_v34 = vld [vmem:[#allocation5 + $0x1148] sm:$0xff]  ;;  %v696_v35 = vld [vmem:[#allocation5 + $0x1178] sm:$0xff] }
 0x13c   :  { %3329 = vmatprep.subr.bf16.mxu1 %v3328_v40  ;;  %v3346_v40 = vpack.c.bf16 %v685_v33, %v679_v30  ;;  %v3152_v41 = vpack.c.bf16 %v696_v35, %v690_v34  ;;  %v172_v30 = vld [vmem:[#allocation5 + $0x118] sm:$0xff]  ;;  %v165_v34 = vld [vmem:[#allocation5 + $0xe0] sm:$0xff]  ;;  %v178_v35 = vld [vmem:[#allocation5 + $0x148] sm:$0xff] }
 0x13d   :  { %v3368_v33 = vpack.c.bf16 %v172_v30, %v166_v29 }
 0x13e   :  { %3135 = vmatpush1.bf16.msra.mxu0 %v3134_v46  ;;  %v697_v46 = vld [vmem:[#allocation5 + $0x1180] sm:$0xff] }
 0x13f   :  { %3331 = vmatpush1.bf16.msra.mxu1 %v3330_v47  ;;  %3137 = vmatprep.subr.bf16.mxu0 %v3136_v48  ;;  %v702_v47 = vld [vmem:[#allocation5 + $0x11a8] sm:$0xff]  ;;  %v708_v48 = vld [vmem:[#allocation5 + $0x11d8] sm:$0xff] }
 0x140   :  { %3333 = vmatprep.subr.bf16.mxu1 %v3332_v53  ;;  %v3350_v53 = vpack.c.bf16 %v697_v46, %v691_v44  ;;  %v3156_v54 = vpack.c.bf16 %v708_v48, %v702_v47  ;;  %v189_v46 = vld [vmem:[#allocation5 + $0x1a0] sm:$0xff]  ;;  %v195_v47 = vld [vmem:[#allocation5 + $0x1d0] sm:$0xff]  ;;  %v202_v48 = vld [vmem:[#allocation5 + $0x208] sm:$0xff] }
 0x141   :  { %v3380_v51 = vpack.c.bf16 %v208_v50, %v202_v48  ;;  %v1678_v48 = vld [vmem:[#allocation8 + $0x98] sm:$0xff]  ;;  %v1681_v50 = vld [vmem:[#allocation8 + $0xb0] sm:$0xff] }
 0x142   :  { %3139 = vmatpush1.bf16.msra.mxu0 %v3138_v60  ;;  %v709_v60 = vld [vmem:[#allocation5 + $0x11e0] sm:$0xff] }
 0x143   :  { %3335 = vmatpush1.bf16.msra.mxu1 %v3334_v62  ;;  %3141 = vmatprep.subr.bf16.mxu0 %v3140_v0  ;;  %v714_v62 = vld [vmem:[#allocation5 + $0x1208] sm:$0xff]  ;;  %v720_v0 = vld [vmem:[#allocation5 + $0x1238] sm:$0xff] }
 0x144   :  { %3337 = vmatprep.subr.bf16.mxu1 %v3336_v4  ;;  %v3354_v4 = vpack.c.bf16 %v709_v60, %v703_v58  ;;  %v3160_v5 = vpack.c.bf16 %v720_v0, %v714_v62  ;;  %v219_v60 = vld [vmem:[#allocation5 + $0x290] sm:$0xff]  ;;  %v226_v62 = vld [vmem:[#allocation5 + $0x2c8] sm:$0xff]  ;;  %v232_v0 = vld [vmem:[#allocation5 + $0x2f8] sm:$0xff] }
 0x145   :  { %v3388_v2 = vpack.c.bf16 %v232_v0, %v226_v62  ;;  %v1684_v62 = vld [vmem:[#allocation8 + $0xc8] sm:$0xff]  ;;  %v1687_v0 = vld [vmem:[#allocation8 + $0xe0] sm:$0xff] }
 0x146   :  { %3143 = vmatpush1.bf16.msra.mxu0 %v3142_v10  ;;  %v721_v10 = vld [vmem:[#allocation5 + $0x1240] sm:$0xff] }
 0x147   :  { %3339 = vmatpush1.bf16.msra.mxu1 %v3338_v12  ;;  %3145 = vmatprep.subr.bf16.mxu0 %v3144_v13  ;;  %v142_v12 = vld [vmem:[#allocation5 + $0x28] sm:$0xff]  ;;  %v148_v13 = vld [vmem:[#allocation5 + $0x58] sm:$0xff]  ;;  %v3358_v15 = vpack.c.bf16 %v721_v10, %v715_v9 }
 0x148   :  { %3341 = vmatprep.subr.bf16.mxu1 %v3340_v17  ;;  %v3360_v16 = vpack.c.bf16 %v148_v13, %v142_v12  ;;  %v776_v17 = vcombine.high %v4413_v49, %v4413_v49  ;;  %v3364_v49 = vpack.c.bf16 %v160_v23, %v154_v21  ;;  %v1659_v10 = vld [vmem:[#allocation8] sm:$0xff]  ;;  %v1662_v12 = vld [vmem:[#allocation8 + $0x18] sm:$0xff]  ;;  %v1669_v23 = vld [vmem:[#allocation8 + $0x50] sm:$0xff] }
 0x149   :  { %v1666_v21 = vld [vmem:[#allocation8 + $0x38] sm:$0xff] }
 0x14a   :  { %3147 = vmatpush1.bf16.msra.mxu0 %v3146_v24  ;;  %v4434_v24 = vrot.slane %v776_v17, %v4386_v11  ;;  %v171_v11 = vld [vmem:[#allocation5 + $0x110] sm:$0xff] }
 0x14b   :  { %3343 = vmatpush1.bf16.msra.mxu1 %v3342_v22  ;;  %3149 = vmatprep.subr.bf16.mxu0 %v3148_v27  ;;  %v3362_v22 = vpack.c.bf16 %v147_v20, %v141_v19  ;;  %v153_v27 = vld [vmem:[#allocation5 + $0x80] sm:$0xff]  ;;  %v3370_v37 = vpack.c.bf16 %v171_v11, %v165_v34  ;;  %v243_v17 = vld [vmem:[#allocation5 + $0x350] sm:$0xff]  ;;  %v250_v19 = vld [vmem:[#allocation5 + $0x388] sm:$0xff] }
 0x14c   :  { %3345 = vmatprep.subr.bf16.mxu1 %v3344_v31  ;;  %v3366_v31 = vpack.c.bf16 %v159_v28, %v153_v27  ;;  %v256_v20 = vld [vmem:[#allocation5 + $0x3b8] sm:$0xff]  ;;  %v1668_v27 = vld [vmem:[#allocation8 + $0x48] sm:$0xff] }
 0x14d   :  { %v3396_v30 = vpack.c.bf16 %v256_v20, %v250_v19  ;;  %v262_v34 = vld [vmem:[#allocation5 + $0x3e8] sm:$0xff]  ;;  %v268_v11 = vld [vmem:[#allocation5 + $0x418] sm:$0xff] }
 0x14e   :  { %3151 = vmatpush1.bf16.msra.mxu0 %v3150_v38  ;;  %v3372_v38 = vpack.c.bf16 %v184_v36, %v178_v35  ;;  %v1672_v35 = vld [vmem:[#allocation8 + $0x68] sm:$0xff]  ;;  %v1675_v36 = vld [vmem:[#allocation8 + $0x80] sm:$0xff] }
 0x14f   :  { %3347 = vmatpush1.bf16.msra.mxu1 %v3346_v40  ;;  %3153 = vmatprep.subr.bf16.mxu0 %v3152_v41  ;;  %v177_v40 = vld [vmem:[#allocation5 + $0x140] sm:$0xff]  ;;  %v183_v41 = vld [vmem:[#allocation5 + $0x170] sm:$0xff] }
 0x150   :  { %3349 = vmatprep.subr.bf16.mxu1 %v3348_v45  ;;  %v3374_v44 = vpack.c.bf16 %v183_v41, %v177_v40  ;;  %v3376_v45 = vpack.c.bf16 %v196_v43, %v190_v42  ;;  %v1674_v40 = vld [vmem:[#allocation8 + $0x78] sm:$0xff]  ;;  %v3400_v43 = vpack.c.bf16 %v268_v11, %v262_v34 }
 0x152   :  { %3155 = vmatpush1.bf16.msra.mxu0 %v3154_v52  ;;  %v201_v52 = vld [vmem:[#allocation5 + $0x200] sm:$0xff] }
 0x153   :  { %3351 = vmatpush1.bf16.msra.mxu1 %v3350_v53  ;;  %3157 = vmatprep.subr.bf16.mxu0 %v3156_v54  ;;  %v207_v53 = vld [vmem:[#allocation5 + $0x230] sm:$0xff]  ;;  %v214_v54 = vld [vmem:[#allocation5 + $0x268] sm:$0xff] }
 0x154   :  { %3353 = vmatprep.subr.bf16.mxu1 %v3352_v59  ;;  %v3382_v57 = vpack.c.bf16 %v207_v53, %v201_v52  ;;  %v3384_v58 = vpack.c.bf16 %v220_v56, %v214_v54  ;;  %v213_v59 = vld [vmem:[#allocation5 + $0x260] sm:$0xff]  ;;  %v1680_v52 = vld [vmem:[#allocation8 + $0xa8] sm:$0xff] }
 0x155   :  { %v3386_v1 = vpack.c.bf16 %v219_v60, %v213_v59  ;;  %v286_v59 = vld [vmem:[#allocation5 + $0x4a8] sm:$0xff]  ;;  %v292_v60 = vld [vmem:[#allocation5 + $0x4d8] sm:$0xff] }
 0x156   :  { %3159 = vmatpush1.bf16.msra.mxu0 %v3158_v3  ;;  %v225_v3 = vld [vmem:[#allocation5 + $0x2c0] sm:$0xff] }
 0x157   :  { %3355 = vmatpush1.bf16.msra.mxu1 %v3354_v4  ;;  %3161 = vmatprep.subr.bf16.mxu0 %v3160_v5  ;;  %v231_v4 = vld [vmem:[#allocation5 + $0x2f0] sm:$0xff]  ;;  %v238_v5 = vld [vmem:[#allocation5 + $0x328] sm:$0xff] }
 0x158   :  { %3357 = vmatprep.subr.bf16.mxu1 %v3356_v8  ;;  %v1663_v8 = vld [vmem:[#allocation8 + $0x20] sm:$0xff]  ;;  %v3390_v13 = vpack.c.bf16 %v231_v4, %v225_v3  ;;  %v1686_v3 = vld [vmem:[#allocation8 + $0xd8] sm:$0xff] }
 0x159   :  { %1008 = vmatmul.mubr.f32.vlgmr.msra.gmra.mrb[0].mxu0 %v4417_v55  ;;  %v3556_v9 = vpack.c.bf16 %v1663_v8, %v1660_v7  ;;  %v285_v7 = vld [vmem:[#allocation5 + $0x4a0] sm:$0xff]  ;;  %v291_v8 = vld [vmem:[#allocation5 + $0x4d0] sm:$0xff] }
 0x15a   :  { %1292 = vmatmul.mubr.f32.vlgmr.msra.gmra.mrb[0].mxu1 %v4417_v55  ;;  %3163 = vmatpush1.bf16.msra.mxu0 %v3162_v14  ;;  %v3558_v14 = vpack.c.bf16 %v1662_v12, %v1659_v10  ;;  %v304_v10 = vld [vmem:[#allocation5 + $0x538] sm:$0xff] }
 0x15b   :  { %3359 = vmatpush1.bf16.msra.mxu1 %v3358_v15  ;;  %1078 = vmatprep.mubr.f32.mxu0 %v4226_v18  ;;  %v3392_v15 = vpack.c.bf16 %v244_v6, %v238_v5  ;;  %v3408_v6 = vpack.c.bf16 %v292_v60, %v286_v59  ;;  %v1690_v12 = vld [vmem:[#allocation8 + $0xf8] sm:$0xff] }
 0x15c   :  { %1362 = vmatprep.mubr.f32.mxu1 %v4226_v18  ;;  %3361 = vmatprep.subr.bf16.mxu0 %v3360_v16  ;;  %v237_v16 = vld [vmem:[#allocation5 + $0x320] sm:$0xff] }
 0x15d   :  { %3557 = vmatprep.subr.bf16.mxu1 %v3556_v9  ;;  %v3394_v28 = vpack.c.bf16 %v243_v17, %v237_v16  ;;  %v298_v9 = vld [vmem:[#allocation5 + $0x508] sm:$0xff]  ;;  %v3410_v17 = vpack.c.bf16 %v291_v8, %v285_v7 }
 0x15e   :  { %v1692_v16 = vld [vmem:[#allocation8 + $0x108] sm:$0xff]  ;;  %v3412_v20 = vpack.c.bf16 %v304_v10, %v298_v9 }
 0x15f   :  { %v1716_v7 = vld [vmem:[#allocation8 + $0x1c8] sm:$0xff] }
 0x161   :  { %2719 = vmatmul.mubr.msk.f32.vlgmr.msra.gmra.mrb[0].mxu0 %vm798_vm0, %v4434_v24 }
 0x162   :  { %2720 = vmatmul.mubr.msk.f32.vlgmr.msra.gmra.mrb[0].mxu1 %vm798_vm0, %v4434_v24  ;;  %3363 = vmatpush1.bf16.msra.mxu0 %v3362_v22  ;;  %v3560_v22 = vpack.c.bf16 %v1669_v23, %v1666_v21  ;;  %v297_v21 = vld [vmem:[#allocation5 + $0x500] sm:$0xff]  ;;  %v303_v23 = vld [vmem:[#allocation5 + $0x530] sm:$0xff] }
 0x163   :  { %3365 = vmatprep.subr.bf16.mxu0 %v3364_v49  ;;  %1433 = vmatprep.mubr.f32.mxu0 %v4396_v32  ;;  %v3378_v32 = vpack.c.bf16 %v195_v47, %v189_v46  ;;  %v1665_v49 = vld [vmem:[#allocation8 + $0x30] sm:$0xff]  ;;  %v274_v46 = vld [vmem:[#allocation5 + $0x448] sm:$0xff] }
 0x164   :  { %3559 = vmatpush1.bf16.msra.mxu1 %v3558_v14  ;;  %v3562_v29 = vpack.c.bf16 %v1668_v27, %v1665_v49  ;;  %v280_v47 = vld [vmem:[#allocation5 + $0x478] sm:$0xff]  ;;  %v1696_v27 = vld [vmem:[#allocation8 + $0x128] sm:$0xff] }
 0x165   :  { %3561 = vmatprep.subr.bf16.mxu1 %v3560_v22  ;;  %v3404_v56 = vpack.c.bf16 %v280_v47, %v274_v46  ;;  %v310_v22 = vld [vmem:[#allocation5 + $0x568] sm:$0xff]  ;;  %v316_v49 = vld [vmem:[#allocation5 + $0x598] sm:$0xff] }
 0x166   :  { %3367 = vmatpush1.bf16.msra.mxu0 %v3366_v31  ;;  %v249_v31 = vld [vmem:[#allocation5 + $0x380] sm:$0xff]  ;;  %v3416_v11 = vpack.c.bf16 %v316_v49, %v310_v22 }
 0x167   :  { %3369 = vmatprep.subr.bf16.mxu0 %v3368_v33  ;;  %v255_v33 = vld [vmem:[#allocation5 + $0x3b0] sm:$0xff]  ;;  %v1719_v22 = vld [vmem:[#allocation8 + $0x1e0] sm:$0xff]  ;;  %v1722_v49 = vld [vmem:[#allocation8 + $0x1f8] sm:$0xff] }
 0x168   :  { %3563 = vmatpush1.bf16.msra.mxu1 %v3562_v29  ;;  %v3398_v41 = vpack.c.bf16 %v255_v33, %v249_v31  ;;  %v1698_v31 = vld [vmem:[#allocation8 + $0x138] sm:$0xff]  ;;  %v3414_v33 = vpack.c.bf16 %v303_v23, %v297_v21  ;;  %v363_v23 = vld [vmem:[#allocation5 + $0x710] sm:$0xff] }
 0x16a   :  { %3371 = vmatpush1.bf16.msra.mxu0 %v3370_v37  ;;  %v3564_v37 = vpack.c.bf16 %v1675_v36, %v1672_v35  ;;  %v309_v35 = vld [vmem:[#allocation5 + $0x560] sm:$0xff]  ;;  %v315_v36 = vld [vmem:[#allocation5 + $0x590] sm:$0xff] }
 0x16b   :  { %3373 = vmatprep.subr.bf16.mxu0 %v3372_v38  ;;  %v1671_v38 = vld [vmem:[#allocation8 + $0x60] sm:$0xff] }
 0x16c   :  { %v3566_v42 = vpack.c.bf16 %v1674_v40, %v1671_v38  ;;  %3565 = vmatprep.subr.bf16.mxu1 %v3564_v37  ;;  %v322_v37 = vld [vmem:[#allocation5 + $0x5c8] sm:$0xff]  ;;  %v328_v38 = vld [vmem:[#allocation5 + $0x5f8] sm:$0xff] }
 0x16d   :  { %v1702_v40 = vld [vmem:[#allocation8 + $0x158] sm:$0xff]  ;;  %v3420_v47 = vpack.c.bf16 %v328_v38, %v322_v37  ;;  %v375_v38 = vld [vmem:[#allocation5 + $0x770] sm:$0xff] }
 0x16e   :  { %3375 = vmatpush1.bf16.msra.mxu0 %v3374_v44  ;;  %v261_v44 = vld [vmem:[#allocation5 + $0x3e0] sm:$0xff]  ;;  %3567 = vmatpush1.bf16.msra.mxu1 %v3566_v42 }
 0x16f   :  { %3377 = vmatprep.subr.bf16.mxu0 %v3376_v45  ;;  %v267_v45 = vld [vmem:[#allocation5 + $0x410] sm:$0xff]  ;;  %v369_v37 = vld [vmem:[#allocation5 + $0x740] sm:$0xff] }
 0x170   :  { %v3402_v53 = vpack.c.bf16 %v267_v45, %v261_v44  ;;  %v1704_v44 = vld [vmem:[#allocation8 + $0x168] sm:$0xff]  ;;  %v3418_v45 = vpack.c.bf16 %v315_v36, %v309_v35 }
 0x172   :  { %3379 = vmatpush1.bf16.msra.mxu0 %v3378_v32  ;;  %v3568_v32 = vpack.c.bf16 %v1681_v50, %v1678_v48  ;;  %v321_v48 = vld [vmem:[#allocation5 + $0x5c0] sm:$0xff]  ;;  %v327_v50 = vld [vmem:[#allocation5 + $0x5f0] sm:$0xff] }
 0x173   :  { %3381 = vmatprep.subr.bf16.mxu0 %v3380_v51  ;;  %v1677_v51 = vld [vmem:[#allocation8 + $0x90] sm:$0xff] }
 0x174   :  { %v3570_v54 = vpack.c.bf16 %v1680_v52, %v1677_v51  ;;  %3569 = vmatprep.subr.bf16.mxu1 %v3568_v32  ;;  %v334_v32 = vld [vmem:[#allocation5 + $0x628] sm:$0xff]  ;;  %v340_v51 = vld [vmem:[#allocation5 + $0x658] sm:$0xff] }
 0x175   :  { %v1708_v52 = vld [vmem:[#allocation8 + $0x188] sm:$0xff]  ;;  %v3424_v60 = vpack.c.bf16 %v340_v51, %v334_v32 }
 0x176   :  { %3383 = vmatpush1.bf16.msra.mxu0 %v3382_v57  ;;  %v273_v57 = vld [vmem:[#allocation5 + $0x440] sm:$0xff]  ;;  %3571 = vmatpush1.bf16.msra.mxu1 %v3570_v54  ;;  %v387_v32 = vld [vmem:[#allocation5 + $0x7d0] sm:$0xff] }
 0x177   :  { %3385 = vmatprep.subr.bf16.mxu0 %v3384_v58  ;;  %v279_v58 = vld [vmem:[#allocation5 + $0x470] sm:$0xff] }
 0x178   :  { %v3406_v4 = vpack.c.bf16 %v279_v58, %v273_v57  ;;  %v1710_v57 = vld [vmem:[#allocation8 + $0x198] sm:$0xff]  ;;  %v3422_v58 = vpack.c.bf16 %v327_v50, %v321_v48 }
 0x179   :  { %v381_v50 = vld [vmem:[#allocation5 + $0x7a0] sm:$0xff] }
 0x17a   :  { %3387 = vmatpush1.bf16.msra.mxu0 %v3386_v1  ;;  %v3572_v1 = vpack.c.bf16 %v1687_v0, %v1684_v62  ;;  %v333_v62 = vld [vmem:[#allocation5 + $0x620] sm:$0xff]  ;;  %v339_v0 = vld [vmem:[#allocation5 + $0x650] sm:$0xff] }
 0x17b   :  { %3389 = vmatprep.subr.bf16.mxu0 %v3388_v2  ;;  %v1683_v2 = vld [vmem:[#allocation8 + $0xc0] sm:$0xff]  ;;  %v3426_v8 = vpack.c.bf16 %v339_v0, %v333_v62 }
 0x17c   :  { %v3574_v5 = vpack.c.bf16 %v1686_v3, %v1683_v2  ;;  %3573 = vmatprep.subr.bf16.mxu1 %v3572_v1  ;;  %v346_v1 = vld [vmem:[#allocation5 + $0x688] sm:$0xff]  ;;  %v352_v2 = vld [vmem:[#allocation5 + $0x6b8] sm:$0xff]  ;;  %v393_v0 = vld [vmem:[#allocation5 + $0x800] sm:$0xff] }
 0x17d   :  { %v1714_v3 = vld [vmem:[#allocation8 + $0x1b8] sm:$0xff]  ;;  %v3428_v10 = vpack.c.bf16 %v352_v2, %v346_v1  ;;  %v399_v1 = vld [vmem:[#allocation5 + $0x830] sm:$0xff] }
 0x17e   :  { %3391 = vmatpush1.bf16.msra.mxu0 %v3390_v13  ;;  %3575 = vmatpush1.bf16.msra.mxu1 %v3574_v5  ;;  %v1693_v13 = vld [vmem:[#allocation8 + $0x110] sm:$0xff] }
 0x17f   :  { %3393 = vmatprep.subr.bf16.mxu0 %v3392_v15  ;;  %v3576_v14 = vpack.c.bf16 %v1693_v13, %v1690_v12  ;;  %v1689_v15 = vld [vmem:[#allocation8 + $0xf0] sm:$0xff]  ;;  %v345_v12 = vld [vmem:[#allocation5 + $0x680] sm:$0xff] }
 0x180   :  { %v3578_v19 = vpack.c.bf16 %v1692_v16, %v1689_v15  ;;  %v351_v13 = vld [vmem:[#allocation5 + $0x6b0] sm:$0xff]  ;;  %v364_v15 = vld [vmem:[#allocation5 + $0x718] sm:$0xff] }
 0x181   :  { %3577 = vmatprep.subr.bf16.mxu1 %v3576_v14  ;;  %v358_v14 = vld [vmem:[#allocation5 + $0x6e8] sm:$0xff]  ;;  %v3430_v21 = vpack.c.bf16 %v351_v13, %v345_v12  ;;  %v405_v13 = vld [vmem:[#allocation5 + $0x860] sm:$0xff] }
 0x182   :  { %3395 = vmatpush1.bf16.msra.mxu0 %v3394_v28  ;;  %3579 = vmatpush1.bf16.msra.mxu1 %v3578_v19  ;;  %v1699_v28 = vld [vmem:[#allocation8 + $0x140] sm:$0xff]  ;;  %v1720_v16 = vld [vmem:[#allocation8 + $0x1e8] sm:$0xff] }
 0x183   :  { %3397 = vmatprep.subr.bf16.mxu0 %v3396_v30  ;;  %v3580_v29 = vpack.c.bf16 %v1699_v28, %v1696_v27  ;;  %v1695_v30 = vld [vmem:[#allocation8 + $0x120] sm:$0xff]  ;;  %v3432_v27 = vpack.c.bf16 %v364_v15, %v358_v14  ;;  %v3598_v28 = vpack.c.bf16 %v1722_v49, %v1719_v22  ;;  %v411_v14 = vld [vmem:[#allocation5 + $0x890] sm:$0xff] }
 0x184   :  { %v3582_v34 = vpack.c.bf16 %v1698_v31, %v1695_v30  ;;  %v357_v19 = vld [vmem:[#allocation5 + $0x6e0] sm:$0xff]  ;;  %v1729_v30 = vld [vmem:[#allocation8 + $0x230] sm:$0xff]  ;;  %v1752_v49 = vld [vmem:[#allocation8 + $0x2e8] sm:$0xff] }
 0x185   :  { %3581 = vmatprep.subr.bf16.mxu1 %v3580_v29  ;;  %v1726_v29 = vld [vmem:[#allocation8 + $0x218] sm:$0xff]  ;;  %v1725_v31 = vld [vmem:[#allocation8 + $0x210] sm:$0xff]  ;;  %v3434_v36 = vpack.c.bf16 %v363_v23, %v357_v19 }
 0x186   :  { %3399 = vmatpush1.bf16.msra.mxu0 %v3398_v41  ;;  %3583 = vmatpush1.bf16.msra.mxu1 %v3582_v34  ;;  %v1705_v41 = vld [vmem:[#allocation8 + $0x170] sm:$0xff]  ;;  %v1750_v19 = vld [vmem:[#allocation8 + $0x2d8] sm:$0xff] }
 0x187   :  { %3401 = vmatprep.subr.bf16.mxu0 %v3400_v43  ;;  %v3584_v42 = vpack.c.bf16 %v1705_v41, %v1702_v40  ;;  %v1701_v43 = vld [vmem:[#allocation8 + $0x150] sm:$0xff]  ;;  %v382_v40 = vld [vmem:[#allocation5 + $0x7a8] sm:$0xff] }
 0x188   :  { %v3586_v46 = vpack.c.bf16 %v1704_v44, %v1701_v43  ;;  %v376_v34 = vld [vmem:[#allocation5 + $0x778] sm:$0xff]  ;;  %v1735_v43 = vld [vmem:[#allocation8 + $0x260] sm:$0xff]  ;;  %v3438_v44 = vpack.c.bf16 %v375_v38, %v369_v37  ;;  %v435_v37 = vld [vmem:[#allocation5 + $0x950] sm:$0xff] }
 0x189   :  { %3585 = vmatprep.subr.bf16.mxu1 %v3584_v42  ;;  %v388_v41 = vld [vmem:[#allocation5 + $0x7d8] sm:$0xff]  ;;  %v1732_v42 = vld [vmem:[#allocation8 + $0x248] sm:$0xff] }
 0x18a   :  { %3403 = vmatpush1.bf16.msra.mxu0 %v3402_v53  ;;  %3587 = vmatpush1.bf16.msra.mxu1 %v3586_v46  ;;  %v1711_v53 = vld [vmem:[#allocation8 + $0x1a0] sm:$0xff]  ;;  %v3440_v48 = vpack.c.bf16 %v388_v41, %v382_v40  ;;  %v1749_v22 = vld [vmem:[#allocation8 + $0x2d0] sm:$0xff] }
 0x18b   :  { %3405 = vmatprep.subr.bf16.mxu0 %v3404_v56  ;;  %v3588_v54 = vpack.c.bf16 %v1711_v53, %v1708_v52  ;;  %v1707_v56 = vld [vmem:[#allocation8 + $0x180] sm:$0xff]  ;;  %v400_v53 = vld [vmem:[#allocation5 + $0x838] sm:$0xff] }
 0x18c   :  { %v3590_v59 = vpack.c.bf16 %v1710_v57, %v1707_v56  ;;  %v1731_v46 = vld [vmem:[#allocation8 + $0x240] sm:$0xff]  ;;  %v1741_v56 = vld [vmem:[#allocation8 + $0x290] sm:$0xff]  ;;  %v3442_v57 = vpack.c.bf16 %v387_v32, %v381_v50 }
 0x18d   :  { %3589 = vmatprep.subr.bf16.mxu1 %v3588_v54  ;;  %v394_v52 = vld [vmem:[#allocation5 + $0x808] sm:$0xff]  ;;  %v1738_v54 = vld [vmem:[#allocation8 + $0x278] sm:$0xff]  ;;  %v459_v32 = vld [vmem:[#allocation5 + $0xa10] sm:$0xff] }
 0x18e   :  { %3407 = vmatpush1.bf16.msra.mxu0 %v3406_v4  ;;  %3591 = vmatpush1.bf16.msra.mxu1 %v3590_v59  ;;  %v1717_v4 = vld [vmem:[#allocation8 + $0x1d0] sm:$0xff]  ;;  %v3444_v62 = vpack.c.bf16 %v400_v53, %v394_v52  ;;  %v442_v38 = vld [vmem:[#allocation5 + $0x988] sm:$0xff]  ;;  %v453_v50 = vld [vmem:[#allocation5 + $0x9e0] sm:$0xff] }
 0x18f   :  { %3409 = vmatprep.subr.bf16.mxu0 %v3408_v6  ;;  %v3592_v5 = vpack.c.bf16 %v1717_v4, %v1714_v3  ;;  %v1713_v6 = vld [vmem:[#allocation8 + $0x1b0] sm:$0xff]  ;;  %v406_v3 = vld [vmem:[#allocation5 + $0x868] sm:$0xff]  ;;  %v3466_v53 = vpack.c.bf16 %v459_v32, %v453_v50  ;;  %v573_v32 = vld [vmem:[#allocation5 + $0xda0] sm:$0xff] }
 0x190   :  { %v3594_v9 = vpack.c.bf16 %v1716_v7, %v1713_v6  ;;  %v1737_v59 = vld [vmem:[#allocation8 + $0x270] sm:$0xff]  ;;  %v1747_v6 = vld [vmem:[#allocation8 + $0x2c0] sm:$0xff]  ;;  %v3446_v7 = vpack.c.bf16 %v399_v1, %v393_v0 }
 0x191   :  { %3593 = vmatprep.subr.bf16.mxu1 %v3592_v5  ;;  %v412_v4 = vld [vmem:[#allocation5 + $0x898] sm:$0xff]  ;;  %v1744_v5 = vld [vmem:[#allocation8 + $0x2a8] sm:$0xff]  ;;  %v477_v0 = vld [vmem:[#allocation5 + $0xaa0] sm:$0xff] }
 0x192   :  { %3411 = vmatpush1.bf16.msra.mxu0 %v3410_v17  ;;  %3595 = vmatpush1.bf16.msra.mxu1 %v3594_v9  ;;  %v1723_v17 = vld [vmem:[#allocation8 + $0x200] sm:$0xff]  ;;  %v3448_v12 = vpack.c.bf16 %v412_v4, %v406_v3  ;;  %v448_v40 = vld [vmem:[#allocation5 + $0x9b8] sm:$0xff]  ;;  %v483_v1 = vld [vmem:[#allocation5 + $0xad0] sm:$0xff] }
 0x193   :  { %3413 = vmatprep.subr.bf16.mxu0 %v3412_v20  ;;  %v3596_v20 = vpack.c.bf16 %v1723_v17, %v1720_v16  ;;  %v1743_v9 = vld [vmem:[#allocation8 + $0x2a0] sm:$0xff]  ;;  %v424_v17 = vld [vmem:[#allocation5 + $0x8f8] sm:$0xff]  ;;  %v3474_v4 = vpack.c.bf16 %v483_v1, %v477_v0  ;;  %v603_v1 = vld [vmem:[#allocation5 + $0xe90] sm:$0xff] }
 0x194   :  { %v418_v16 = vld [vmem:[#allocation5 + $0x8c8] sm:$0xff]  ;;  %v472_v52 = vld [vmem:[#allocation5 + $0xa78] sm:$0xff]  ;;  %v597_v0 = vld [vmem:[#allocation5 + $0xe60] sm:$0xff] }
 0x195   :  { %3597 = vmatprep.subr.bf16.mxu1 %v3596_v20  ;;  %v1753_v20 = vld [vmem:[#allocation8 + $0x2f0] sm:$0xff] }
 0x196   :  { %3415 = vmatpush1.bf16.msra.mxu0 %v3414_v33  ;;  %v370_v33 = vld [vmem:[#allocation5 + $0x748] sm:$0xff]  ;;  %3599 = vmatpush1.bf16.msra.mxu1 %v3598_v28  ;;  %v3616_v23 = vpack.c.bf16 %v1753_v20, %v1750_v19  ;;  %v417_v28 = vld [vmem:[#allocation5 + $0x8c0] sm:$0xff]  ;;  %v496_v3 = vld [vmem:[#allocation5 + $0xb38] sm:$0xff] }
 0x197   :  { %3417 = vmatprep.subr.bf16.mxu0 %v3416_v11  ;;  %v3600_v11 = vpack.c.bf16 %v1729_v30, %v1726_v29  ;;  %v423_v29 = vld [vmem:[#allocation5 + $0x8f0] sm:$0xff]  ;;  %v3618_v30 = vpack.c.bf16 %v1752_v49, %v1749_v22  ;;  %v513_v20 = vld [vmem:[#allocation5 + $0xbc0] sm:$0xff]  ;;  %v532_v22 = vld [vmem:[#allocation5 + $0xc58] sm:$0xff] }
 0x199   :  { %3601 = vmatprep.subr.bf16.mxu1 %v3600_v11  ;;  %v1759_v11 = vld [vmem:[#allocation8 + $0x320] sm:$0xff] }
 0x19a   :  { %3419 = vmatpush1.bf16.msra.mxu0 %v3418_v45  ;;  %v3604_v45 = vpack.c.bf16 %v1735_v43, %v1732_v42  ;;  %v3460_v42 = vpack.c.bf16 %v448_v40, %v442_v38  ;;  %v441_v43 = vld [vmem:[#allocation5 + $0x980] sm:$0xff]  ;;  %v555_v40 = vld [vmem:[#allocation5 + $0xd10] sm:$0xff] }
 0x19b   :  { %3421 = vmatprep.subr.bf16.mxu0 %v3420_v47  ;;  %v1734_v47 = vld [vmem:[#allocation8 + $0x258] sm:$0xff] }
 0x19c   :  { %v3606_v51 = vpack.c.bf16 %v1734_v47, %v1731_v46  ;;  %v460_v46 = vld [vmem:[#allocation5 + $0xa18] sm:$0xff]  ;;  %v549_v38 = vld [vmem:[#allocation5 + $0xce0] sm:$0xff] }
 0x19e   :  { %3423 = vmatpush1.bf16.msra.mxu0 %v3422_v58  ;;  %v3608_v58 = vpack.c.bf16 %v1741_v56, %v1738_v54  ;;  %v465_v56 = vld [vmem:[#allocation5 + $0xa40] sm:$0xff] }
 0x19f   :  { %3425 = vmatprep.subr.bf16.mxu0 %v3424_v60  ;;  %v1740_v60 = vld [vmem:[#allocation8 + $0x288] sm:$0xff] }
 0x1a0   :  { %v3610_v2 = vpack.c.bf16 %v1740_v60, %v1737_v59  ;;  %v484_v59 = vld [vmem:[#allocation5 + $0xad8] sm:$0xff] }
 0x1a1   :  { %1434 = vmatmul.mubr.f32.vlgmr.msra.gmra.mrb[2].mxu0 %v4392_v25  ;;  %v1728_v25 = vld [vmem:[#allocation8 + $0x228] sm:$0xff] }
 0x1a2   :  { %3427 = vmatpush1.bf16.msra.mxu0 %v3426_v8  ;;  %1504 = vmatprep.mubr.f32.mxu0 %v4407_v39  ;;  %v3602_v35 = vpack.c.bf16 %v1728_v25, %v1725_v31  ;;  %v3436_v39 = vpack.c.bf16 %v376_v34, %v370_v33  ;;  %v3612_v8 = vpack.c.bf16 %v1747_v6, %v1744_v5  ;;  %v430_v31 = vld [vmem:[#allocation5 + $0x928] sm:$0xff]  ;;  %v436_v33 = vld [vmem:[#allocation5 + $0x958] sm:$0xff]  ;;  %v489_v6 = vld [vmem:[#allocation5 + $0xb00] sm:$0xff] }
 0x1a3   :  { %3429 = vmatprep.subr.bf16.mxu0 %v3428_v10  ;;  %v1746_v10 = vld [vmem:[#allocation8 + $0x2b8] sm:$0xff]  ;;  %v1756_v34 = vld [vmem:[#allocation8 + $0x308] sm:$0xff]  ;;  %v3454_v25 = vpack.c.bf16 %v423_v29, %v417_v28 }
 0x1a4   :  { %3603 = vmatpush1.bf16.msra.mxu1 %v3602_v35  ;;  %v3614_v15 = vpack.c.bf16 %v1746_v10, %v1743_v9  ;;  %v3620_v35 = vpack.c.bf16 %v1759_v11, %v1756_v34  ;;  %v508_v9 = vld [vmem:[#allocation5 + $0xb98] sm:$0xff]  ;;  %v525_v28 = vld [vmem:[#allocation5 + $0xc20] sm:$0xff]  ;;  %v531_v29 = vld [vmem:[#allocation5 + $0xc50] sm:$0xff] }
 0x1a5   :  { %3605 = vmatprep.subr.bf16.mxu1 %v3604_v45  ;;  %v454_v45 = vld [vmem:[#allocation5 + $0x9e8] sm:$0xff]  ;;  %v537_v11 = vld [vmem:[#allocation5 + $0xc80] sm:$0xff] }
 0x1a6   :  { %3431 = vmatpush1.bf16.msra.mxu0 %v3430_v21  ;;  %v3450_v21 = vpack.c.bf16 %v411_v14, %v405_v13  ;;  %v501_v13 = vld [vmem:[#allocation5 + $0xb60] sm:$0xff]  ;;  %v507_v14 = vld [vmem:[#allocation5 + $0xb90] sm:$0xff] }
 0x1a7   :  { %3433 = vmatprep.subr.bf16.mxu0 %v3432_v27  ;;  %v3452_v27 = vpack.c.bf16 %v424_v17, %v418_v16  ;;  %v520_v16 = vld [vmem:[#allocation5 + $0xbf8] sm:$0xff]  ;;  %v3482_v17 = vpack.c.bf16 %v507_v14, %v501_v13  ;;  %v621_v13 = vld [vmem:[#allocation5 + $0xf20] sm:$0xff]  ;;  %v627_v14 = vld [vmem:[#allocation5 + $0xf50] sm:$0xff] }
 0x1a8   :  { %3607 = vmatpush1.bf16.msra.mxu1 %v3606_v51  ;;  %v466_v51 = vld [vmem:[#allocation5 + $0xa48] sm:$0xff] }
 0x1a9   :  { %3609 = vmatprep.subr.bf16.mxu1 %v3608_v58  ;;  %v3468_v54 = vpack.c.bf16 %v472_v52, %v466_v51  ;;  %v478_v58 = vld [vmem:[#allocation5 + $0xaa8] sm:$0xff]  ;;  %v592_v52 = vld [vmem:[#allocation5 + $0xe38] sm:$0xff] }
 0x1aa   :  { %3435 = vmatpush1.bf16.msra.mxu0 %v3434_v36  ;;  %v3456_v36 = vpack.c.bf16 %v436_v33, %v430_v31  ;;  %v544_v31 = vld [vmem:[#allocation5 + $0xcb8] sm:$0xff]  ;;  %v3490_v33 = vpack.c.bf16 %v531_v29, %v525_v28  ;;  %v586_v51 = vld [vmem:[#allocation5 + $0xe08] sm:$0xff]  ;;  %v645_v28 = vld [vmem:[#allocation5 + $0xfe0] sm:$0xff] }
 0x1ab   :  { %3437 = vmatprep.subr.bf16.mxu0 %v3436_v39  ;;  %v429_v39 = vld [vmem:[#allocation5 + $0x920] sm:$0xff]  ;;  %v651_v29 = vld [vmem:[#allocation5 + $0x1010] sm:$0xff] }
 0x1ac   :  { %3611 = vmatpush1.bf16.msra.mxu1 %v3610_v2  ;;  %v3458_v41 = vpack.c.bf16 %v435_v37, %v429_v39  ;;  %v490_v2 = vld [vmem:[#allocation5 + $0xb08] sm:$0xff] }
 0x1ad   :  { %3613 = vmatprep.subr.bf16.mxu1 %v3612_v8  ;;  %v3476_v5 = vpack.c.bf16 %v496_v3, %v490_v2  ;;  %v502_v8 = vld [vmem:[#allocation5 + $0xb68] sm:$0xff]  ;;  %v616_v3 = vld [vmem:[#allocation5 + $0xef8] sm:$0xff] }
 0x1ae   :  { %3439 = vmatpush1.bf16.msra.mxu0 %v3438_v44  ;;  %v447_v44 = vld [vmem:[#allocation5 + $0x9b0] sm:$0xff]  ;;  %v610_v2 = vld [vmem:[#allocation5 + $0xec8] sm:$0xff] }
 0x1af   :  { %3441 = vmatprep.subr.bf16.mxu0 %v3440_v48  ;;  %v3462_v47 = vpack.c.bf16 %v447_v44, %v441_v43  ;;  %v3464_v48 = vpack.c.bf16 %v460_v46, %v454_v45  ;;  %v3498_v43 = vpack.c.bf16 %v555_v40, %v549_v38  ;;  %v561_v45 = vld [vmem:[#allocation5 + $0xd40] sm:$0xff]  ;;  %v567_v46 = vld [vmem:[#allocation5 + $0xd70] sm:$0xff] }
 0x1b0   :  { %3615 = vmatpush1.bf16.msra.mxu1 %v3614_v15  ;;  %v514_v15 = vld [vmem:[#allocation5 + $0xbc8] sm:$0xff]  ;;  %v669_v38 = vld [vmem:[#allocation5 + $0x10a0] sm:$0xff]  ;;  %v675_v40 = vld [vmem:[#allocation5 + $0x10d0] sm:$0xff] }
 0x1b1   :  { %3617 = vmatprep.subr.bf16.mxu1 %v3616_v23  ;;  %v3484_v19 = vpack.c.bf16 %v520_v16, %v514_v15  ;;  %v526_v23 = vld [vmem:[#allocation5 + $0xc28] sm:$0xff]  ;;  %v640_v16 = vld [vmem:[#allocation5 + $0xfb8] sm:$0xff] }
 0x1b2   :  { %3443 = vmatpush1.bf16.msra.mxu0 %v3442_v57  ;;  %v471_v57 = vld [vmem:[#allocation5 + $0xa70] sm:$0xff]  ;;  %v634_v15 = vld [vmem:[#allocation5 + $0xf88] sm:$0xff] }
 0x1b3   :  { %3445 = vmatprep.subr.bf16.mxu0 %v3444_v62  ;;  %v3470_v60 = vpack.c.bf16 %v471_v57, %v465_v56  ;;  %v3472_v62 = vpack.c.bf16 %v484_v59, %v478_v58  ;;  %v585_v56 = vld [vmem:[#allocation5 + $0xe00] sm:$0xff]  ;;  %v591_v57 = vld [vmem:[#allocation5 + $0xe30] sm:$0xff]  ;;  %v598_v58 = vld [vmem:[#allocation5 + $0xe68] sm:$0xff] }
 0x1b4   :  { %3619 = vmatpush1.bf16.msra.mxu1 %v3618_v30  ;;  %v538_v30 = vld [vmem:[#allocation5 + $0xc88] sm:$0xff]  ;;  %v604_v59 = vld [vmem:[#allocation5 + $0xe98] sm:$0xff] }
 0x1b5   :  { %3621 = vmatprep.subr.bf16.mxu1 %v3620_v35  ;;  %v3492_v34 = vpack.c.bf16 %v544_v31, %v538_v30  ;;  %v550_v35 = vld [vmem:[#allocation5 + $0xce8] sm:$0xff]  ;;  %v664_v31 = vld [vmem:[#allocation5 + $0x1078] sm:$0xff] }
 0x1b6   :  { %3447 = vmatpush1.bf16.msra.mxu0 %v3446_v7  ;;  %v495_v7 = vld [vmem:[#allocation5 + $0xb30] sm:$0xff]  ;;  %v658_v30 = vld [vmem:[#allocation5 + $0x1048] sm:$0xff] }
 0x1b7   :  { %3449 = vmatprep.subr.bf16.mxu0 %v3448_v12  ;;  %v3478_v10 = vpack.c.bf16 %v495_v7, %v489_v6  ;;  %v3480_v12 = vpack.c.bf16 %v508_v9, %v502_v8  ;;  %v609_v6 = vld [vmem:[#allocation5 + $0xec0] sm:$0xff]  ;;  %v615_v7 = vld [vmem:[#allocation5 + $0xef0] sm:$0xff]  ;;  %v622_v8 = vld [vmem:[#allocation5 + $0xf28] sm:$0xff] }
 0x1b8   :  { %v628_v9 = vld [vmem:[#allocation5 + $0xf58] sm:$0xff] }
 0x1ba   :  { %3451 = vmatpush1.bf16.msra.mxu0 %v3450_v21  ;;  %v519_v21 = vld [vmem:[#allocation5 + $0xbf0] sm:$0xff] }
 0x1bb   :  { %3453 = vmatprep.subr.bf16.mxu0 %v3452_v27  ;;  %v3486_v49 = vpack.c.bf16 %v519_v21, %v513_v20  ;;  %v3488_v27 = vpack.c.bf16 %v532_v22, %v526_v23  ;;  %v633_v20 = vld [vmem:[#allocation5 + $0xf80] sm:$0xff]  ;;  %v639_v21 = vld [vmem:[#allocation5 + $0xfb0] sm:$0xff]  ;;  %v646_v23 = vld [vmem:[#allocation5 + $0xfe8] sm:$0xff] }
 0x1bc   :  { %v652_v22 = vld [vmem:[#allocation5 + $0x1018] sm:$0xff] }
 0x1be   :  { %3455 = vmatpush1.bf16.msra.mxu0 %v3454_v25  ;;  %v543_v25 = vld [vmem:[#allocation5 + $0xcb0] sm:$0xff] }
 0x1bf   :  { %3457 = vmatprep.subr.bf16.mxu0 %v3456_v36  ;;  %v556_v36 = vld [vmem:[#allocation5 + $0xd18] sm:$0xff]  ;;  %v3494_v39 = vpack.c.bf16 %v543_v25, %v537_v11  ;;  %v657_v11 = vld [vmem:[#allocation5 + $0x1040] sm:$0xff]  ;;  %v663_v25 = vld [vmem:[#allocation5 + $0x1070] sm:$0xff] }
 0x1c0   :  { %v3496_v37 = vpack.c.bf16 %v556_v36, %v550_v35  ;;  %v670_v35 = vld [vmem:[#allocation5 + $0x10a8] sm:$0xff]  ;;  %v676_v36 = vld [vmem:[#allocation5 + $0x10d8] sm:$0xff] }
 0x1c2   :  { %3459 = vmatpush1.bf16.msra.mxu0 %v3458_v41  ;;  %v562_v41 = vld [vmem:[#allocation5 + $0xd48] sm:$0xff] }
 0x1c3   :  { %3461 = vmatprep.subr.bf16.mxu0 %v3460_v42  ;;  %v568_v42 = vld [vmem:[#allocation5 + $0xd78] sm:$0xff] }
 0x1c4   :  { %v3500_v44 = vpack.c.bf16 %v568_v42, %v562_v41  ;;  %v682_v41 = vld [vmem:[#allocation5 + $0x1108] sm:$0xff]  ;;  %v688_v42 = vld [vmem:[#allocation5 + $0x1138] sm:$0xff] }
 0x1c6   :  { %3463 = vmatpush1.bf16.msra.mxu0 %v3462_v47  ;;  %v574_v47 = vld [vmem:[#allocation5 + $0xda8] sm:$0xff] }
 0x1c7   :  { %3465 = vmatprep.subr.bf16.mxu0 %v3464_v48  ;;  %v580_v48 = vld [vmem:[#allocation5 + $0xdd8] sm:$0xff] }
 0x1c8   :  { %v3504_v50 = vpack.c.bf16 %v580_v48, %v574_v47  ;;  %v694_v47 = vld [vmem:[#allocation5 + $0x1168] sm:$0xff]  ;;  %v700_v48 = vld [vmem:[#allocation5 + $0x1198] sm:$0xff] }
 0x1ca   :  { %3467 = vmatpush1.bf16.msra.mxu0 %v3466_v53 }
 0x1cb   :  { %3469 = vmatprep.subr.bf16.mxu0 %v3468_v54  ;;  %v3508_v54 = vpack.c.bf16 %v592_v52, %v586_v51  ;;  %v706_v51 = vld [vmem:[#allocation5 + $0x11c8] sm:$0xff]  ;;  %v712_v52 = vld [vmem:[#allocation5 + $0x11f8] sm:$0xff] }
 0x1ce   :  { %3471 = vmatpush1.bf16.msra.mxu0 %v3470_v60  ;;  %v3510_v60 = vpack.c.bf16 %v591_v57, %v585_v56  ;;  %v705_v56 = vld [vmem:[#allocation5 + $0x11c0] sm:$0xff]  ;;  %v711_v57 = vld [vmem:[#allocation5 + $0x11f0] sm:$0xff] }
 0x1cf   :  { %3473 = vmatprep.subr.bf16.mxu0 %v3472_v62  ;;  %v3512_v62 = vpack.c.bf16 %v604_v59, %v598_v58  ;;  %v718_v58 = vld [vmem:[#allocation5 + $0x1228] sm:$0xff]  ;;  %v724_v59 = vld [vmem:[#allocation5 + $0x1258] sm:$0xff] }
 0x1d2   :  { %3475 = vmatpush1.bf16.msra.mxu0 %v3474_v4  ;;  %v3514_v4 = vpack.c.bf16 %v603_v1, %v597_v0  ;;  %v717_v0 = vld [vmem:[#allocation5 + $0x1220] sm:$0xff]  ;;  %v723_v1 = vld [vmem:[#allocation5 + $0x1250] sm:$0xff] }
 0x1d3   :  { %3477 = vmatprep.subr.bf16.mxu0 %v3476_v5  ;;  %v3516_v5 = vpack.c.bf16 %v616_v3, %v610_v2  ;;  %v1805_v2 = vld [vmem:[#allocation8 + $0x490] sm:$0xff]  ;;  %v1808_v3 = vld [vmem:[#allocation8 + $0x4a8] sm:$0xff] }
 0x1d6   :  { %3479 = vmatpush1.bf16.msra.mxu0 %v3478_v10  ;;  %v3518_v10 = vpack.c.bf16 %v615_v7, %v609_v6  ;;  %v1757_v6 = vld [vmem:[#allocation8 + $0x310] sm:$0xff]  ;;  %v1760_v7 = vld [vmem:[#allocation8 + $0x328] sm:$0xff] }
 0x1d7   :  { %3481 = vmatprep.subr.bf16.mxu0 %v3480_v12  ;;  %v3520_v12 = vpack.c.bf16 %v628_v9, %v622_v8  ;;  %v1811_v8 = vld [vmem:[#allocation8 + $0x4c0] sm:$0xff]  ;;  %v1814_v9 = vld [vmem:[#allocation8 + $0x4d8] sm:$0xff] }
 0x1da   :  { %3483 = vmatpush1.bf16.msra.mxu0 %v3482_v17  ;;  %v3522_v17 = vpack.c.bf16 %v627_v14, %v621_v13  ;;  %v1763_v13 = vld [vmem:[#allocation8 + $0x340] sm:$0xff]  ;;  %v1766_v14 = vld [vmem:[#allocation8 + $0x358] sm:$0xff] }
 0x1db   :  { %3485 = vmatprep.subr.bf16.mxu0 %v3484_v19  ;;  %v3524_v19 = vpack.c.bf16 %v640_v16, %v634_v15  ;;  %v1817_v15 = vld [vmem:[#allocation8 + $0x4f0] sm:$0xff]  ;;  %v1820_v16 = vld [vmem:[#allocation8 + $0x508] sm:$0xff] }
 0x1de   :  { %3487 = vmatpush1.bf16.msra.mxu0 %v3486_v49  ;;  %v3526_v49 = vpack.c.bf16 %v639_v21, %v633_v20  ;;  %v1772_v20 = vld [vmem:[#allocation8 + $0x388] sm:$0xff]  ;;  %v1823_v21 = vld [vmem:[#allocation8 + $0x520] sm:$0xff] }
 0x1df   :  { %3489 = vmatprep.subr.bf16.mxu0 %v3488_v27  ;;  %v3528_v27 = vpack.c.bf16 %v652_v22, %v646_v23  ;;  %v1826_v23 = vld [vmem:[#allocation8 + $0x538] sm:$0xff]  ;;  %v729_v22 = vsub.s32 0, %v4383_v61 }
 0x1e1   :  { %1505 = vmatmul.mubr.f32.vlgmr.msra.gmra.mrb[2].mxu0 %v4403_v26  ;;  %v3502_v26 = vpack.c.bf16 %v567_v46, %v561_v45  ;;  %v681_v45 = vld [vmem:[#allocation5 + $0x1100] sm:$0xff]  ;;  %v687_v46 = vld [vmem:[#allocation5 + $0x1130] sm:$0xff] }
 0x1e2   :  { %3491 = vmatpush1.bf16.msra.mxu0 %v3490_v33  ;;  %1575 = vmatprep.mubr.f32.mxu0 %v4422_v63  ;;  %v579_v63 = vld [vmem:[#allocation5 + $0xdd0] sm:$0xff]  ;;  %v3530_v33 = vpack.c.bf16 %v651_v29, %v645_v28  ;;  %v733_v28 = vsub.s32 1, %v4383_v61  ;;  %v3792_v29 = vpack.c.bf16 %v1826_v23, %v1823_v21  ;;  %v1799_v23 = vld [vmem:[#allocation8 + $0x460] sm:$0xff] }
 0x1e3   :  { %3493 = vmatprep.subr.bf16.mxu0 %v3492_v34  ;;  %v3506_v53 = vpack.c.bf16 %v579_v63, %v573_v32  ;;  %v3532_v34 = vpack.c.bf16 %v664_v31, %v658_v30  ;;  %v693_v32 = vld [vmem:[#allocation5 + $0x1160] sm:$0xff]  ;;  %v699_v63 = vld [vmem:[#allocation5 + $0x1190] sm:$0xff]  ;;  %v741_v31 = vsub.s32 3, %v4383_v61 }
 0x1e4   :  { %v1775_v30 = vld [vmem:[#allocation8 + $0x3a0] sm:$0xff] }
 0x1e6   :  { %3495 = vmatpush1.bf16.msra.mxu0 %v3494_v39  ;;  %v3534_v39 = vpack.c.bf16 %v663_v25, %v657_v11 }
 0x1e7   :  { %3497 = vmatprep.subr.bf16.mxu0 %v3496_v37  ;;  %v3536_v37 = vpack.c.bf16 %v676_v36, %v670_v35 }
 0x1ea   :  { %3499 = vmatpush1.bf16.msra.mxu0 %v3498_v43  ;;  %v3538_v43 = vpack.c.bf16 %v675_v40, %v669_v38  ;;  %v1784_v38 = vld [vmem:[#allocation8 + $0x3e8] sm:$0xff] }
 0x1eb   :  { %3501 = vmatprep.subr.bf16.mxu0 %v3500_v44  ;;  %v3540_v44 = vpack.c.bf16 %v688_v42, %v682_v41  ;;  %v1755_v41 = vld [vmem:[#allocation8 + $0x300] sm:$0xff] }
 0x1ee   :  { %3503 = vmatpush1.bf16.msra.mxu0 %v3502_v26  ;;  %v3542_v26 = vpack.c.bf16 %v687_v46, %v681_v45  ;;  %v1758_v45 = vld [vmem:[#allocation8 + $0x318] sm:$0xff]  ;;  %v1835_v46 = vld [vmem:[#allocation8 + $0x580] sm:$0xff] }
 0x1ef   :  { %3505 = vmatprep.subr.bf16.mxu0 %v3504_v50  ;;  %v3544_v50 = vpack.c.bf16 %v700_v48, %v694_v47  ;;  %v1838_v47 = vld [vmem:[#allocation8 + $0x598] sm:$0xff] }
 0x1f2   :  { %3507 = vmatpush1.bf16.msra.mxu0 %v3506_v53  ;;  %v3546_v53 = vpack.c.bf16 %v699_v63, %v693_v32  ;;  %v1762_v32 = vld [vmem:[#allocation8 + $0x338] sm:$0xff]  ;;  %v1765_v63 = vld [vmem:[#allocation8 + $0x350] sm:$0xff] }
 0x1f3   :  { %3509 = vmatprep.subr.bf16.mxu0 %v3508_v54  ;;  %v3548_v54 = vpack.c.bf16 %v712_v52, %v706_v51  ;;  %v1787_v52 = vld [vmem:[#allocation8 + $0x400] sm:$0xff] }
 0x1f6   :  { %3511 = vmatpush1.bf16.msra.mxu0 %v3510_v60  ;;  %v3550_v60 = vpack.c.bf16 %v711_v57, %v705_v56  ;;  %v3622_v56 = vpack.c.bf16 %v1758_v45, %v1755_v41  ;;  %v3800_v57 = vpack.c.bf16 %v1838_v47, %v1835_v46  ;;  %v1785_v45 = vld [vmem:[#allocation8 + $0x3f0] sm:$0xff]  ;;  %v1788_v46 = vld [vmem:[#allocation8 + $0x408] sm:$0xff] }
 0x1f7   :  { %3513 = vmatprep.subr.bf16.mxu0 %v3512_v62  ;;  %v3552_v62 = vpack.c.bf16 %v724_v59, %v718_v58  ;;  %v1841_v58 = vld [vmem:[#allocation8 + $0x5b0] sm:$0xff]  ;;  %v1844_v59 = vld [vmem:[#allocation8 + $0x5c8] sm:$0xff] }
 0x1f8   :  { %v1792_v47 = vld [vmem:[#allocation8 + $0x428] sm:$0xff] }
 0x1fa   :  { %3515 = vmatpush1.bf16.msra.mxu0 %v3514_v4  ;;  %v3554_v4 = vpack.c.bf16 %v723_v1, %v717_v0  ;;  %v3624_v0 = vpack.c.bf16 %v1765_v63, %v1762_v32  ;;  %v1761_v1 = vld [vmem:[#allocation8 + $0x330] sm:$0xff]  ;;  %v1791_v63 = vld [vmem:[#allocation8 + $0x420] sm:$0xff] }
 0x1fb   :  { %3517 = vmatprep.subr.bf16.mxu0 %v3516_v5  ;;  %v3780_v5 = vpack.c.bf16 %v1808_v3, %v1805_v2  ;;  %v1764_v2 = vld [vmem:[#allocation8 + $0x348] sm:$0xff] }
 0x1fe   :  { %3519 = vmatpush1.bf16.msra.mxu0 %v3518_v10  ;;  %v3782_v10 = vpack.c.bf16 %v1760_v7, %v1757_v6  ;;  %v737_v6 = vsub.s32 2, %v4383_v61  ;;  %v3804_v7 = vpack.c.bf16 %v1844_v59, %v1841_v58  ;;  %v1797_v58 = vld [vmem:[#allocation8 + $0x450] sm:$0xff]  ;;  %v1800_v59 = vld [vmem:[#allocation8 + $0x468] sm:$0xff] }
 0x1ff   :  { %3521 = vmatprep.subr.bf16.mxu0 %v3520_v12  ;;  %v3784_v12 = vpack.c.bf16 %v1814_v9, %v1811_v8  ;;  %v1793_v8 = vld [vmem:[#allocation8 + $0x430] sm:$0xff]  ;;  %v1796_v9 = vld [vmem:[#allocation8 + $0x448] sm:$0xff] }
 0x202   :  { %3523 = vmatpush1.bf16.msra.mxu0 %v3522_v17  ;;  %v3786_v17 = vpack.c.bf16 %v1766_v14, %v1763_v13  ;;  %v1850_v13 = vld [vmem:[#allocation8 + $0x5f8] sm:$0xff] }
 0x203   :  { %3525 = vmatprep.subr.bf16.mxu0 %v3524_v19  ;;  %v1769_v19 = vld [vmem:[#allocation8 + $0x370] sm:$0xff] }
 0x206   :  { %3527 = vmatpush1.bf16.msra.mxu0 %v3526_v49  ;;  %v3790_v49 = vpack.c.bf16 %v1772_v20, %v1769_v19  ;;  %v1777_v19 = vld [vmem:[#allocation8 + $0x3b0] sm:$0xff] }
 0x207   :  { %3529 = vmatprep.subr.bf16.mxu0 %v3528_v27  ;;  %v4450_v27 = vld [vmem:[#allocation7] sm:$0x3f] }
 0x208   :  { %v730_v11 = vrot.slane %v4450_v27, %v729_v22  ;;  %v734_v35 = vrot.slane %v4450_v27, %v733_v28  ;;  %v742_v36 = vrot.slane %v4450_v27, %v741_v31  ;;  %v738_v20 = vrot.slane %v4450_v27, %v737_v6  ;;  %v1776_v31 = vld [vmem:[#allocation8 + $0x3a8] sm:$0xff] }
 0x20a   :  { %3531 = vmatpush1.bf16.msra.mxu0 %v3530_v33  ;;  %v1829_v33 = vld [vmem:[#allocation8 + $0x550] sm:$0xff] }
 0x20b   :  { %3533 = vmatprep.subr.bf16.mxu0 %v3532_v34  ;;  %v1832_v34 = vld [vmem:[#allocation8 + $0x568] sm:$0xff] }
 0x20e   :  { %3535 = vmatpush1.bf16.msra.mxu0 %v3534_v39  ;;  %v3796_v39 = vpack.c.bf16 %v1832_v34, %v1829_v33  ;;  %v1780_v34 = vld [vmem:[#allocation8 + $0x3c8] sm:$0xff] }
 0x20f   :  { %3537 = vmatprep.subr.bf16.mxu0 %v3536_v37  ;;  %v1781_v37 = vld [vmem:[#allocation8 + $0x3d0] sm:$0xff] }
 0x212   :  { %3539 = vmatpush1.bf16.msra.mxu0 %v3538_v43 }
 0x213   :  { %3541 = vmatprep.subr.bf16.mxu0 %v3540_v44 }
 0x216   :  { %3543 = vmatpush1.bf16.msra.mxu0 %v3542_v26 }
 0x217   :  { %3545 = vmatprep.subr.bf16.mxu0 %v3544_v50  ;;  %v3798_v50 = vpack.c.bf16 %v1784_v38, %v1781_v37  ;;  %v1782_v37 = vld [vmem:[#allocation8 + $0x3d8] sm:$0xff] }
 0x218   :  { %v1786_v38 = vld [vmem:[#allocation8 + $0x3f8] sm:$0xff] }
 0x21a   :  { %3547 = vmatpush1.bf16.msra.mxu0 %v3546_v53  ;;  %v1790_v53 = vld [vmem:[#allocation8 + $0x418] sm:$0xff] }
 0x21b   :  { %3549 = vmatprep.subr.bf16.mxu0 %v3548_v54  ;;  %v3802_v3 = vpack.c.bf16 %v1790_v53, %v1787_v52  ;;  %v1798_v52 = vld [vmem:[#allocation8 + $0x458] sm:$0xff]  ;;  %v1801_v53 = vld [vmem:[#allocation8 + $0x470] sm:$0xff] }
 0x21e   :  { %3551 = vmatpush1.bf16.msra.mxu0 %v3550_v60 }
 0x21f   :  { %3553 = vmatprep.subr.bf16.mxu0 %v3552_v62 }
 0x221   :  { %1576 = vmatmul.mubr.f32.vlgmr.msra.gmra.mrb[2].mxu0 %v4417_v55  ;;  %v3788_v55 = vpack.c.bf16 %v1820_v16, %v1817_v15  ;;  %v1767_v15 = vld [vmem:[#allocation8 + $0x360] sm:$0xff]  ;;  %v1770_v16 = vld [vmem:[#allocation8 + $0x378] sm:$0xff] }
 0x222   :  { %3555 = vmatpush1.bf16.msra.mxu0 %v3554_v4  ;;  %1646 = vmatprep.mubr.f32.mxu0 %v4226_v18  ;;  %v1768_v4 = vld [vmem:[#allocation8 + $0x368] sm:$0xff] }
 0x223   :  { %3781 = vmatprep.subr.bf16.mxu0 %v3780_v5  ;;  %v1771_v5 = vld [vmem:[#allocation8 + $0x380] sm:$0xff] }
 0x224   :  { %v3628_v14 = vpack.c.bf16 %v1771_v5, %v1768_v4  ;;  %v1806_v4 = vld [vmem:[#allocation8 + $0x498] sm:$0xff] }
 0x225   :  { %v1810_v5 = vld [vmem:[#allocation8 + $0x4b8] sm:$0xff] }
 0x229   :  { %2721 = vmatmul.mubr.msk.f32.vlgmr.msra.gmra.mrb[2].mxu0 %vm798_vm0, %v4434_v24  ;;  %v1778_v24 = vld [vmem:[#allocation8 + $0x3b8] sm:$0xff] }
 0x22a   :  { %3783 = vmatpush3.bf16.msra.mxu0 %v3782_v10  ;;  %v3794_v25 = vpack.c.bf16 %v1778_v24, %v1775_v30  ;;  %v3626_v10 = vpack.c.bf16 %v1764_v2, %v1761_v1  ;;  %v1773_v24 = vld [vmem:[#allocation8 + $0x390] sm:$0xff]  ;;  %v3650_v1 = vpack.c.bf16 %v1800_v59, %v1797_v58 }
 0x22b   :  { %3785 = vmatprep.subr.bf16.mxu0 %v3784_v12  ;;  %v1847_v12 = vld [vmem:[#allocation8 + $0x5e0] sm:$0xff] }
 0x22c   :  { %v3808_v21 = vpack.c.bf16 %v1850_v13, %v1847_v12  ;;  %v1812_v12 = vld [vmem:[#allocation8 + $0x4c8] sm:$0xff] }
 0x22d   :  { %v1816_v13 = vld [vmem:[#allocation8 + $0x4e8] sm:$0xff] }
 0x22e   :  { %3787 = vmatpush3.bf16.msra.mxu0 %v3786_v17  ;;  %v3806_v17 = vpack.c.bf16 %v1796_v9, %v1793_v8 }
 0x22f   :  { %3789 = vmatprep.subr.bf16.mxu0 %v3788_v55  ;;  %v1774_v55 = vld [vmem:[#allocation8 + $0x398] sm:$0xff] }
 0x230   :  { %v3632_v30 = vpack.c.bf16 %v1777_v19, %v1774_v55  ;;  %v1818_v55 = vld [vmem:[#allocation8 + $0x4f8] sm:$0xff] }
 0x231   :  { %v1822_v19 = vld [vmem:[#allocation8 + $0x518] sm:$0xff] }
 0x232   :  { %3791 = vmatpush3.bf16.msra.mxu0 %v3790_v49  ;;  %v1802_v49 = vld [vmem:[#allocation8 + $0x478] sm:$0xff] }
 0x233   :  { %3793 = vmatprep.subr.bf16.mxu0 %v3792_v29  ;;  %v3630_v29 = vpack.c.bf16 %v1770_v16, %v1767_v15  ;;  %v3810_v33 = vpack.c.bf16 %v1802_v49, %v1799_v23  ;;  %v1821_v49 = vld [vmem:[#allocation8 + $0x510] sm:$0xff] }
 0x234   :  { %v1080_v40 = vpop.f32.mrb[0].mxu0 }
 0x235   :  { %v4461_v42 = vadd.f32 %v1080_v40, %v730_v11  ;;  %v4463_v43 = vpop.f32.mrb[0].mxu1  ;;  %v1082_v44 = vpop.f32.mrb[1].mxu0  ;;  %v1783_v11 = vld [vmem:[#allocation8 + $0x3e0] sm:$0xff]  ;;  %v1789_v40 = vld [vmem:[#allocation8 + $0x410] sm:$0xff] }
 0x236   :  { %3795 = vmatpush3.bf16.msra.mxu0 %v3794_v25  ;;  %v4465_v48 = vadd.f32 %v1082_v44, %v734_v35  ;;  %v1366_v26 = vpop.f32.mrb[1].mxu1  ;;  %v4478_v25 = vadd.f32 %v4463_v43, %v738_v20  ;;  %v3634_v35 = vpack.c.bf16 %v1776_v31, %v1773_v24  ;;  %v3640_v43 = vpack.c.bf16 %v1789_v40, %v1786_v38  ;;  %v1825_v20 = vld [vmem:[#allocation8 + $0x530] sm:$0xff]  ;;  %v1831_v24 = vld [vmem:[#allocation8 + $0x560] sm:$0xff]  ;;  %v1836_v40 = vld [vmem:[#allocation8 + $0x588] sm:$0xff] }
 0x237   :  { %v3927_v51 = vadd.f32 %v1366_v26, %v742_v36  ;;  %3797 = vmatprep.subr.bf16.mxu0 %v3796_v39  ;;  %v1653_v60 = vmax.f32 %v4461_v42, 0.0  ;;  %v3636_v36 = vpack.c.bf16 %v1783_v11, %v1780_v34  ;;  %v1779_v39 = vld [vmem:[#allocation8 + $0x3c0] sm:$0xff]  ;;  %v3664_v23 = vpack.c.bf16 %v1825_v20, %v1822_v19  ;;  %v1830_v11 = vld [vmem:[#allocation8 + $0x558] sm:$0xff]  ;;  %v1833_v38 = vld [vmem:[#allocation8 + $0x570] sm:$0xff] }
 0x238   :  { %v1654_v54 = vmax.f32 %v4465_v48, 0.0  ;;  %v1655_v41 = vmax.f32 %v4478_v25, 0.0  ;;  %v3638_v44 = vpack.c.bf16 %v1782_v37, %v1779_v39  ;;  %v1795_v26 = vld [vmem:[#allocation8 + $0x440] sm:$0xff]  ;;  %v1869_v19 = vld [vmem:[#allocation8 + $0x690] sm:$0xff]  ;;  %v1872_v20 = vld [vmem:[#allocation8 + $0x6a8] sm:$0xff] }
 0x239   :  { %v1656_v62 = vmax.f32 %v3927_v51, 0.0  ;;  %v3644_v32 = vpack.c.bf16 %v1795_v26, %v1792_v47  ;;  %v1794_v51 = vld [vmem:[#allocation8 + $0x438] sm:$0xff]  ;;  %v1827_v34 = vld [vmem:[#allocation8 + $0x540] sm:$0xff]  ;;  %v1928_v42 = vld [vmem:[#allocation8 + $0x868] sm:$0xff] }
 0x23a   :  { %3799 = vmatpush3.bf16.msra.mxu0 %v3798_v50  ;;  %2028 = vmatprep.mubr.f32.mxu1 %v1654_v54  ;;  %v3642_v50 = vpack.c.bf16 %v1788_v46, %v1785_v45  ;;  %v3670_v39 = vpack.c.bf16 %v1830_v11, %v1827_v34  ;;  %v3674_v45 = vpack.c.bf16 %v1836_v40, %v1833_v38  ;;  %v1839_v47 = vld [vmem:[#allocation8 + $0x5a0] sm:$0xff]  ;;  %v1842_v26 = vld [vmem:[#allocation8 + $0x5b8] sm:$0xff]  ;;  %v1881_v34 = vld [vmem:[#allocation8 + $0x6f0] sm:$0xff] }
 0x23b   :  { %2311 = vmatprep.mubr.f32.mxu0 %v1656_v62  ;;  %2029 = vmatmul.mubr.f32.vlgmr.msra.gmra.mrb[2].mxu1 %v1653_v60  ;;  %v1884_v11 = vld [vmem:[#allocation8 + $0x708] sm:$0xff]  ;;  %v1887_v38 = vld [vmem:[#allocation8 + $0x720] sm:$0xff]  ;;  %v1890_v40 = vld [vmem:[#allocation8 + $0x738] sm:$0xff] }
 0x23c   :  { %3623 = vmatpush1.bf16.msra.mxu1 %v3622_v56  ;;  %3801 = vmatprep.subr.bf16.mxu0 %v3800_v57  ;;  %v3646_v56 = vpack.c.bf16 %v1794_v51, %v1791_v63  ;;  %v3648_v57 = vpack.c.bf16 %v1801_v53, %v1798_v52  ;;  %v3678_v63 = vpack.c.bf16 %v1842_v26, %v1839_v47  ;;  %v1845_v52 = vld [vmem:[#allocation8 + $0x5d0] sm:$0xff]  ;;  %v1848_v53 = vld [vmem:[#allocation8 + $0x5e8] sm:$0xff] }
 0x23d   :  { %2099 = vmatprep.mubr.f32.mxu1 %v1656_v62  ;;  %3625 = vmatprep.subr.bf16.mxu1 %v3624_v0  ;;  %v1804_v62 = vld [vmem:[#allocation8 + $0x488] sm:$0xff]  ;;  %v1807_v0 = vld [vmem:[#allocation8 + $0x4a0] sm:$0xff]  ;;  %v3682_v58 = vpack.c.bf16 %v1848_v53, %v1845_v52  ;;  %v1893_v47 = vld [vmem:[#allocation8 + $0x750] sm:$0xff] }
 0x23e   :  { %3803 = vmatpush3.bf16.msra.mxu0 %v3802_v3  ;;  %v3652_v2 = vpack.c.bf16 %v1807_v0, %v1804_v62  ;;  %v1803_v3 = vld [vmem:[#allocation8 + $0x480] sm:$0xff]  ;;  %v1854_v0 = vld [vmem:[#allocation8 + $0x618] sm:$0xff]  ;;  %v1896_v26 = vld [vmem:[#allocation8 + $0x768] sm:$0xff] }
 0x23f   :  { %3805 = vmatprep.subr.bf16.mxu0 %v3804_v7  ;;  %v1813_v7 = vld [vmem:[#allocation8 + $0x4d0] sm:$0xff]  ;;  %v3654_v8 = vpack.c.bf16 %v1806_v4, %v1803_v3  ;;  %v1851_v62 = vld [vmem:[#allocation8 + $0x600] sm:$0xff]  ;;  %v1902_v53 = vld [vmem:[#allocation8 + $0x798] sm:$0xff] }
 0x240   :  { %3627 = vmatpush1.bf16.msra.mxu1 %v3626_v10  ;;  %v3656_v9 = vpack.c.bf16 %v1813_v7, %v1810_v5  ;;  %v1809_v10 = vld [vmem:[#allocation8 + $0x4b0] sm:$0xff]  ;;  %v3686_v3 = vpack.c.bf16 %v1854_v0, %v1851_v62  ;;  %v1860_v7 = vld [vmem:[#allocation8 + $0x648] sm:$0xff]  ;;  %v1899_v52 = vld [vmem:[#allocation8 + $0x780] sm:$0xff] }
 0x241   :  { %3629 = vmatprep.subr.bf16.mxu1 %v3628_v14  ;;  %v1819_v14 = vld [vmem:[#allocation8 + $0x500] sm:$0xff]  ;;  %v3658_v15 = vpack.c.bf16 %v1812_v12, %v1809_v10  ;;  %v1857_v5 = vld [vmem:[#allocation8 + $0x630] sm:$0xff]  ;;  %v1908_v0 = vld [vmem:[#allocation8 + $0x7c8] sm:$0xff] }
 0x242   :  { %3807 = vmatpush3.bf16.msra.mxu0 %v3806_v17  ;;  %v3660_v16 = vpack.c.bf16 %v1819_v14, %v1816_v13  ;;  %v1815_v17 = vld [vmem:[#allocation8 + $0x4e0] sm:$0xff]  ;;  %v3690_v10 = vpack.c.bf16 %v1860_v7, %v1857_v5  ;;  %v1866_v14 = vld [vmem:[#allocation8 + $0x678] sm:$0xff]  ;;  %v1905_v62 = vld [vmem:[#allocation8 + $0x7b0] sm:$0xff] }
 0x243   :  { %3809 = vmatprep.subr.bf16.mxu0 %v3808_v21  ;;  %v3662_v21 = vpack.c.bf16 %v1818_v55, %v1815_v17  ;;  %v1863_v13 = vld [vmem:[#allocation8 + $0x660] sm:$0xff]  ;;  %v1914_v7 = vld [vmem:[#allocation8 + $0x7f8] sm:$0xff] }
 0x244   :  { %3631 = vmatpush1.bf16.msra.mxu1 %v3630_v29  ;;  %v1824_v29 = vld [vmem:[#allocation8 + $0x528] sm:$0xff]  ;;  %v3694_v17 = vpack.c.bf16 %v1866_v14, %v1863_v13  ;;  %v1911_v5 = vld [vmem:[#allocation8 + $0x7e0] sm:$0xff]  ;;  %v1917_v13 = vld [vmem:[#allocation8 + $0x810] sm:$0xff] }
 0x245   :  { %3633 = vmatprep.subr.bf16.mxu1 %v3632_v30  ;;  %v1828_v30 = vld [vmem:[#allocation8 + $0x548] sm:$0xff]  ;;  %v3666_v31 = vpack.c.bf16 %v1824_v29, %v1821_v49  ;;  %v3698_v49 = vpack.c.bf16 %v1872_v20, %v1869_v19  ;;  %v1878_v29 = vld [vmem:[#allocation8 + $0x6d8] sm:$0xff]  ;;  %v1923_v19 = vld [vmem:[#allocation8 + $0x840] sm:$0xff] }
 0x246   :  { %3811 = vmatpush3.bf16.msra.mxu0 %v3810_v33  ;;  %v3668_v33 = vpack.c.bf16 %v1831_v24, %v1828_v30  ;;  %v1882_v30 = vld [vmem:[#allocation8 + $0x6f8] sm:$0xff]  ;;  %v1885_v24 = vld [vmem:[#allocation8 + $0x710] sm:$0xff]  ;;  %v1920_v14 = vld [vmem:[#allocation8 + $0x828] sm:$0xff] }
 0x247   :  { %v1926_v20 = vld [vmem:[#allocation8 + $0x858] sm:$0xff] }
 0x248   :  { %3635 = vmatpush1.bf16.msra.mxu1 %v3634_v35  ;;  %v1834_v35 = vld [vmem:[#allocation8 + $0x578] sm:$0xff] }
 0x249   :  { %2312 = vmatmul.mubr.f32.vlgmr.msra.gmra.mrb[4].mxu0 %v1655_v41  ;;  %3637 = vmatprep.subr.bf16.mxu1 %v3636_v36  ;;  %v1837_v36 = vld [vmem:[#allocation8 + $0x590] sm:$0xff] }
 0x24a   :  { %v3672_v37 = vpack.c.bf16 %v1837_v36, %v1834_v35  ;;  %v1888_v35 = vld [vmem:[#allocation8 + $0x728] sm:$0xff]  ;;  %v1891_v36 = vld [vmem:[#allocation8 + $0x740] sm:$0xff] }
 0x24c   :  { %3639 = vmatpush1.bf16.msra.mxu1 %v3638_v44  ;;  %v1840_v44 = vld [vmem:[#allocation8 + $0x5a8] sm:$0xff] }
 0x24d   :  { %3641 = vmatprep.subr.bf16.mxu1 %v3640_v43  ;;  %v1843_v43 = vld [vmem:[#allocation8 + $0x5c0] sm:$0xff] }
 0x24e   :  { %v3676_v46 = vpack.c.bf16 %v1843_v43, %v1840_v44  ;;  %v1894_v44 = vld [vmem:[#allocation8 + $0x758] sm:$0xff]  ;;  %v1897_v43 = vld [vmem:[#allocation8 + $0x770] sm:$0xff] }
 0x250   :  { %3643 = vmatpush1.bf16.msra.mxu1 %v3642_v50  ;;  %v1846_v50 = vld [vmem:[#allocation8 + $0x5d8] sm:$0xff] }
 0x251   :  { %3645 = vmatprep.subr.bf16.mxu1 %v3644_v32  ;;  %v1849_v32 = vld [vmem:[#allocation8 + $0x5f0] sm:$0xff] }
 0x252   :  { %v3680_v51 = vpack.c.bf16 %v1849_v32, %v1846_v50  ;;  %v1900_v50 = vld [vmem:[#allocation8 + $0x788] sm:$0xff]  ;;  %v1903_v32 = vld [vmem:[#allocation8 + $0x7a0] sm:$0xff] }
 0x254   :  { %3647 = vmatpush1.bf16.msra.mxu1 %v3646_v56  ;;  %v1852_v56 = vld [vmem:[#allocation8 + $0x608] sm:$0xff] }
 0x255   :  { %3649 = vmatprep.subr.bf16.mxu1 %v3648_v57  ;;  %v1855_v57 = vld [vmem:[#allocation8 + $0x620] sm:$0xff] }
 0x256   :  { %v3684_v59 = vpack.c.bf16 %v1855_v57, %v1852_v56  ;;  %v1906_v56 = vld [vmem:[#allocation8 + $0x7b8] sm:$0xff]  ;;  %v1909_v57 = vld [vmem:[#allocation8 + $0x7d0] sm:$0xff] }
 0x258   :  { %3651 = vmatpush1.bf16.msra.mxu1 %v3650_v1  ;;  %v1858_v1 = vld [vmem:[#allocation8 + $0x638] sm:$0xff] }
 0x259   :  { %3653 = vmatprep.subr.bf16.mxu1 %v3652_v2  ;;  %v1861_v2 = vld [vmem:[#allocation8 + $0x650] sm:$0xff] }
 0x25a   :  { %v3688_v4 = vpack.c.bf16 %v1861_v2, %v1858_v1  ;;  %v1912_v1 = vld [vmem:[#allocation8 + $0x7e8] sm:$0xff]  ;;  %v1915_v2 = vld [vmem:[#allocation8 + $0x800] sm:$0xff] }
 0x25c   :  { %3655 = vmatpush1.bf16.msra.mxu1 %v3654_v8  ;;  %v1864_v8 = vld [vmem:[#allocation8 + $0x668] sm:$0xff] }
 0x25d   :  { %3657 = vmatprep.subr.bf16.mxu1 %v3656_v9  ;;  %v1867_v9 = vld [vmem:[#allocation8 + $0x680] sm:$0xff] }
 0x25e   :  { %v3692_v12 = vpack.c.bf16 %v1867_v9, %v1864_v8  ;;  %v1918_v8 = vld [vmem:[#allocation8 + $0x818] sm:$0xff]  ;;  %v1921_v9 = vld [vmem:[#allocation8 + $0x830] sm:$0xff] }
 0x260   :  { %3659 = vmatpush1.bf16.msra.mxu1 %v3658_v15  ;;  %v1870_v15 = vld [vmem:[#allocation8 + $0x698] sm:$0xff] }
 0x261   :  { %3661 = vmatprep.subr.bf16.mxu1 %v3660_v16  ;;  %v1873_v16 = vld [vmem:[#allocation8 + $0x6b0] sm:$0xff] }
 0x262   :  { %v3696_v55 = vpack.c.bf16 %v1873_v16, %v1870_v15  ;;  %v1924_v15 = vld [vmem:[#allocation8 + $0x848] sm:$0xff]  ;;  %v1927_v16 = vld [vmem:[#allocation8 + $0x860] sm:$0xff] }
 0x264   :  { %3663 = vmatpush1.bf16.msra.mxu1 %v3662_v21  ;;  %v1876_v21 = vld [vmem:[#allocation8 + $0x6c8] sm:$0xff] }
 0x265   :  { %3665 = vmatprep.subr.bf16.mxu1 %v3664_v23  ;;  %v1879_v23 = vld [vmem:[#allocation8 + $0x6e0] sm:$0xff] }
 0x266   :  { %v3700_v25 = vpack.c.bf16 %v1879_v23, %v1876_v21  ;;  %v1930_v21 = vld [vmem:[#allocation8 + $0x878] sm:$0xff]  ;;  %v1933_v23 = vld [vmem:[#allocation8 + $0x890] sm:$0xff] }
 0x268   :  { %3667 = vmatpush1.bf16.msra.mxu1 %v3666_v31 }
 0x269   :  { %3669 = vmatprep.subr.bf16.mxu1 %v3668_v33  ;;  %v3704_v33 = vpack.c.bf16 %v1885_v24, %v1882_v30  ;;  %v1936_v30 = vld [vmem:[#allocation8 + $0x8a8] sm:$0xff]  ;;  %v1939_v24 = vld [vmem:[#allocation8 + $0x8c0] sm:$0xff] }
 0x26c   :  { %3671 = vmatpush1.bf16.msra.mxu1 %v3670_v39  ;;  %v3706_v39 = vpack.c.bf16 %v1884_v11, %v1881_v34  ;;  %v1935_v34 = vld [vmem:[#allocation8 + $0x8a0] sm:$0xff]  ;;  %v1938_v11 = vld [vmem:[#allocation8 + $0x8b8] sm:$0xff] }
 0x26d   :  { %3673 = vmatprep.subr.bf16.mxu1 %v3672_v37  ;;  %v3708_v37 = vpack.c.bf16 %v1891_v36, %v1888_v35  ;;  %v1942_v35 = vld [vmem:[#allocation8 + $0x8d8] sm:$0xff]  ;;  %v1945_v36 = vld [vmem:[#allocation8 + $0x8f0] sm:$0xff] }
 0x270   :  { %3675 = vmatpush1.bf16.msra.mxu1 %v3674_v45  ;;  %v3710_v45 = vpack.c.bf16 %v1890_v40, %v1887_v38  ;;  %v1941_v38 = vld [vmem:[#allocation8 + $0x8d0] sm:$0xff]  ;;  %v1944_v40 = vld [vmem:[#allocation8 + $0x8e8] sm:$0xff] }
 0x271   :  { %3677 = vmatprep.subr.bf16.mxu1 %v3676_v46  ;;  %v3712_v46 = vpack.c.bf16 %v1897_v43, %v1894_v44  ;;  %v1709_v44 = vld [vmem:[#allocation8 + $0x190] sm:$0xff]  ;;  %v1712_v43 = vld [vmem:[#allocation8 + $0x1a8] sm:$0xff] }
 0x274   :  { %3679 = vmatpush1.bf16.msra.mxu1 %v3678_v63  ;;  %v3714_v63 = vpack.c.bf16 %v1896_v26, %v1893_v47  ;;  %v2406_v47 = vld [vmem:[#allocation11 + $0x80] sm:$0xff]  ;;  %v2407_v26 = vld [vmem:[#allocation11 + $0x88] sm:$0xff] }
 0x275   :  { %3681 = vmatprep.subr.bf16.mxu1 %v3680_v51  ;;  %v3716_v51 = vpack.c.bf16 %v1903_v32, %v1900_v50  ;;  %v2390_v50 = vld [vmem:[#allocation11] sm:$0xff]  ;;  %v3844_v32 = vpack.c.bf16 %v2407_v26, %v2406_v47 }
 0x276   :  { %v1667_v26 = vld [vmem:[#allocation8 + $0x40] sm:$0xff] }
 0x277   :  { %3845 = vmatprep.subr.bf16.mxu0 %v3844_v32  ;;  %v1724_v32 = vld [vmem:[#allocation8 + $0x208] sm:$0xff] }
 0x278   :  { %3683 = vmatpush1.bf16.msra.mxu1 %v3682_v58  ;;  %v3718_v58 = vpack.c.bf16 %v1902_v53, %v1899_v52  ;;  %v2409_v52 = vld [vmem:[#allocation11 + $0x98] sm:$0xff] }
 0x279   :  { %3685 = vmatprep.subr.bf16.mxu1 %v3684_v59  ;;  %v3720_v59 = vpack.c.bf16 %v1909_v57, %v1906_v56  ;;  %v2392_v57 = vld [vmem:[#allocation11 + $0x10] sm:$0xff] }
 0x27b   :  { %2100 = vmatmul.mubr.f32.vlgmr.msra.gmra.mrb[2].mxu1 %v1655_v41  ;;  %v1875_v41 = vld [vmem:[#allocation8 + $0x6c0] sm:$0xff] }
 0x27c   :  { %3687 = vmatpush1.bf16.msra.mxu1 %v3686_v3  ;;  %v3702_v31 = vpack.c.bf16 %v1878_v29, %v1875_v41  ;;  %v3722_v3 = vpack.c.bf16 %v1908_v0, %v1905_v62  ;;  %v1929_v41 = vld [vmem:[#allocation8 + $0x870] sm:$0xff]  ;;  %v1932_v29 = vld [vmem:[#allocation8 + $0x888] sm:$0xff] }
 0x27d   :  { %3689 = vmatprep.subr.bf16.mxu1 %v3688_v4  ;;  %v3724_v4 = vpack.c.bf16 %v1915_v2, %v1912_v1  ;;  %v2411_v62 = vld [vmem:[#allocation11 + $0xa8] sm:$0xff]  ;;  %v2394_v2 = vld [vmem:[#allocation11 + $0x20] sm:$0xff] }
 0x280   :  { %3691 = vmatpush1.bf16.msra.mxu1 %v3690_v10  ;;  %v3726_v10 = vpack.c.bf16 %v1914_v7, %v1911_v5  ;;  %v2413_v5 = vld [vmem:[#allocation11 + $0xb8] sm:$0xff] }
 0x281   :  { %3693 = vmatprep.subr.bf16.mxu1 %v3692_v12  ;;  %v3728_v12 = vpack.c.bf16 %v1921_v9, %v1918_v8  ;;  %v2396_v9 = vld [vmem:[#allocation11 + $0x30] sm:$0xff] }
 0x284   :  { %3695 = vmatpush1.bf16.msra.mxu1 %v3694_v17  ;;  %v3730_v17 = vpack.c.bf16 %v1920_v14, %v1917_v13  ;;  %v2415_v13 = vld [vmem:[#allocation11 + $0xc8] sm:$0xff] }
 0x285   :  { %3697 = vmatprep.subr.bf16.mxu1 %v3696_v55  ;;  %v3732_v55 = vpack.c.bf16 %v1927_v16, %v1924_v15  ;;  %v2398_v16 = vld [vmem:[#allocation11 + $0x40] sm:$0xff] }
 0x288   :  { %3699 = vmatpush1.bf16.msra.mxu1 %v3698_v49  ;;  %v3734_v49 = vpack.c.bf16 %v1926_v20, %v1923_v19  ;;  %v2417_v19 = vld [vmem:[#allocation11 + $0xd8] sm:$0xff] }
 0x289   :  { %3701 = vmatprep.subr.bf16.mxu1 %v3700_v25  ;;  %v3736_v25 = vpack.c.bf16 %v1933_v23, %v1930_v21  ;;  %v2400_v23 = vld [vmem:[#allocation11 + $0x50] sm:$0xff] }
 0x28c   :  { %3703 = vmatpush1.bf16.msra.mxu1 %v3702_v31  ;;  %v3738_v31 = vpack.c.bf16 %v1932_v29, %v1929_v41  ;;  %v2419_v41 = vld [vmem:[#allocation11 + $0xe8] sm:$0xff] }
 0x28d   :  { %3705 = vmatprep.subr.bf16.mxu1 %v3704_v33  ;;  %v3740_v33 = vpack.c.bf16 %v1939_v24, %v1936_v30  ;;  %v745_v24 = vsub.s32 4, %v4383_v61 }
 0x290   :  { %3707 = vmatpush1.bf16.msra.mxu1 %v3706_v39  ;;  %v3742_v39 = vpack.c.bf16 %v1938_v11, %v1935_v34 }
 0x291   :  { %3709 = vmatprep.subr.bf16.mxu1 %v3708_v37  ;;  %v3744_v37 = vpack.c.bf16 %v1945_v36, %v1942_v35 }
 0x294   :  { %3711 = vmatpush1.bf16.msra.mxu1 %v3710_v45  ;;  %v3746_v45 = vpack.c.bf16 %v1944_v40, %v1941_v38  ;;  %v1715_v40 = vld [vmem:[#allocation8 + $0x1c0] sm:$0xff] }
 0x295   :  { %3713 = vmatprep.subr.bf16.mxu1 %v3712_v46  ;;  %v3748_v46 = vpack.c.bf16 %v1712_v43, %v1709_v44  ;;  %v1718_v44 = vld [vmem:[#allocation8 + $0x1d8] sm:$0xff] }
 0x296   :  { %v3752_v47 = vpack.c.bf16 %v1718_v44, %v1715_v40 }
 0x298   :  { %3715 = vmatpush1.bf16.msra.mxu1 %v3714_v63  ;;  %v2391_v63 = vld [vmem:[#allocation11 + $0x8] sm:$0xff] }
 0x299   :  { %3717 = vmatprep.subr.bf16.mxu1 %v3716_v51  ;;  %v2408_v51 = vld [vmem:[#allocation11 + $0x90] sm:$0xff]  ;;  %v3846_v53 = vpack.c.bf16 %v2391_v63, %v2390_v50 }
 0x29a   :  { %v3848_v56 = vpack.c.bf16 %v2409_v52, %v2408_v51  ;;  %v1670_v50 = vld [vmem:[#allocation8 + $0x58] sm:$0xff]  ;;  %v1673_v52 = vld [vmem:[#allocation8 + $0x70] sm:$0xff] }
 0x29b   :  { %3847 = vmatpush3.bf16.msra.mxu0 %v3846_v53  ;;  %v3754_v63 = vpack.c.bf16 %v1670_v50, %v1667_v26  ;;  %v1676_v53 = vld [vmem:[#allocation8 + $0x88] sm:$0xff]  ;;  %v1913_v26 = vld [vmem:[#allocation8 + $0x7f0] sm:$0xff] }
 0x29c   :  { %3719 = vmatpush1.bf16.msra.mxu1 %v3718_v58  ;;  %v2393_v58 = vld [vmem:[#allocation11 + $0x18] sm:$0xff]  ;;  %3849 = vmatprep.subr.bf16.mxu0 %v3848_v56  ;;  %v1916_v50 = vld [vmem:[#allocation8 + $0x808] sm:$0xff] }
 0x29d   :  { %3721 = vmatprep.subr.bf16.mxu1 %v3720_v59  ;;  %v2410_v59 = vld [vmem:[#allocation11 + $0xa0] sm:$0xff]  ;;  %v3850_v0 = vpack.c.bf16 %v2393_v58, %v2392_v57  ;;  %v1730_v57 = vld [vmem:[#allocation8 + $0x238] sm:$0xff]  ;;  %v3758_v58 = vpack.c.bf16 %v1676_v53, %v1673_v52 }
 0x29e   :  { %v3852_v1 = vpack.c.bf16 %v2411_v62, %v2410_v59  ;;  %v1727_v56 = vld [vmem:[#allocation8 + $0x220] sm:$0xff]  ;;  %v1922_v53 = vld [vmem:[#allocation8 + $0x838] sm:$0xff] }
 0x29f   :  { %3851 = vmatpush3.bf16.msra.mxu0 %v3850_v0  ;;  %v3760_v59 = vpack.c.bf16 %v1730_v57, %v1727_v56  ;;  %v1679_v62 = vld [vmem:[#allocation8 + $0xa0] sm:$0xff]  ;;  %v1682_v0 = vld [vmem:[#allocation8 + $0xb8] sm:$0xff] }
 0x2a0   :  { %3723 = vmatpush1.bf16.msra.mxu1 %v3722_v3  ;;  %v2395_v3 = vld [vmem:[#allocation11 + $0x28] sm:$0xff]  ;;  %3853 = vmatprep.subr.bf16.mxu0 %v3852_v1  ;;  %v1919_v52 = vld [vmem:[#allocation8 + $0x820] sm:$0xff] }
 0x2a1   :  { %3725 = vmatprep.subr.bf16.mxu1 %v3724_v4  ;;  %v2412_v4 = vld [vmem:[#allocation11 + $0xb0] sm:$0xff]  ;;  %v3854_v7 = vpack.c.bf16 %v2395_v3, %v2394_v2  ;;  %v1736_v2 = vld [vmem:[#allocation8 + $0x268] sm:$0xff]  ;;  %v3762_v3 = vpack.c.bf16 %v1682_v0, %v1679_v62  ;;  %v3824_v57 = vpack.c.bf16 %v1922_v53, %v1919_v52 }
 0x2a2   :  { %v3856_v8 = vpack.c.bf16 %v2413_v5, %v2412_v4  ;;  %v1733_v1 = vld [vmem:[#allocation8 + $0x250] sm:$0xff]  ;;  %v1688_v4 = vld [vmem:[#allocation8 + $0xe8] sm:$0xff]  ;;  %v1739_v5 = vld [vmem:[#allocation8 + $0x280] sm:$0xff] }
 0x2a3   :  { %3855 = vmatpush3.bf16.msra.mxu0 %v3854_v7  ;;  %v3764_v48 = vpack.c.bf16 %v1736_v2, %v1733_v1  ;;  %v1742_v7 = vld [vmem:[#allocation8 + $0x298] sm:$0xff]  ;;  %v1925_v62 = vld [vmem:[#allocation8 + $0x850] sm:$0xff]  ;;  %v1880_v0 = vld [vmem:[#allocation8 + $0x6e8] sm:$0xff] }
 0x2a4   :  { %3727 = vmatpush1.bf16.msra.mxu1 %v3726_v10  ;;  %v2397_v10 = vld [vmem:[#allocation11 + $0x38] sm:$0xff]  ;;  %3857 = vmatprep.subr.bf16.mxu0 %v3856_v8  ;;  %v2434_v53 = vld [vmem:[#allocation11 + $0x160] sm:$0xff] }
 0x2a5   :  { %3729 = vmatprep.subr.bf16.mxu1 %v3728_v12  ;;  %v2414_v12 = vld [vmem:[#allocation11 + $0xc0] sm:$0xff]  ;;  %v3858_v14 = vpack.c.bf16 %v2397_v10, %v2396_v9  ;;  %v3768_v9 = vpack.c.bf16 %v1742_v7, %v1739_v5  ;;  %v1934_v2 = vld [vmem:[#allocation8 + $0x898] sm:$0xff]  ;;  %v1937_v5 = vld [vmem:[#allocation8 + $0x8b0] sm:$0xff] }
 0x2a6   :  { %v3860_v15 = vpack.c.bf16 %v2415_v13, %v2414_v12  ;;  %v1691_v10 = vld [vmem:[#allocation8 + $0x100] sm:$0xff]  ;;  %v1694_v12 = vld [vmem:[#allocation8 + $0x118] sm:$0xff]  ;;  %v1745_v13 = vld [vmem:[#allocation8 + $0x2b0] sm:$0xff] }
 0x2a7   :  { %3859 = vmatpush3.bf16.msra.mxu0 %v3858_v14  ;;  %v1748_v14 = vld [vmem:[#allocation8 + $0x2c8] sm:$0xff]  ;;  %v1931_v1 = vld [vmem:[#allocation8 + $0x880] sm:$0xff] }
 0x2a8   :  { %3731 = vmatpush1.bf16.msra.mxu1 %v3730_v17  ;;  %v2399_v17 = vld [vmem:[#allocation11 + $0x48] sm:$0xff]  ;;  %3861 = vmatprep.subr.bf16.mxu0 %v3860_v15  ;;  %v3770_v15 = vpack.c.bf16 %v1694_v12, %v1691_v10 }
 0x2a9   :  { %3733 = vmatprep.subr.bf16.mxu1 %v3732_v55  ;;  %v2416_v55 = vld [vmem:[#allocation11 + $0xd0] sm:$0xff]  ;;  %v3862_v20 = vpack.c.bf16 %v2399_v17, %v2398_v16  ;;  %v3772_v16 = vpack.c.bf16 %v1748_v14, %v1745_v13  ;;  %v1940_v7 = vld [vmem:[#allocation8 + $0x8c8] sm:$0xff]  ;;  %v1943_v13 = vld [vmem:[#allocation8 + $0x8e0] sm:$0xff] }
 0x2aa   :  { %v3864_v21 = vpack.c.bf16 %v2417_v19, %v2416_v55  ;;  %v1697_v17 = vld [vmem:[#allocation8 + $0x130] sm:$0xff]  ;;  %v1700_v55 = vld [vmem:[#allocation8 + $0x148] sm:$0xff]  ;;  %v1751_v19 = vld [vmem:[#allocation8 + $0x2e0] sm:$0xff] }
 0x2ab   :  { %3863 = vmatpush3.bf16.msra.mxu0 %v3862_v20  ;;  %v1754_v20 = vld [vmem:[#allocation8 + $0x2f8] sm:$0xff]  ;;  %v1889_v10 = vld [vmem:[#allocation8 + $0x730] sm:$0xff]  ;;  %v1892_v12 = vld [vmem:[#allocation8 + $0x748] sm:$0xff] }
 0x2ac   :  { %3735 = vmatpush1.bf16.msra.mxu1 %v3734_v49  ;;  %v2401_v49 = vld [vmem:[#allocation11 + $0x58] sm:$0xff]  ;;  %3865 = vmatprep.subr.bf16.mxu0 %v3864_v21  ;;  %v3774_v21 = vpack.c.bf16 %v1700_v55, %v1697_v17 }
 0x2ad   :  { %3737 = vmatprep.subr.bf16.mxu1 %v3736_v25  ;;  %v2418_v25 = vld [vmem:[#allocation11 + $0xe0] sm:$0xff]  ;;  %v3866_v29 = vpack.c.bf16 %v2401_v49, %v2400_v23  ;;  %v3776_v23 = vpack.c.bf16 %v1754_v20, %v1751_v19  ;;  %v1946_v14 = vld [vmem:[#allocation8 + $0x8f8] sm:$0xff] }
 0x2ae   :  { %v3868_v30 = vpack.c.bf16 %v2419_v41, %v2418_v25  ;;  %v1703_v49 = vld [vmem:[#allocation8 + $0x160] sm:$0xff]  ;;  %v1706_v25 = vld [vmem:[#allocation8 + $0x178] sm:$0xff]  ;;  %v1901_v41 = vld [vmem:[#allocation8 + $0x790] sm:$0xff] }
 0x2af   :  { %3867 = vmatpush3.bf16.msra.mxu0 %v3866_v29  ;;  %v1904_v29 = vld [vmem:[#allocation8 + $0x7a8] sm:$0xff]  ;;  %v1895_v17 = vld [vmem:[#allocation8 + $0x760] sm:$0xff]  ;;  %v1898_v55 = vld [vmem:[#allocation8 + $0x778] sm:$0xff] }
 0x2b0   :  { %3739 = vmatpush1.bf16.msra.mxu1 %v3738_v31  ;;  %3869 = vmatprep.subr.bf16.mxu0 %v3868_v30  ;;  %v749_v31 = vsub.s32 5, %v4383_v61  ;;  %v3842_v19 = vpack.c.bf16 %v1898_v55, %v1895_v17  ;;  %v2402_v20 = vld [vmem:[#allocation11 + $0x60] sm:$0xff]  ;;  %v2587_v61 = vld [vmem:[%s4615_s7 + $0x8] sm:$0xff] }
 0x2b1   :  { %3741 = vmatprep.subr.bf16.mxu1 %v3740_v33  ;;  %v746_v33 = vrot.slane %v4450_v27, %v745_v24  ;;  %v3778_v24 = vpack.c.bf16 %v1706_v25, %v1703_v49  ;;  %v2420_v49 = vld [vmem:[#allocation11 + $0xf0] sm:$0xff]  ;;  %v2421_v25 = vld [vmem:[#allocation11 + $0xf8] sm:$0xff] }
 0x2b2   :  { %v750_v34 = vrot.slane %v4450_v27, %v749_v31  ;;  %v1721_v27 = vld [vmem:[#allocation8 + $0x1f0] sm:$0xff] }
 0x2b3   :  { %v3756_v51 = vpack.c.bf16 %v1724_v32, %v1721_v27  ;;  %v3820_v32 = vpack.c.bf16 %v1916_v50, %v1913_v26  ;;  %v2430_v50 = vld [vmem:[#allocation11 + $0x140] sm:$0xff]  ;;  %v2591_v17 = vld [vmem:[%s4615_s7 + $0x28] sm:$0xff] }
 0x2b4   :  { %3743 = vmatpush1.bf16.msra.mxu1 %v3742_v39  ;;  %v1661_v39 = vld [vmem:[#allocation8 + $0x10] sm:$0xff] }
 0x2b5   :  { %3745 = vmatprep.subr.bf16.mxu1 %v3744_v37  ;;  %v1664_v37 = vld [vmem:[#allocation8 + $0x28] sm:$0xff] }
 0x2b8   :  { %3747 = vmatpush1.bf16.msra.mxu1 %v3746_v45  ;;  %v3750_v45 = vpack.c.bf16 %v1664_v37, %v1661_v39  ;;  %v1907_v39 = vld [vmem:[#allocation8 + $0x7c0] sm:$0xff]  ;;  %v1910_v37 = vld [vmem:[#allocation8 + $0x7d8] sm:$0xff] }
 0x2b9   :  { %3749 = vmatprep.subr.bf16.mxu1 %v3748_v46  ;;  %v3816_v44 = vpack.c.bf16 %v1910_v37, %v1907_v39  ;;  %v2426_v37 = vld [vmem:[#allocation11 + $0x120] sm:$0xff] }
 0x2fc   :  { %v1648_v11 = vpop.f32.mrb[2].mxu0 }
 0x2fd   :  { %v4489_v35 = vadd.f32 %v1648_v11, %v746_v33  ;;  %v1650_v36 = vpop.f32.mrb[3].mxu0  ;;  %v3812_v33 = vpack.c.bf16 %v1904_v29, %v1901_v41  ;;  %v1856_v11 = vld [vmem:[#allocation8 + $0x628] sm:$0xff]  ;;  %v3872_v41 = vpack.c.bf16 %v2421_v25, %v2420_v49  ;;  %v2404_v29 = vld [vmem:[#allocation11 + $0x70] sm:$0xff] }
 0x2fe   :  { %v4491_v38 = vadd.f32 %v1650_v36, %v750_v34  ;;  %v1853_v34 = vld [vmem:[#allocation8 + $0x610] sm:$0xff] }
 0x2ff   :  { %v1657_v46 = vmax.f32 %v4489_v35, 0.0  ;;  %v3814_v40 = vpack.c.bf16 %v1856_v11, %v1853_v34  ;;  %v2424_v34 = vld [vmem:[#allocation11 + $0x110] sm:$0xff]  ;;  %v4227_v11 = vmov 0.0|0.0  }
 0x300   :  { %v1658_v43 = vmax.f32 %v4491_v38, 0.0  ;;  %v3828_v38 = vpack.c.bf16 %v1928_v42, %v1925_v62  ;;  %v1947_v42 = vld [vmem:[#allocation10] sm:$0x7]  ;;  %v2595_v49 = vld [vmem:[%s4615_s7 + $0x48] sm:$0xff] }
 0x302   :  { %2170 = vmatprep.mubr.f32.mxu1 %v1658_v43 }
 0x303   :  { %2171 = vmatmul.mubr.f32.vlgmr.msra.gmra.mrb[2].mxu1 %v1657_v46 }
 0x304   :  { %3751 = vmatpush3.bf16.msra.mxu1 %v3750_v45  ;;  %2241 = vmatprep.mubr.f32.mxu1 %v1654_v54  ;;  %v1685_v54 = vld [vmem:[#allocation8 + $0xd0] sm:$0xff]  ;;  %v1859_v45 = vld [vmem:[#allocation8 + $0x640] sm:$0xff] }
 0x305   :  { %3753 = vmatprep.subr.bf16.mxu1 %v3752_v47  ;;  %v3766_v8 = vpack.c.bf16 %v1688_v4, %v1685_v54  ;;  %v1862_v47 = vld [vmem:[#allocation8 + $0x658] sm:$0xff]  ;;  %v1883_v54 = vld [vmem:[#allocation8 + $0x700] sm:$0xff] }
 0x306   :  { %v3818_v27 = vpack.c.bf16 %v1862_v47, %v1859_v45  ;;  %v1886_v4 = vld [vmem:[#allocation8 + $0x718] sm:$0xff] }
 0x307   :  { %v2428_v45 = vld [vmem:[#allocation11 + $0x130] sm:$0xff]  ;;  %v2429_v47 = vld [vmem:[#allocation11 + $0x138] sm:$0xff] }
 0x308   :  { %3755 = vmatpush3.bf16.msra.mxu1 %v3754_v63  ;;  %v1865_v63 = vld [vmem:[#allocation8 + $0x670] sm:$0xff]  ;;  %v3886_v26 = vpack.c.bf16 %v2429_v47, %v2428_v45 }
 0x309   :  { %3757 = vmatprep.subr.bf16.mxu1 %v3756_v51  ;;  %v1868_v51 = vld [vmem:[#allocation8 + $0x688] sm:$0xff] }
 0x30a   :  { %v3822_v56 = vpack.c.bf16 %v1868_v51, %v1865_v63  ;;  %v2432_v63 = vld [vmem:[#allocation11 + $0x150] sm:$0xff]  ;;  %v2433_v51 = vld [vmem:[#allocation11 + $0x158] sm:$0xff] }
 0x30b   :  { %v3892_v52 = vpack.c.bf16 %v2433_v51, %v2432_v63 }
 0x30c   :  { %3759 = vmatpush3.bf16.msra.mxu1 %v3758_v58  ;;  %v1871_v58 = vld [vmem:[#allocation8 + $0x6a0] sm:$0xff] }
 0x30d   :  { %3761 = vmatprep.subr.bf16.mxu1 %v3760_v59  ;;  %v1874_v59 = vld [vmem:[#allocation8 + $0x6b8] sm:$0xff] }
 0x310   :  { %3763 = vmatpush3.bf16.msra.mxu1 %v3762_v3 }
 0x311   :  { %3765 = vmatprep.subr.bf16.mxu1 %v3764_v48  ;;  %v3832_v48 = vpack.c.bf16 %v1934_v2, %v1931_v1 }
 0x314   :  { %3767 = vmatpush3.bf16.msra.mxu1 %v3766_v8  ;;  %v3834_v8 = vpack.c.bf16 %v1886_v4, %v1883_v54  ;;  %v1960_v4 = vrot.slane %v1947_v42, %v737_v6 }
 0x315   :  { %3769 = vmatprep.subr.bf16.mxu1 %v3768_v9  ;;  %v3836_v9 = vpack.c.bf16 %v1940_v7, %v1937_v5 }
 0x318   :  { %3771 = vmatpush3.bf16.msra.mxu1 %v3770_v15  ;;  %v3838_v15 = vpack.c.bf16 %v1892_v12, %v1889_v10 }
 0x319   :  { %3773 = vmatprep.subr.bf16.mxu1 %v3772_v16  ;;  %v3840_v16 = vpack.c.bf16 %v1946_v14, %v1943_v13  ;;  %v2586_v14 = vld [vmem:[%s4615_s7] sm:$0xff] }
 0x31a   :  { %v3901_v6 = vpack.c.bf16 %v2587_v61, %v2586_v14 }
 0x31c   :  { %3775 = vmatpush3.bf16.msra.mxu1 %v3774_v21  ;;  %v2791_v30 = vpop.f32.mrb[4].mxu0  ;;  %v2403_v21 = vld [vmem:[#allocation11 + $0x68] sm:$0xff] }
 0x31d   :  { %v2792_v31 = vpop.f32.mrb[5].mxu0  ;;  %3777 = vmatprep.subr.bf16.mxu1 %v3776_v23  ;;  %v3870_v23 = vpack.c.bf16 %v2403_v21, %v2402_v20  ;;  %v2593_v20 = vld [vmem:[%s4615_s7 + $0x38] sm:$0xff] }
 0x31e   :  { %v4501_v36 = vadd.f32 %v2792_v31, %v2791_v30  ;;  %v2405_v30 = vld [vmem:[#allocation11 + $0x78] sm:$0xff]  ;;  %v2422_v31 = vld [vmem:[#allocation11 + $0x100] sm:$0xff] }
 0x31f   :  { %3871 = vmatpush3.bf16.msra.mxu0 %v3870_v23  ;;  %v2594_v23 = vld [vmem:[%s4615_s7 + $0x40] sm:$0xff] }
 0x320   :  { %3779 = vmatpush3.bf16.msra.mxu1 %v3778_v24  ;;  %v3874_v24 = vpack.c.bf16 %v2405_v30, %v2404_v29  ;;  %3873 = vmatprep.subr.bf16.mxu0 %v3872_v41  ;;  %v3913_v25 = vpack.c.bf16 %v2595_v49, %v2594_v23  ;;  %v2596_v41 = vld [vmem:[%s4615_s7 + $0x50] sm:$0xff]  ;;  %v2597_v29 = vld [vmem:[%s4615_s7 + $0x58] sm:$0xff] }
 0x321   :  { %3813 = vmatprep.subr.bf16.mxu1 %v3812_v33  ;;  %v2423_v33 = vld [vmem:[#allocation11 + $0x108] sm:$0xff]  ;;  %v3916_v30 = vpack.c.bf16 %v2597_v29, %v2596_v41 }
 0x322   :  { %v3877_v35 = vpack.c.bf16 %v2423_v33, %v2422_v31  ;;  %v2599_v31 = vld [vmem:[%s4615_s7 + $0x68] sm:$0xff] }
 0x323   :  { %2242 = vmatmul.mubr.f32.vlgmr.msra.gmra.mrb[4].mxu1 %v1653_v60  ;;  %v3826_v60 = vpack.c.bf16 %v1874_v59, %v1871_v58  ;;  %3875 = vmatpush3.bf16.msra.mxu0 %v3874_v24  ;;  %v2436_v58 = vld [vmem:[#allocation11 + $0x170] sm:$0xff]  ;;  %v2437_v59 = vld [vmem:[#allocation11 + $0x178] sm:$0xff]  ;;  %v2598_v24 = vld [vmem:[%s4615_s7 + $0x60] sm:$0xff] }
 0x324   :  { %3815 = vmatpush3.bf16.msra.mxu1 %v3814_v40  ;;  %2381 = vmatprep.mubr.f32.mxu1 %v1658_v43  ;;  %v1877_v43 = vld [vmem:[#allocation8 + $0x6d0] sm:$0xff]  ;;  %v3898_v62 = vpack.c.bf16 %v2437_v59, %v2436_v58  ;;  %v3919_v33 = vpack.c.bf16 %v2599_v31, %v2598_v24 }
 0x325   :  { %3817 = vmatprep.subr.bf16.mxu1 %v3816_v44  ;;  %v3830_v3 = vpack.c.bf16 %v1880_v0, %v1877_v43  ;;  %3900 = vmatprep.subr.bf16.mxu0 %v4227_v11  ;;  %v2427_v40 = vld [vmem:[#allocation11 + $0x128] sm:$0xff] }
 0x326   :  { %v3883_v44 = vpack.c.bf16 %v2427_v40, %v2426_v37 }
 0x328   :  { %3819 = vmatpush3.bf16.msra.mxu1 %v3818_v27  ;;  %v2431_v27 = vld [vmem:[#allocation11 + $0x148] sm:$0xff] }
 0x329   :  { %3821 = vmatprep.subr.bf16.mxu1 %v3820_v32  ;;  %v3889_v32 = vpack.c.bf16 %v2431_v27, %v2430_v50 }
 0x32c   :  { %3823 = vmatpush3.bf16.msra.mxu1 %v3822_v56  ;;  %v2435_v56 = vld [vmem:[#allocation11 + $0x168] sm:$0xff] }
 0x32d   :  { %3825 = vmatprep.subr.bf16.mxu1 %v3824_v57  ;;  %v3895_v57 = vpack.c.bf16 %v2435_v56, %v2434_v53 }
 0x330   :  { %3827 = vmatpush3.bf16.msra.mxu1 %v3826_v60  ;;  %v1952_v60 = vrot.slane %v1947_v42, %v729_v22 }
 0x331   :  { %3829 = vmatprep.subr.bf16.mxu1 %v3828_v38  ;;  %v1956_v38 = vrot.slane %v1947_v42, %v733_v28 }
 0x334   :  { %3831 = vmatpush3.bf16.msra.mxu1 %v3830_v3 }
 0x335   :  { %3833 = vmatprep.subr.bf16.mxu1 %v3832_v48 }
 0x338   :  { %3835 = vmatpush3.bf16.msra.mxu1 %v3834_v8 }
 0x339   :  { %3837 = vmatprep.subr.bf16.mxu1 %v3836_v9 }
 0x33c   :  { %3839 = vmatpush3.bf16.msra.mxu1 %v3838_v15 }
 0x33d   :  { %3841 = vmatprep.subr.bf16.mxu1 %v3840_v16  ;;  %v2590_v16 = vld [vmem:[%s4615_s7 + $0x20] sm:$0xff] }
 0x33e   :  { %v3907_v55 = vpack.c.bf16 %v2591_v17, %v2590_v16 }
 0x340   :  { %3843 = vmatpush3.bf16.msra.mxu1 %v3842_v19  ;;  %v2592_v19 = vld [vmem:[%s4615_s7 + $0x30] sm:$0xff] }
 0x341   :  { %3876 = vmatprep.subr.bf16.mxu1 %v4227_v11  ;;  %v3910_v21 = vpack.c.bf16 %v2593_v20, %v2592_v19 }
 0x343   :  { %2382 = vmatmul.mubr.f32.vlgmr.msra.gmra.mrb[6].mxu1 %v1657_v46  ;;  %v2425_v46 = vld [vmem:[#allocation11 + $0x118] sm:$0xff] }
 0x344   :  { %3878 = vmatpush3.bf16.msra.mxu1 %v3877_v35  ;;  %v3880_v39 = vpack.c.bf16 %v2425_v46, %v2424_v34  ;;  %2930 = vmatprep.mubr.msk.f32.mxu1 %vm4228_vm1, %v4226_v18  ;;  %v2600_v34 = vld [vmem:[%s4615_s7 + $0x70] sm:$0xff]  ;;  %v2601_v35 = vld [vmem:[%s4615_s7 + $0x78] sm:$0xff] }
 0x345   :  { %3879 = vmatprep.subr.bf16.mxu1 %v4227_v11  ;;  %v3922_v46 = vpack.c.bf16 %v2601_v35, %v2600_v34 }
 0x348   :  { %3881 = vmatpush3.bf16.msra.mxu1 %v3880_v39 }
 0x349   :  { %3882 = vmatprep.subr.bf16.mxu1 %v4227_v11 }
 0x34c   :  { %3884 = vmatpush3.bf16.msra.mxu1 %v3883_v44  ;;  %v2722_v44 = vld [vmem:[#allocation13] ss:$0 sm:$0xff] }
 0x34d   :  { %3885 = vmatprep.subr.bf16.mxu1 %v4227_v11 }
 0x350   :  { %3887 = vmatpush3.bf16.msra.mxu1 %v3886_v26 }
 0x351   :  { %3888 = vmatprep.subr.bf16.mxu1 %v4227_v11 }
 0x354   :  { %3890 = vmatpush3.bf16.msra.mxu1 %v3889_v32 }
 0x355   :  { %3891 = vmatprep.subr.bf16.mxu1 %v4227_v11 }
 0x358   :  { %3893 = vmatpush3.bf16.msra.mxu1 %v3892_v52 }
 0x359   :  { %3894 = vmatprep.subr.bf16.mxu1 %v4227_v11 }
 0x35c   :  { %3896 = vmatpush3.bf16.msra.mxu1 %v3895_v57 }
 0x35d   :  { %3897 = vmatprep.subr.bf16.mxu1 %v4227_v11 }
 0x360   :  { %3899 = vmatpush3.bf16.msra.mxu1 %v3898_v62 }
 0x3d6   :  { %v2172_v43 = vpop.f32.mrb[2].mxu1 }
 0x3d7   :  { %v3930_v0 = vadd.f32 %v2172_v43, %v1952_v60  ;;  %v2174_v1 = vpop.f32.mrb[3].mxu1 }
 0x3d8   :  { %v3931_v2 = vadd.f32 %v2174_v1, %v1956_v38 }
 0x3d9   :  { %v2387_v48 = vmax.f32 %v3930_v0, 0.0 }
 0x3da   :  { %v2388_v3 = vmax.f32 %v3931_v2, 0.0 }
 0x3dc   :  { %2509 = vmatprep.mubr.f32.mxu0 %v2388_v3 }
 0x3dd   :  { %2510 = vmatmul.mubr.f32.vlgmr.msra.gmra.mrb[6].mxu0 %v2387_v48 }
 0x3de   :  { %2965 = vmatprep.mubr.msk.f32.mxu0 %vm4228_vm1, %v4226_v18  ;;  %v2588_v18 = vld [vmem:[%s4615_s7 + $0x10] sm:$0xff]  ;;  %3902 = vmatpush3.bf16.msra.mxu0 %v3901_v6 }
 0x3df   :  { %3903 = vmatprep.subr.bf16.mxu0 %v4227_v11 }
 0x3f6   :  { %v2756_v54 = vpop.f32.mrb[4].mxu1 }
 0x3f7   :  { %v2757_v5 = vpop.f32.mrb[5].mxu1 }
 0x3f8   :  { %v2758_v7 = vadd.f32 %v2757_v5, %v2756_v54 }
 0x3fa   :  { %v2244_v22 = vadd.f32 %v2758_v7, %v1960_v4 }
 0x3fc   :  { %v2314_v8 = vadd.f32 %v4501_v36, %v2244_v22  ;;  %v2589_v36 = vld [vmem:[%s4615_s7 + $0x18] sm:$0xff]  ;;  %s4230_s7 = smov 120  }
 0x3fd   :  { %v3904_v15 = vpack.c.bf16 %v2589_v36, %v2588_v18 }
 0x3ff   :  { %3905 = vmatpush3.bf16.msra.mxu0 %v3904_v15 }
 0x400   :  { %3906 = vmatprep.subr.bf16.mxu0 %v4227_v11 }
 0x403   :  { %3908 = vmatpush3.bf16.msra.mxu0 %v3907_v55 }
 0x404   :  { %3909 = vmatprep.subr.bf16.mxu0 %v4227_v11 }
 0x407   :  { %3911 = vmatpush3.bf16.msra.mxu0 %v3910_v21 }
 0x408   :  { %3912 = vmatprep.subr.bf16.mxu0 %v4227_v11 }
 0x40b   :  { %3914 = vmatpush3.bf16.msra.mxu0 %v3913_v25 }
 0x40c   :  { %3915 = vmatprep.subr.bf16.mxu0 %v4227_v11 }
 0x40f   :  { %3917 = vmatpush3.bf16.msra.mxu0 %v3916_v30 }
 0x410   :  { %3918 = vmatprep.subr.bf16.mxu0 %v4227_v11 }
 0x413   :  { %3920 = vmatpush3.bf16.msra.mxu0 %v3919_v33 }
 0x414   :  { %3921 = vmatprep.subr.bf16.mxu0 %v4227_v11  ;;  %v2723_v11 = vld [vmem:[#allocation14] ss:$0 sm:$0xff] }
 0x416   :  { %v2826_v28 = vpop.f32.mrb[6].mxu1 }
 0x417   :  { %v2827_v9 = vpop.f32.mrb[7].mxu1  ;;  %3923 = vmatpush3.bf16.msra.mxu0 %v3922_v46 }
 0x418   :  { %v2828_v10 = vadd.f32 %v2827_v9, %v2826_v28 }
 0x41a   :  { %v2384_v12 = vadd.f32 %v2828_v10, %v2314_v8 }
 0x41c   :  { %v2389_v13 = vmax.f32 %v2384_v12, 0.0 }
 0x41e   :  { %2931 = vmatmul.mubr.f32.vlgmr.msra.gmra.mrb[8].mxu1 %v2389_v13 }
 0x4b0   :  { %v2861_v39 = vpop.f32.mrb[6].mxu0 }
 0x4b1   :  { %v2862_v37 = vpop.f32.mrb[7].mxu0 }
 0x4b2   :  { %v2863_v40 = vadd.f32 %v2862_v37, %v2861_v39 }
 0x4b4   :  { %v2512_v45 = vadd.f32 %v2863_v40, %v2722_v44 }
 0x4f1   :  { %v2581_v47 = vpop.f32.mrb[8].mxu1 }
 0x4f2   :  { %v2582_v26 = vadd.f32 %v2581_v47, %v2512_v45  ;;  %v2932_v50 = vpop.f32.mrb[9].mxu1 }
 0x4f4   :  { %v2585_v27 = vmax.f32 %v2582_v26, 0.0 }
 0x4f6   :  { %2966 = vmatmul.mubr.f32.vlgmr.msra.gmra.mrb[8].mxu0 %v2585_v27 }
 0x5c9   :  { %v2675_v32 = vpop.f32.mrb[8].mxu0 }
 0x5ca   :  { %v2676_v63 = vadd.f32 %v2723_v11, %v2675_v32  ;;  %v2967_v51 = vpop.f32.mrb[9].mxu0 }
 0x5cc   :  { %2682 = vrot.lane.b32.xlu0 %v2676_v63, %s4230_s7  ;;  %2680 = vst.msk [vmem:[#allocation16] sm:$0x3] %vm2679_vm2, %v2676_v63 }
 0x5cd   :  { %4164 = shalt.err (!%p4161_p12)
}
 0x5ce   :  { %s4165_s3 = scalar_lea.hbm %s4617_s9, 32 }
 0x5cf   :  { %p4166_p13 = scmp.ne.s32.totalorder %s4617_s9, %s4165_s3  ;;  %p4169_p0 = scmp.lt.u32.totalorder %s4165_s3, %s4617_s9 }
 0x5d1   :  { %p4171_p1 = pnand %p4169_p0, %p4166_p13 }
 0x5d3   :  { %4174 = shalt.err (!%p4171_p1)
}
 0x5d4   :  { %2695 = dma.vmem_to_hbm [thread:$0]  %s2693_s26, 32, %s4617_s9, [#allocation4]  }
 0x5d5   :  { %s4231_s15 = smov [#allocation17]  }
 0x5d6   :  { %s2702_s16 = sshll.u32 %s4231_s15, 4  ;;  %s2703_s16 = int_to_ptr.vmem [resolvable:$true] %s2702_s16 }
 0x5d7   :  { %s4175_s14 = scalar_lea.vmem %s2703_s16, 32  ;;  %p4180_p3 = scmp.lt.s32.totalorder %s2703_s16, %s2703_s16 }
 0x5d8   :  { %p4176_p2 = scmp.ne.s32.totalorder %s2703_s16, %s4175_s14  ;;  %p4181_p4 = scmp.lt.s32.totalorder %s4175_s14, %s4175_s14 }
 0x5da   :  { %p4182_p5 = por %p4181_p4, %p4180_p3 }
 0x5dc   :  { %p4183_p6 = pnand %p4182_p5, %p4176_p2 }
 0x63e   :  { %v2683_v52 = vpop.permute.xlu0 %2682 }
 0x63f   :  { %2685 = vst.msk [vmem:[#allocation17] sm:$0x3] %vm2679_vm2, %v2683_v52 }
 0x640   :  { %4186 = shalt.err (!%p4183_p6)
}
 0x641   :  { %s4187_s20 = scalar_lea.hbm %s4618_s10, 32 }
 0x642   :  { %p4188_p7 = scmp.ne.s32.totalorder %s4618_s10, %s4187_s20  ;;  %p4191_p8 = scmp.lt.u32.totalorder %s4187_s20, %s4618_s10 }
 0x644   :  { %p4193_p9 = pnand %p4191_p8, %p4188_p7 }
 0x646   :  { %4196 = shalt.err (!%p4193_p9)
}
 0x647   :  { %2705 = dma.vmem_to_hbm [thread:$0]  %s2703_s16, 32, %s4618_s10, [#allocation18]  }
 0x648   :  { %4207 = dma.done.wait [#allocation4], 32  }
 0x649   :  { %4208 = vsyncadd [#allocation4], 4294967264 }
 0x64a   :  { %4209 = dma.done.wait [#allocation18], 32  }
 0x64b   :  { %4210 = vsyncadd [#allocation18], 4294967264 }
 0x64c   :  { %2712 = vsyncpa [#allocation3], 1 }
 0x64d   :  { %2713 = vsyncpa [#allocation6], 1 }
 0x64e   :  { %2714 = vsyncpa [#allocation9], 1 }
 0x64f   :  { %2715 = vsyncpa [#allocation12], 1 }
 0x650   :  { %2716 = vsyncpa [#allocation15], 1 }
 0x651   :  { %2717 = vsyncpa [#allocation4], 1 }
 0x652   :  { %2718 = vsyncpa [#allocation18], 1 }

</bundles_post_ra>
